<compile_context>
chip_gen: v6e
topology: v6e:2x2x1
jax: 0.10.0
libtpu: 0.0.40
codegen_flags: <defaults>
</compile_context>

<pallas_src>
import math
import functools

import jax
import jax.numpy as jnp
from jax.experimental import pallas as pl
from jax.experimental.pallas import tpu as pltpu


_CPAD = 16  # pad channel counts to a multiple of the bf16 sublane tile


def _cpad(c):
    return ((c + _CPAD - 1) // _CPAD) * _CPAD


# ----------------------------------------------------------------------------
# helpers matching the PyTorch reference (cheap glue, plain JAX, NCHW)
# ----------------------------------------------------------------------------
def _size_map(shape_hw, height):
    size = list(shape_hw)
    sizes = {}
    for h in range(1, height):
        sizes[h] = tuple(size)
        size = [math.ceil(w / 2) for w in size]
    return sizes


def maxpool2_ceil(x):
    """MaxPool2d(2, stride=2, ceil_mode=True) on NCHW."""
    n, c, h, w = x.shape
    ph, pw = (-h) % 2, (-w) % 2
    if ph or pw:
        x = jnp.pad(x, ((0, 0), (0, 0), (0, ph), (0, pw)),
                    constant_values=-jnp.inf)
    h2, w2 = x.shape[2] // 2, x.shape[3] // 2
    return x.reshape(n, c, h2, 2, w2, 2).max(axis=(3, 5))


def _interp_matrix(in_size, out_size):
    """Dense 1-D bilinear interpolation matrix (align_corners=False)."""
    scale = in_size / out_size
    coords = jnp.maximum(
        (jnp.arange(out_size, dtype=jnp.float32) + 0.5) * scale - 0.5, 0.0)
    lo = jnp.floor(coords)
    hi = jnp.minimum(lo + 1.0, float(in_size - 1))
    frac = coords - lo
    src = jnp.arange(in_size, dtype=jnp.float32)[None, :]
    return ((src == lo[:, None]).astype(jnp.float32) * (1.0 - frac[:, None])
            + (src == hi[:, None]).astype(jnp.float32) * frac[:, None])


def upsample_bilinear(x, out_hw):
    """nn.Upsample(size, mode='bilinear', align_corners=False) as two dense
    interpolation matmuls (no advanced-indexing gathers)."""
    n, c, h, w = x.shape
    oh, ow = int(out_hw[0]), int(out_hw[1])
    if (oh, ow) == (h, w):
        return x
    my = _interp_matrix(h, oh)        # (oh, h)
    mx = _interp_matrix(w, ow)        # (ow, w)
    y = jnp.einsum('oh,nchw,pw->ncop', my, x.astype(jnp.float32), mx)
    return y.astype(x.dtype)


# ----------------------------------------------------------------------------
# Pallas kernel: fused [concat] + 3x3 dilated conv + folded eval-BN + ReLU
# ----------------------------------------------------------------------------
def _rebnconv_kernel(*refs, H, W, d, cps, ccatp, coutp):
    # refs = (*x_refs, w_ref, b_ref, o_ref, xp_ref, cols_ref)
    #   x_refs[i] : (1, cps[i], H*W)     bf16 activation (lane-dense, Cpad'ed)
    #   w_ref     : (coutp, 9*ccatp)     bf16 weight, BN scale folded in,
    #                                    column index = tap*ccatp + channel
    #   b_ref     : (coutp, 1)           f32 folded conv-bias + BN shift
    #   o_ref     : (1, coutp, H*W)      bf16 output
    #   xp_ref    : (ccatp, H*W + 2*PAD) bf16 zero-haloed flat staging scratch
    #   cols_ref  : (9*ccatp, H*W)       bf16 im2col operand scratch
    n_in = len(cps)
    x_refs = refs[:n_in]
    w_ref, b_ref, o_ref, xp_ref, cols_ref = refs[n_in:]

    HW = H * W
    PAD = d * (W + 1)

    # Halo gutters re-zeroed each step (cheap; see header comment on why a
    # pl.when(program_id==0) one-time init is unsafe with a parallel axis).
    zero_halo = jnp.zeros((ccatp, PAD), jnp.bfloat16)
    xp_ref[:, :PAD] = zero_halo
    xp_ref[:, PAD + HW:] = zero_halo

    # Stage the (channel-concatenated) inputs into the haloed bf16 scratch.
    # This fuses the decoder torch.cat((x2, x1), 1) and the conv zero-padding
    # entirely in VMEM; all slab offsets are multiples of 16 (tile aligned).
    c0 = 0
    for xr, cp in zip(x_refs, cps):
        xp_ref[c0:c0 + cp, PAD:PAD + HW] = xr[0]
        c0 += cp

    # Two hoisted row-wrap masks, reused by the 6 taps with dx != 0.
    col = jax.lax.broadcasted_iota(jnp.int32, (ccatp, HW), 1) % W
    mask_l = col >= d          # valid for dx = -d
    mask_r = col < (W - d)     # valid for dx = +d
    zeros = jnp.zeros((ccatp, HW), jnp.bfloat16)

    # im2col: assemble the 9 shifted windows into one (9*ccatp, HW) operand.
    t = 0
    for ky in range(3):
        dy = (ky - 1) * d
        for kx in range(3):
            dx = (kx - 1) * d
            off = dy * W + dx
            window = xp_ref[:, PAD + off:PAD + off + HW]
            if dx < 0:
                window = jnp.where(mask_l, window, zeros)
            elif dx > 0:
                window = jnp.where(mask_r, window, zeros)
            cols_ref[t * ccatp:(t + 1) * ccatp, :] = window
            t += 1

    # Single bf16 x bf16 -> f32 MXU matmul: (coutp, 9*ccatp) @ (9*ccatp, HW).
    acc = jnp.dot(w_ref[...], cols_ref[...],
                  preferred_element_type=jnp.float32)

    # BN scale already folded into the weights; bias + ReLU epilogue in f32.
    y = jnp.maximum(acc + b_ref[...], 0.0)
    o_ref[0] = y.astype(o_ref.dtype)


def rebnconv(xs, params, dilate=1):
    """Fused (channel-concat of xs) -> Conv3x3(dilate, pad=dilate) -> BN -> ReLU.

    xs: tuple of NCHW bf16 arrays with channel counts already padded to 16.
    Returns NCHW bfloat16 with padded output channels (exact zeros).
    """
    wt, bias = params                               # (CoutP, 9*CcatP) bf16, (CoutP,1) f32
    N, _, H, W = xs[0].shape
    HW = H * W
    cps = tuple(int(x.shape[1]) for x in xs)
    ccatp = sum(cps)
    coutp = int(wt.shape[0])
    assert int(wt.shape[1]) == 9 * ccatp, (wt.shape, cps)
    PAD = dilate * (W + 1)

    # Lane-dense flattening; activations are already bf16.
    x_flat = [x.reshape(N, cp, HW).astype(jnp.bfloat16)
              for x, cp in zip(xs, cps)]

    kernel = functools.partial(_rebnconv_kernel, H=H, W=W, d=dilate,
                               cps=cps, ccatp=ccatp, coutp=coutp)

    flops = 2 * N * coutp * 9 * ccatp * HW
    bytes_accessed = (2 * N * HW * (ccatp + coutp)   # bf16 activations in/out
                      + 2 * coutp * 9 * ccatp        # bf16 weights
                      + 4 * coutp)                   # f32 bias

    # Explicit VMEM budget: scratch + double-buffered in/out blocks + weights.
    scratch_bytes = 2 * (ccatp * (HW + 2 * PAD) + 9 * ccatp * HW)
    block_bytes = 2 * HW * (ccatp + coutp)
    weight_bytes = 2 * coutp * 9 * ccatp + 4 * coutp
    vmem_limit = int(min(100 << 20,
                         max(32 << 20,
                             2 * (scratch_bytes + 2 * block_bytes + weight_bytes))))

    in_specs = (
        [pl.BlockSpec((1, cp, HW), lambda n: (n, 0, 0)) for cp in cps]
        + [pl.BlockSpec((coutp, 9 * ccatp), lambda n: (0, 0)),   # resident
           pl.BlockSpec((coutp, 1), lambda n: (0, 0))]           # resident
    )

    out = pl.pallas_call(
        kernel,
        out_shape=jax.ShapeDtypeStruct((N, coutp, HW), jnp.bfloat16),
        grid_spec=pltpu.PrefetchScalarGridSpec(
            num_scalar_prefetch=0,
            grid=(N,),
            in_specs=in_specs,
            out_specs=pl.BlockSpec((1, coutp, HW), lambda n: (n, 0, 0)),
            scratch_shapes=[
                pltpu.VMEM((ccatp, HW + 2 * PAD), jnp.bfloat16),
                pltpu.VMEM((9 * ccatp, HW), jnp.bfloat16),
            ],
        ),
        compiler_params=pltpu.CompilerParams(
            dimension_semantics=("parallel",),
            vmem_limit_bytes=vmem_limit),
        cost_estimate=pl.CostEstimate(flops=flops, transcendentals=0,
                                      bytes_accessed=bytes_accessed),
    )(*x_flat, wt, bias)
    return out.reshape(N, coutp, H, W)


# ----------------------------------------------------------------------------
# Parameter construction (deterministic, synthetic)
# ----------------------------------------------------------------------------
def make_rebnconv_params(key, cins, cout):
    """Conv(sum(cins)->cout, 3x3) + eval-mode BN, prepacked for the kernel."""
    cin_total = sum(cins)
    kw, kb = jax.random.split(key)
    w = jax.random.normal(kw, (cout, cin_total, 3, 3), jnp.float32) * 0.1  # OIHW
    conv_b = jax.random.normal(kb, (cout,), jnp.float32) * 0.1
    # fresh BatchNorm2d (eval): gamma=1, beta=0, running_mean=0, running_var=1
    gamma = jnp.ones((cout,), jnp.float32)
    beta = jnp.zeros((cout,), jnp.float32)
    mean = jnp.zeros((cout,), jnp.float32)
    var = jnp.ones((cout,), jnp.float32)
    eps = 1e-5
    scale = gamma / jnp.sqrt(var + eps)
    bias = (conv_b - mean) * scale + beta

    coutp = _cpad(cout)
    # Split along Cin per concat input, zero-pad each input's Cin to the
    # padded activation layout, fold the BN scale, pad Cout, and flatten to
    # the kernel's (CoutP, 9*CcatP) layout: column = (ky*3+kx)*CcatP + c.
    pieces, c0 = [], 0
    for c in cins:
        wi = w[:, c0:c0 + c]
        wi = jnp.pad(wi, ((0, 0), (0, _cpad(c) - c), (0, 0), (0, 0)))
        pieces.append(wi)
        c0 += c
    wcat = jnp.concatenate(pieces, axis=1) * scale[:, None, None, None]
    wcat = jnp.pad(wcat, ((0, coutp - cout), (0, 0), (0, 0), (0, 0)))
    ccatp = wcat.shape[1]
    wt = jnp.transpose(wcat, (0, 2, 3, 1)).reshape(coutp, 9 * ccatp)
    bias_p = jnp.pad(bias, (0, coutp - cout)).reshape(coutp, 1)
    return (wt.astype(jnp.bfloat16), bias_p.astype(jnp.float32))


def init_rsu_params(key, height, in_ch, mid_ch, out_ch, dilated=False):
    params = {}
    keys = jax.random.split(key, 2 * height)
    k = iter(keys)
    params['rebnconvin'] = make_rebnconv_params(next(k), (in_ch,), out_ch)
    params['rebnconv1'] = make_rebnconv_params(next(k), (out_ch,), mid_ch)
    params['rebnconv1d'] = make_rebnconv_params(next(k), (mid_ch, mid_ch), out_ch)
    for i in range(2, height):
        params[f'rebnconv{i}'] = make_rebnconv_params(next(k), (mid_ch,), mid_ch)
        params[f'rebnconv{i}d'] = make_rebnconv_params(next(k), (mid_ch, mid_ch), mid_ch)
    params[f'rebnconv{height}'] = make_rebnconv_params(next(k), (mid_ch,), mid_ch)
    return params


def _dilate_of(name, height, dilated):
    """Dilation of each REBNCONV, mirroring RSU._make_layers."""
    if name in ('rebnconvin', 'rebnconv1', 'rebnconv1d'):
        return 1
    i = int(name.replace('rebnconv', '').rstrip('d'))
    if i == height:
        return 2 if not dilated else 2 ** (height - 1)
    return 1 if not dilated else 2 ** (i - 1)


# ----------------------------------------------------------------------------
# RSU forward (mirrors the PyTorch recursion exactly)
# ----------------------------------------------------------------------------
def rsu_forward(x_nchw, params, height, dilated, out_ch):
    N, C, H, W = x_nchw.shape
    x = jnp.pad(x_nchw, ((0, 0), (0, _cpad(C) - C), (0, 0), (0, 0)))
    x = x.astype(jnp.bfloat16)                      # NCHW, bf16, padded channels
    sizes = _size_map((H, W), height)

    def apply(name, *inputs):
        d = _dilate_of(name, height, dilated)
        return rebnconv(inputs, params[name], dilate=d)

    xin = apply('rebnconvin', x)

    def unet(xx, h=1):
        if h >= height:
            return apply(f'rebnconv{h}', xx)
        x1 = apply(f'rebnconv{h}', xx)
        if (not dilated) and h < height - 1:
            x2 = unet(maxpool2_ceil(x1), h + 1)
        else:
            x2 = unet(x1, h + 1)
        # torch.cat((x2, x1), 1) is fused into the decoder conv kernel.
        xd = apply(f'rebnconv{h}d', x2, x1)
        if (not dilated) and h > 1:
            return upsample_bilinear(xd, sizes[h - 1])
        return xd

    # residual add in f32, then drop the zero padding channels
    out = xin.astype(jnp.float32) + unet(xin).astype(jnp.float32)
    return out[:, :out_ch]                          # NCHW f32


# ----------------------------------------------------------------------------
if __name__ == "__main__":
    key = jax.random.PRNGKey(0)
    kx, kp = jax.random.split(key)

    # small shapes consistent with the module: RSU('rsu4', height=4, 4->4->4)
    N, C, H, W = 2, 4, 16, 16
    height, in_ch, mid_ch, out_ch = 4, 4, 4, 4

    x = jax.random.normal(kx, (N, C, H, W), jnp.float32)
    params = init_rsu_params(kp, height, in_ch, mid_ch, out_ch, dilated=False)

    rsu = jax.jit(rsu_forward, static_argnums=(2, 3, 4))
    y = rsu(x, params, height, False, out_ch)
    y = jax.block_until_ready(y)

    assert y.shape == (N, out_ch, H, W), y.shape
    assert bool(jnp.all(jnp.isfinite(y)))
    print("KERNEL_OK")
</pallas_src>

<mosaic_0001>
module attributes {stable_mosaic.version = 11 : i64} {
  func.func @_rebnconv_kernel(%arg0: i32, %arg1: memref<1x16x256xbf16, #tpu.memory_space<vmem>>, %arg2: memref<16x144xbf16, #tpu.memory_space<vmem>>, %arg3: memref<16x1xf32, #tpu.memory_space<vmem>>, %arg4: memref<1x16x256xbf16, #tpu.memory_space<vmem>>, %arg5: memref<16x290xbf16, #tpu.memory_space<vmem>>, %arg6: memref<144x256xbf16, #tpu.memory_space<vmem>>) attributes {dimension_semantics = [#tpu.dimension_semantics<parallel>], iteration_bounds = array<i64: 2>, scalar_prefetch = 0 : i64, scratch_operands = 2 : i64, tpu.core_type = #tpu.core_type<tc>, window_params = [{transform_indices = @transform_0, window_bounds = array<i64: 1, 16, 256>}, {pipeline_mode = #tpu.pipeline_mode<synchronous>, transform_indices = @transform_1, window_bounds = array<i64: 16, 144>}, {pipeline_mode = #tpu.pipeline_mode<synchronous>, transform_indices = @transform_2, window_bounds = array<i64: 16, 1>}, {transform_indices = @transform_3, window_bounds = array<i64: 1, 16, 256>}]} {
    %cst = arith.constant 0.000000e+00 : bf16
    %0 = vector.broadcast %cst : bf16 to vector<16x17xbf16>
    %c0 = arith.constant 0 : index
    %c0_0 = arith.constant 0 : index
    %1 = vector.load %arg5[%c0, %c0_0] : memref<16x290xbf16, #tpu.memory_space<vmem>>, vector<16x17xbf16>
    tpu.vector_store %arg5[%c0, %c0_0], %0 {strides = array<i32>} : memref<16x290xbf16, #tpu.memory_space<vmem>>, vector<16x17xbf16>,
    %c0_1 = arith.constant 0 : index
    %c273 = arith.constant 273 : index
    %2 = vector.load %arg5[%c0_1, %c273] : memref<16x290xbf16, #tpu.memory_space<vmem>>, vector<16x17xbf16>
    tpu.vector_store %arg5[%c0_1, %c273], %0 {strides = array<i32>} : memref<16x290xbf16, #tpu.memory_space<vmem>>, vector<16x17xbf16>,
    %c0_2 = arith.constant 0 : index
    %c0_3 = arith.constant 0 : index
    %c0_4 = arith.constant 0 : index
    %3 = vector.load %arg1[%c0_2, %c0_3, %c0_4] : memref<1x16x256xbf16, #tpu.memory_space<vmem>>, vector<1x16x256xbf16>
    %4 = vector.shape_cast %3 : vector<1x16x256xbf16> to vector<16x256xbf16>
    %c0_5 = arith.constant 0 : index
    %c17 = arith.constant 17 : index
    %5 = vector.load %arg5[%c0_5, %c17] : memref<16x290xbf16, #tpu.memory_space<vmem>>, vector<16x256xbf16>
    tpu.vector_store %arg5[%c0_5, %c17], %4 {strides = array<i32>} : memref<16x290xbf16, #tpu.memory_space<vmem>>, vector<16x256xbf16>,
    %6 = tpu.iota {dimensions = array<i32: 1>} : vector<16x256xi32>
    %c16_i32 = arith.constant 16 : i32
    %c0_i32 = arith.constant 0 : i32
    %7 = arith.cmpi eq, %c16_i32, %c0_i32 : i32
    %c1_i32 = arith.constant 1 : i32
    %8 = arith.select %7, %c1_i32, %c16_i32 : i32
    %9 = vector.broadcast %8 : i32 to vector<16x256xi32>
    %10 = arith.remsi %6, %9 : vector<16x256xi32>
    %c0_i32_6 = arith.constant 0 : i32
    %11 = vector.broadcast %c0_i32_6 : i32 to vector<16x256xi32>
    %12 = arith.cmpi ne, %10, %11 : vector<16x256xi32>
    %c0_i32_7 = arith.constant 0 : i32
    %13 = vector.broadcast %c0_i32_7 : i32 to vector<16x256xi32>
    %14 = arith.cmpi slt, %10, %13 : vector<16x256xi32>
    %c0_i32_8 = arith.constant 0 : i32
    %15 = arith.cmpi slt, %8, %c0_i32_8 : i32
    %16 = vector.broadcast %15 : i1 to vector<16x256xi1>
    %17 = vector.broadcast %16 : vector<16x256xi1> to vector<16x256xi1>
    %18 = arith.xori %14, %17 : vector<16x256xi1>
    %19 = arith.andi %18, %12 : vector<16x256xi1>
    %20 = vector.broadcast %8 : i32 to vector<16x256xi32>
    %21 = arith.addi %10, %20 : vector<16x256xi32>
    %22 = arith.select %19, %21, %10 : vector<16x256xi1>, vector<16x256xi32>
    %c1_i32_9 = arith.constant 1 : i32
    %23 = vector.broadcast %c1_i32_9 : i32 to vector<16x256xi32>
    %24 = arith.cmpi sge, %22, %23 : vector<16x256xi32>
    %c15_i32 = arith.constant 15 : i32
    %25 = vector.broadcast %c15_i32 : i32 to vector<16x256xi32>
    %26 = arith.cmpi slt, %22, %25 : vector<16x256xi32>
    %cst_10 = arith.constant 0.000000e+00 : bf16
    %27 = vector.broadcast %cst_10 : bf16 to vector<16x256xbf16>
    %c0_11 = arith.constant 0 : index
    %c0_12 = arith.constant 0 : index
    %28 = vector.load %arg5[%c0_11, %c0_12] : memref<16x290xbf16, #tpu.memory_space<vmem>>, vector<16x256xbf16>
    %29 = arith.select %24, %28, %27 : vector<16x256xi1>, vector<16x256xbf16>
    %c0_13 = arith.constant 0 : index
    %c0_14 = arith.constant 0 : index
    %30 = vector.load %arg6[%c0_13, %c0_14] : memref<144x256xbf16, #tpu.memory_space<vmem>>, vector<16x256xbf16>
    tpu.vector_store %arg6[%c0_13, %c0_14], %29 {strides = array<i32>} : memref<144x256xbf16, #tpu.memory_space<vmem>>, vector<16x256xbf16>,
    %c0_15 = arith.constant 0 : index
    %c1 = arith.constant 1 : index
    %31 = vector.load %arg5[%c0_15, %c1] : memref<16x290xbf16, #tpu.memory_space<vmem>>, vector<16x256xbf16>
    %c16 = arith.constant 16 : index
    %c0_16 = arith.constant 0 : index
    %32 = vector.load %arg6[%c16, %c0_16] : memref<144x256xbf16, #tpu.memory_space<vmem>>, vector<16x256xbf16>
    tpu.vector_store %arg6[%c16, %c0_16], %31 {strides = array<i32>} : memref<144x256xbf16, #tpu.memory_space<vmem>>, vector<16x256xbf16>,
    %c0_17 = arith.constant 0 : index
    %c2 = arith.constant 2 : index
    %33 = vector.load %arg5[%c0_17, %c2] : memref<16x290xbf16, #tpu.memory_space<vmem>>, vector<16x256xbf16>
    %34 = arith.select %26, %33, %27 : vector<16x256xi1>, vector<16x256xbf16>
    %c32 = arith.constant 32 : index
    %c0_18 = arith.constant 0 : index
    %35 = vector.load %arg6[%c32, %c0_18] : memref<144x256xbf16, #tpu.memory_space<vmem>>, vector<16x256xbf16>
    tpu.vector_store %arg6[%c32, %c0_18], %34 {strides = array<i32>} : memref<144x256xbf16, #tpu.memory_space<vmem>>, vector<16x256xbf16>,
    %c0_19 = arith.constant 0 : index
    %c16_20 = arith.constant 16 : index
    %36 = vector.load %arg5[%c0_19, %c16_20] : memref<16x290xbf16, #tpu.memory_space<vmem>>, vector<16x256xbf16>
    %37 = arith.select %24, %36, %27 : vector<16x256xi1>, vector<16x256xbf16>
    %c48 = arith.constant 48 : index
    %c0_21 = arith.constant 0 : index
    %38 = vector.load %arg6[%c48, %c0_21] : memref<144x256xbf16, #tpu.memory_space<vmem>>, vector<16x256xbf16>
    tpu.vector_store %arg6[%c48, %c0_21], %37 {strides = array<i32>} : memref<144x256xbf16, #tpu.memory_space<vmem>>, vector<16x256xbf16>,
    %c0_22 = arith.constant 0 : index
    %c17_23 = arith.constant 17 : index
    %39 = vector.load %arg5[%c0_22, %c17_23] : memref<16x290xbf16, #tpu.memory_space<vmem>>, vector<16x256xbf16>
    %c64 = arith.constant 64 : index
    %c0_24 = arith.constant 0 : index
    %40 = vector.load %arg6[%c64, %c0_24] : memref<144x256xbf16, #tpu.memory_space<vmem>>, vector<16x256xbf16>
    tpu.vector_store %arg6[%c64, %c0_24], %39 {strides = array<i32>} : memref<144x256xbf16, #tpu.memory_space<vmem>>, vector<16x256xbf16>,
    %c0_25 = arith.constant 0 : index
    %c18 = arith.constant 18 : index
    %41 = vector.load %arg5[%c0_25, %c18] : memref<16x290xbf16, #tpu.memory_space<vmem>>, vector<16x256xbf16>
    %42 = arith.select %26, %41, %27 : vector<16x256xi1>, vector<16x256xbf16>
    %c80 = arith.constant 80 : index
    %c0_26 = arith.constant 0 : index
    %43 = vector.load %arg6[%c80, %c0_26] : memref<144x256xbf16, #tpu.memory_space<vmem>>, vector<16x256xbf16>
    tpu.vector_store %arg6[%c80, %c0_26], %42 {strides = array<i32>} : memref<144x256xbf16, #tpu.memory_space<vmem>>, vector<16x256xbf16>,
    %c0_27 = arith.constant 0 : index
    %c32_28 = arith.constant 32 : index
    %44 = vector.load %arg5[%c0_27, %c32_28] : memref<16x290xbf16, #tpu.memory_space<vmem>>, vector<16x256xbf16>
    %45 = arith.select %24, %44, %27 : vector<16x256xi1>, vector<16x256xbf16>
    %c96 = arith.constant 96 : index
    %c0_29 = arith.constant 0 : index
    %46 = vector.load %arg6[%c96, %c0_29] : memref<144x256xbf16, #tpu.memory_space<vmem>>, vector<16x256xbf16>
    tpu.vector_store %arg6[%c96, %c0_29], %45 {strides = array<i32>} : memref<144x256xbf16, #tpu.memory_space<vmem>>, vector<16x256xbf16>,
    %c0_30 = arith.constant 0 : index
    %c33 = arith.constant 33 : index
    %47 = vector.load %arg5[%c0_30, %c33] : memref<16x290xbf16, #tpu.memory_space<vmem>>, vector<16x256xbf16>
    %c112 = arith.constant 112 : index
    %c0_31 = arith.constant 0 : index
    %48 = vector.load %arg6[%c112, %c0_31] : memref<144x256xbf16, #tpu.memory_space<vmem>>, vector<16x256xbf16>
    tpu.vector_store %arg6[%c112, %c0_31], %47 {strides = array<i32>} : memref<144x256xbf16, #tpu.memory_space<vmem>>, vector<16x256xbf16>,
    %c0_32 = arith.constant 0 : index
    %c34 = arith.constant 34 : index
    %49 = vector.load %arg5[%c0_32, %c34] : memref<16x290xbf16, #tpu.memory_space<vmem>>, vector<16x256xbf16>
    %50 = arith.select %26, %49, %27 : vector<16x256xi1>, vector<16x256xbf16>
    %c128 = arith.constant 128 : index
    %c0_33 = arith.constant 0 : index
    %51 = vector.load %arg6[%c128, %c0_33] : memref<144x256xbf16, #tpu.memory_space<vmem>>, vector<16x256xbf16>
    tpu.vector_store %arg6[%c128, %c0_33], %50 {strides = array<i32>} : memref<144x256xbf16, #tpu.memory_space<vmem>>, vector<16x256xbf16>,
    %c0_34 = arith.constant 0 : index
    %c0_35 = arith.constant 0 : index
    %52 = vector.load %arg2[%c0_34, %c0_35] : memref<16x144xbf16, #tpu.memory_space<vmem>>, vector<16x144xbf16>
    %c0_36 = arith.constant 0 : index
    %c0_37 = arith.constant 0 : index
    %53 = vector.load %arg6[%c0_36, %c0_37] : memref<144x256xbf16, #tpu.memory_space<vmem>>, vector<144x256xbf16>
    %cst_38 = arith.constant dense<0.000000e+00> : vector<16x256xf32>
    %54 = tpu.matmul %52, %53, %cst_38 {dimension_numbers = #tpu.dot_dimension_numbers<[1], [0], [0], [1], [0, 0, 1, 1], [], []>} : vector<16x144xbf16>, vector<144x256xbf16>, vector<16x256xf32> -> vector<16x256xf32>
    %c0_39 = arith.constant 0 : index
    %c0_40 = arith.constant 0 : index
    %55 = vector.load %arg3[%c0_39, %c0_40] : memref<16x1xf32, #tpu.memory_space<vmem>>, vector<16x1xf32>
    %56 = vector.broadcast %55 : vector<16x1xf32> to vector<16x256xf32>
    %57 = arith.addf %54, %56 : vector<16x256xf32>
    %cst_41 = arith.constant 0.000000e+00 : f32
    %58 = vector.broadcast %cst_41 : f32 to vector<16x256xf32>
    %59 = arith.maximumf %57, %58 : vector<16x256xf32>
    %60 = arith.truncf %59 : vector<16x256xf32> to vector<16x256xbf16>
    %c0_42 = arith.constant 0 : index
    %c0_43 = arith.constant 0 : index
    %c0_44 = arith.constant 0 : index
    %61 = vector.load %arg4[%c0_42, %c0_43, %c0_44] : memref<1x16x256xbf16, #tpu.memory_space<vmem>>, vector<1x16x256xbf16>
    %62 = vector.shape_cast %61 : vector<1x16x256xbf16> to vector<16x256xbf16>
    %63 = vector.shape_cast %60 : vector<16x256xbf16> to vector<1x16x256xbf16>
    tpu.vector_store %arg4[%c0_42, %c0_43, %c0_44], %63 {strides = array<i32>} : memref<1x16x256xbf16, #tpu.memory_space<vmem>>, vector<1x16x256xbf16>,
    return
  }
  func.func @transform_0(%arg0: i32) -> (i32, i32, i32) {
    %c0_i32 = arith.constant 0 : i32
    %c0_i32_0 = arith.constant 0 : i32
    %c0_i32_1 = arith.constant 0 : i32
    return %arg0, %c0_i32, %c0_i32_0 : i32, i32, i32
  }
  func.func @transform_1(%arg0: i32) -> (i32, i32) {
    %c0_i32 = arith.constant 0 : i32
    %c0_i32_0 = arith.constant 0 : i32
    %c0_i32_1 = arith.constant 0 : i32
    return %c0_i32, %c0_i32_0 : i32, i32
  }
  func.func @transform_2(%arg0: i32) -> (i32, i32) {
    %c0_i32 = arith.constant 0 : i32
    %c0_i32_0 = arith.constant 0 : i32
    %c0_i32_1 = arith.constant 0 : i32
    return %c0_i32, %c0_i32_0 : i32, i32
  }
  func.func @transform_3(%arg0: i32) -> (i32, i32, i32) {
    %c0_i32 = arith.constant 0 : i32
    %c0_i32_0 = arith.constant 0 : i32
    %c0_i32_1 = arith.constant 0 : i32
    return %arg0, %c0_i32, %c0_i32_0 : i32, i32, i32
  }
}

module attributes {stable_mosaic.version = 11 : i64} {
  func.func @_rebnconv_kernel(%arg0: i32, %arg1: memref<1x16x64xbf16, #tpu.memory_space<vmem>>, %arg2: memref<16x144xbf16, #tpu.memory_space<vmem>>, %arg3: memref<16x1xf32, #tpu.memory_space<vmem>>, %arg4: memref<1x16x64xbf16, #tpu.memory_space<vmem>>, %arg5: memref<16x82xbf16, #tpu.memory_space<vmem>>, %arg6: memref<144x64xbf16, #tpu.memory_space<vmem>>) attributes {dimension_semantics = [#tpu.dimension_semantics<parallel>], iteration_bounds = array<i64: 2>, scalar_prefetch = 0 : i64, scratch_operands = 2 : i64, tpu.core_type = #tpu.core_type<tc>, window_params = [{transform_indices = @transform_0, window_bounds = array<i64: 1, 16, 64>}, {pipeline_mode = #tpu.pipeline_mode<synchronous>, transform_indices = @transform_1, window_bounds = array<i64: 16, 144>}, {pipeline_mode = #tpu.pipeline_mode<synchronous>, transform_indices = @transform_2, window_bounds = array<i64: 16, 1>}, {transform_indices = @transform_3, window_bounds = array<i64: 1, 16, 64>}]} {
    %cst = arith.constant 0.000000e+00 : bf16
    %0 = vector.broadcast %cst : bf16 to vector<16x9xbf16>
    %c0 = arith.constant 0 : index
    %c0_0 = arith.constant 0 : index
    %1 = vector.load %arg5[%c0, %c0_0] : memref<16x82xbf16, #tpu.memory_space<vmem>>, vector<16x9xbf16>
    tpu.vector_store %arg5[%c0, %c0_0], %0 {strides = array<i32>} : memref<16x82xbf16, #tpu.memory_space<vmem>>, vector<16x9xbf16>,
    %c0_1 = arith.constant 0 : index
    %c73 = arith.constant 73 : index
    %2 = vector.load %arg5[%c0_1, %c73] : memref<16x82xbf16, #tpu.memory_space<vmem>>, vector<16x9xbf16>
    tpu.vector_store %arg5[%c0_1, %c73], %0 {strides = array<i32>} : memref<16x82xbf16, #tpu.memory_space<vmem>>, vector<16x9xbf16>,
    %c0_2 = arith.constant 0 : index
    %c0_3 = arith.constant 0 : index
    %c0_4 = arith.constant 0 : index
    %3 = vector.load %arg1[%c0_2, %c0_3, %c0_4] : memref<1x16x64xbf16, #tpu.memory_space<vmem>>, vector<1x16x64xbf16>
    %4 = vector.shape_cast %3 : vector<1x16x64xbf16> to vector<16x64xbf16>
    %c0_5 = arith.constant 0 : index
    %c9 = arith.constant 9 : index
    %5 = vector.load %arg5[%c0_5, %c9] : memref<16x82xbf16, #tpu.memory_space<vmem>>, vector<16x64xbf16>
    tpu.vector_store %arg5[%c0_5, %c9], %4 {strides = array<i32>} : memref<16x82xbf16, #tpu.memory_space<vmem>>, vector<16x64xbf16>,
    %6 = tpu.iota {dimensions = array<i32: 1>} : vector<16x64xi32>
    %c8_i32 = arith.constant 8 : i32
    %c0_i32 = arith.constant 0 : i32
    %7 = arith.cmpi eq, %c8_i32, %c0_i32 : i32
    %c1_i32 = arith.constant 1 : i32
    %8 = arith.select %7, %c1_i32, %c8_i32 : i32
    %9 = vector.broadcast %8 : i32 to vector<16x64xi32>
    %10 = arith.remsi %6, %9 : vector<16x64xi32>
    %c0_i32_6 = arith.constant 0 : i32
    %11 = vector.broadcast %c0_i32_6 : i32 to vector<16x64xi32>
    %12 = arith.cmpi ne, %10, %11 : vector<16x64xi32>
    %c0_i32_7 = arith.constant 0 : i32
    %13 = vector.broadcast %c0_i32_7 : i32 to vector<16x64xi32>
    %14 = arith.cmpi slt, %10, %13 : vector<16x64xi32>
    %c0_i32_8 = arith.constant 0 : i32
    %15 = arith.cmpi slt, %8, %c0_i32_8 : i32
    %16 = vector.broadcast %15 : i1 to vector<16x64xi1>
    %17 = vector.broadcast %16 : vector<16x64xi1> to vector<16x64xi1>
    %18 = arith.xori %14, %17 : vector<16x64xi1>
    %19 = arith.andi %18, %12 : vector<16x64xi1>
    %20 = vector.broadcast %8 : i32 to vector<16x64xi32>
    %21 = arith.addi %10, %20 : vector<16x64xi32>
    %22 = arith.select %19, %21, %10 : vector<16x64xi1>, vector<16x64xi32>
    %c1_i32_9 = arith.constant 1 : i32
    %23 = vector.broadcast %c1_i32_9 : i32 to vector<16x64xi32>
    %24 = arith.cmpi sge, %22, %23 : vector<16x64xi32>
    %c7_i32 = arith.constant 7 : i32
    %25 = vector.broadcast %c7_i32 : i32 to vector<16x64xi32>
    %26 = arith.cmpi slt, %22, %25 : vector<16x64xi32>
    %cst_10 = arith.constant 0.000000e+00 : bf16
    %27 = vector.broadcast %cst_10 : bf16 to vector<16x64xbf16>
    %c0_11 = arith.constant 0 : index
    %c0_12 = arith.constant 0 : index
    %28 = vector.load %arg5[%c0_11, %c0_12] : memref<16x82xbf16, #tpu.memory_space<vmem>>, vector<16x64xbf16>
    %29 = arith.select %24, %28, %27 : vector<16x64xi1>, vector<16x64xbf16>
    %c0_13 = arith.constant 0 : index
    %c0_14 = arith.constant 0 : index
    %30 = vector.load %arg6[%c0_13, %c0_14] : memref<144x64xbf16, #tpu.memory_space<vmem>>, vector<16x64xbf16>
    tpu.vector_store %arg6[%c0_13, %c0_14], %29 {strides = array<i32>} : memref<144x64xbf16, #tpu.memory_space<vmem>>, vector<16x64xbf16>,
    %c0_15 = arith.constant 0 : index
    %c1 = arith.constant 1 : index
    %31 = vector.load %arg5[%c0_15, %c1] : memref<16x82xbf16, #tpu.memory_space<vmem>>, vector<16x64xbf16>
    %c16 = arith.constant 16 : index
    %c0_16 = arith.constant 0 : index
    %32 = vector.load %arg6[%c16, %c0_16] : memref<144x64xbf16, #tpu.memory_space<vmem>>, vector<16x64xbf16>
    tpu.vector_store %arg6[%c16, %c0_16], %31 {strides = array<i32>} : memref<144x64xbf16, #tpu.memory_space<vmem>>, vector<16x64xbf16>,
    %c0_17 = arith.constant 0 : index
    %c2 = arith.constant 2 : index
    %33 = vector.load %arg5[%c0_17, %c2] : memref<16x82xbf16, #tpu.memory_space<vmem>>, vector<16x64xbf16>
    %34 = arith.select %26, %33, %27 : vector<16x64xi1>, vector<16x64xbf16>
    %c32 = arith.constant 32 : index
    %c0_18 = arith.constant 0 : index
    %35 = vector.load %arg6[%c32, %c0_18] : memref<144x64xbf16, #tpu.memory_space<vmem>>, vector<16x64xbf16>
    tpu.vector_store %arg6[%c32, %c0_18], %34 {strides = array<i32>} : memref<144x64xbf16, #tpu.memory_space<vmem>>, vector<16x64xbf16>,
    %c0_19 = arith.constant 0 : index
    %c8 = arith.constant 8 : index
    %36 = vector.load %arg5[%c0_19, %c8] : memref<16x82xbf16, #tpu.memory_space<vmem>>, vector<16x64xbf16>
    %37 = arith.select %24, %36, %27 : vector<16x64xi1>, vector<16x64xbf16>
    %c48 = arith.constant 48 : index
    %c0_20 = arith.constant 0 : index
    %38 = vector.load %arg6[%c48, %c0_20] : memref<144x64xbf16, #tpu.memory_space<vmem>>, vector<16x64xbf16>
    tpu.vector_store %arg6[%c48, %c0_20], %37 {strides = array<i32>} : memref<144x64xbf16, #tpu.memory_space<vmem>>, vector<16x64xbf16>,
    %c0_21 = arith.constant 0 : index
    %c9_22 = arith.constant 9 : index
    %39 = vector.load %arg5[%c0_21, %c9_22] : memref<16x82xbf16, #tpu.memory_space<vmem>>, vector<16x64xbf16>
    %c64 = arith.constant 64 : index
    %c0_23 = arith.constant 0 : index
    %40 = vector.load %arg6[%c64, %c0_23] : memref<144x64xbf16, #tpu.memory_space<vmem>>, vector<16x64xbf16>
    tpu.vector_store %arg6[%c64, %c0_23], %39 {strides = array<i32>} : memref<144x64xbf16, #tpu.memory_space<vmem>>, vector<16x64xbf16>,
    %c0_24 = arith.constant 0 : index
    %c10 = arith.constant 10 : index
    %41 = vector.load %arg5[%c0_24, %c10] : memref<16x82xbf16, #tpu.memory_space<vmem>>, vector<16x64xbf16>
    %42 = arith.select %26, %41, %27 : vector<16x64xi1>, vector<16x64xbf16>
    %c80 = arith.constant 80 : index
    %c0_25 = arith.constant 0 : index
    %43 = vector.load %arg6[%c80, %c0_25] : memref<144x64xbf16, #tpu.memory_space<vmem>>, vector<16x64xbf16>
    tpu.vector_store %arg6[%c80, %c0_25], %42 {strides = array<i32>} : memref<144x64xbf16, #tpu.memory_space<vmem>>, vector<16x64xbf16>,
    %c0_26 = arith.constant 0 : index
    %c16_27 = arith.constant 16 : index
    %44 = vector.load %arg5[%c0_26, %c16_27] : memref<16x82xbf16, #tpu.memory_space<vmem>>, vector<16x64xbf16>
    %45 = arith.select %24, %44, %27 : vector<16x64xi1>, vector<16x64xbf16>
    %c96 = arith.constant 96 : index
    %c0_28 = arith.constant 0 : index
    %46 = vector.load %arg6[%c96, %c0_28] : memref<144x64xbf16, #tpu.memory_space<vmem>>, vector<16x64xbf16>
    tpu.vector_store %arg6[%c96, %c0_28], %45 {strides = array<i32>} : memref<144x64xbf16, #tpu.memory_space<vmem>>, vector<16x64xbf16>,
    %c0_29 = arith.constant 0 : index
    %c17 = arith.constant 17 : index
    %47 = vector.load %arg5[%c0_29, %c17] : memref<16x82xbf16, #tpu.memory_space<vmem>>, vector<16x64xbf16>
    %c112 = arith.constant 112 : index
    %c0_30 = arith.constant 0 : index
    %48 = vector.load %arg6[%c112, %c0_30] : memref<144x64xbf16, #tpu.memory_space<vmem>>, vector<16x64xbf16>
    tpu.vector_store %arg6[%c112, %c0_30], %47 {strides = array<i32>} : memref<144x64xbf16, #tpu.memory_space<vmem>>, vector<16x64xbf16>,
    %c0_31 = arith.constant 0 : index
    %c18 = arith.constant 18 : index
    %49 = vector.load %arg5[%c0_31, %c18] : memref<16x82xbf16, #tpu.memory_space<vmem>>, vector<16x64xbf16>
    %50 = arith.select %26, %49, %27 : vector<16x64xi1>, vector<16x64xbf16>
    %c128 = arith.constant 128 : index
    %c0_32 = arith.constant 0 : index
    %51 = vector.load %arg6[%c128, %c0_32] : memref<144x64xbf16, #tpu.memory_space<vmem>>, vector<16x64xbf16>
    tpu.vector_store %arg6[%c128, %c0_32], %50 {strides = array<i32>} : memref<144x64xbf16, #tpu.memory_space<vmem>>, vector<16x64xbf16>,
    %c0_33 = arith.constant 0 : index
    %c0_34 = arith.constant 0 : index
    %52 = vector.load %arg2[%c0_33, %c0_34] : memref<16x144xbf16, #tpu.memory_space<vmem>>, vector<16x144xbf16>
    %c0_35 = arith.constant 0 : index
    %c0_36 = arith.constant 0 : index
    %53 = vector.load %arg6[%c0_35, %c0_36] : memref<144x64xbf16, #tpu.memory_space<vmem>>, vector<144x64xbf16>
    %cst_37 = arith.constant dense<0.000000e+00> : vector<16x64xf32>
    %54 = tpu.matmul %52, %53, %cst_37 {dimension_numbers = #tpu.dot_dimension_numbers<[1], [0], [0], [1], [0, 0, 1, 1], [], []>} : vector<16x144xbf16>, vector<144x64xbf16>, vector<16x64xf32> -> vector<16x64xf32>
    %c0_38 = arith.constant 0 : index
    %c0_39 = arith.constant 0 : index
    %55 = vector.load %arg3[%c0_38, %c0_39] : memref<16x1xf32, #tpu.memory_space<vmem>>, vector<16x1xf32>
    %56 = vector.broadcast %55 : vector<16x1xf32> to vector<16x64xf32>
    %57 = arith.addf %54, %56 : vector<16x64xf32>
    %cst_40 = arith.constant 0.000000e+00 : f32
    %58 = vector.broadcast %cst_40 : f32 to vector<16x64xf32>
    %59 = arith.maximumf %57, %58 : vector<16x64xf32>
    %60 = arith.truncf %59 : vector<16x64xf32> to vector<16x64xbf16>
    %c0_41 = arith.constant 0 : index
    %c0_42 = arith.constant 0 : index
    %c0_43 = arith.constant 0 : index
    %61 = vector.load %arg4[%c0_41, %c0_42, %c0_43] : memref<1x16x64xbf16, #tpu.memory_space<vmem>>, vector<1x16x64xbf16>
    %62 = vector.shape_cast %61 : vector<1x16x64xbf16> to vector<16x64xbf16>
    %63 = vector.shape_cast %60 : vector<16x64xbf16> to vector<1x16x64xbf16>
    tpu.vector_store %arg4[%c0_41, %c0_42, %c0_43], %63 {strides = array<i32>} : memref<1x16x64xbf16, #tpu.memory_space<vmem>>, vector<1x16x64xbf16>,
    return
  }
  func.func @transform_0(%arg0: i32) -> (i32, i32, i32) {
    %c0_i32 = arith.constant 0 : i32
    %c0_i32_0 = arith.constant 0 : i32
    %c0_i32_1 = arith.constant 0 : i32
    return %arg0, %c0_i32, %c0_i32_0 : i32, i32, i32
  }
  func.func @transform_1(%arg0: i32) -> (i32, i32) {
    %c0_i32 = arith.constant 0 : i32
    %c0_i32_0 = arith.constant 0 : i32
    %c0_i32_1 = arith.constant 0 : i32
    return %c0_i32, %c0_i32_0 : i32, i32
  }
  func.func @transform_2(%arg0: i32) -> (i32, i32) {
    %c0_i32 = arith.constant 0 : i32
    %c0_i32_0 = arith.constant 0 : i32
    %c0_i32_1 = arith.constant 0 : i32
    return %c0_i32, %c0_i32_0 : i32, i32
  }
  func.func @transform_3(%arg0: i32) -> (i32, i32, i32) {
    %c0_i32 = arith.constant 0 : i32
    %c0_i32_0 = arith.constant 0 : i32
    %c0_i32_1 = arith.constant 0 : i32
    return %arg0, %c0_i32, %c0_i32_0 : i32, i32, i32
  }
}

module attributes {stable_mosaic.version = 11 : i64} {
  func.func @_rebnconv_kernel(%arg0: i32, %arg1: memref<1x16x16xbf16, #tpu.memory_space<vmem>>, %arg2: memref<16x144xbf16, #tpu.memory_space<vmem>>, %arg3: memref<16x1xf32, #tpu.memory_space<vmem>>, %arg4: memref<1x16x16xbf16, #tpu.memory_space<vmem>>, %arg5: memref<16x26xbf16, #tpu.memory_space<vmem>>, %arg6: memref<144x16xbf16, #tpu.memory_space<vmem>>) attributes {dimension_semantics = [#tpu.dimension_semantics<parallel>], iteration_bounds = array<i64: 2>, scalar_prefetch = 0 : i64, scratch_operands = 2 : i64, tpu.core_type = #tpu.core_type<tc>, window_params = [{transform_indices = @transform_0, window_bounds = array<i64: 1, 16, 16>}, {pipeline_mode = #tpu.pipeline_mode<synchronous>, transform_indices = @transform_1, window_bounds = array<i64: 16, 144>}, {pipeline_mode = #tpu.pipeline_mode<synchronous>, transform_indices = @transform_2, window_bounds = array<i64: 16, 1>}, {transform_indices = @transform_3, window_bounds = array<i64: 1, 16, 16>}]} {
    %cst = arith.constant 0.000000e+00 : bf16
    %0 = vector.broadcast %cst : bf16 to vector<16x5xbf16>
    %c0 = arith.constant 0 : index
    %c0_0 = arith.constant 0 : index
    %1 = vector.load %arg5[%c0, %c0_0] : memref<16x26xbf16, #tpu.memory_space<vmem>>, vector<16x5xbf16>
    tpu.vector_store %arg5[%c0, %c0_0], %0 {strides = array<i32>} : memref<16x26xbf16, #tpu.memory_space<vmem>>, vector<16x5xbf16>,
    %c0_1 = arith.constant 0 : index
    %c21 = arith.constant 21 : index
    %2 = vector.load %arg5[%c0_1, %c21] : memref<16x26xbf16, #tpu.memory_space<vmem>>, vector<16x5xbf16>
    tpu.vector_store %arg5[%c0_1, %c21], %0 {strides = array<i32>} : memref<16x26xbf16, #tpu.memory_space<vmem>>, vector<16x5xbf16>,
    %c0_2 = arith.constant 0 : index
    %c0_3 = arith.constant 0 : index
    %c0_4 = arith.constant 0 : index
    %3 = vector.load %arg1[%c0_2, %c0_3, %c0_4] : memref<1x16x16xbf16, #tpu.memory_space<vmem>>, vector<1x16x16xbf16>
    %4 = vector.shape_cast %3 : vector<1x16x16xbf16> to vector<16x16xbf16>
    %c0_5 = arith.constant 0 : index
    %c5 = arith.constant 5 : index
    %5 = vector.load %arg5[%c0_5, %c5] : memref<16x26xbf16, #tpu.memory_space<vmem>>, vector<16x16xbf16>
    tpu.vector_store %arg5[%c0_5, %c5], %4 {strides = array<i32>} : memref<16x26xbf16, #tpu.memory_space<vmem>>, vector<16x16xbf16>,
    %6 = tpu.iota {dimensions = array<i32: 1>} : vector<16x16xi32>
    %c4_i32 = arith.constant 4 : i32
    %c0_i32 = arith.constant 0 : i32
    %7 = arith.cmpi eq, %c4_i32, %c0_i32 : i32
    %c1_i32 = arith.constant 1 : i32
    %8 = arith.select %7, %c1_i32, %c4_i32 : i32
    %9 = vector.broadcast %8 : i32 to vector<16x16xi32>
    %10 = arith.remsi %6, %9 : vector<16x16xi32>
    %c0_i32_6 = arith.constant 0 : i32
    %11 = vector.broadcast %c0_i32_6 : i32 to vector<16x16xi32>
    %12 = arith.cmpi ne, %10, %11 : vector<16x16xi32>
    %c0_i32_7 = arith.constant 0 : i32
    %13 = vector.broadcast %c0_i32_7 : i32 to vector<16x16xi32>
    %14 = arith.cmpi slt, %10, %13 : vector<16x16xi32>
    %c0_i32_8 = arith.constant 0 : i32
    %15 = arith.cmpi slt, %8, %c0_i32_8 : i32
    %16 = vector.broadcast %15 : i1 to vector<16x16xi1>
    %17 = vector.broadcast %16 : vector<16x16xi1> to vector<16x16xi1>
    %18 = arith.xori %14, %17 : vector<16x16xi1>
    %19 = arith.andi %18, %12 : vector<16x16xi1>
    %20 = vector.broadcast %8 : i32 to vector<16x16xi32>
    %21 = arith.addi %10, %20 : vector<16x16xi32>
    %22 = arith.select %19, %21, %10 : vector<16x16xi1>, vector<16x16xi32>
    %c1_i32_9 = arith.constant 1 : i32
    %23 = vector.broadcast %c1_i32_9 : i32 to vector<16x16xi32>
    %24 = arith.cmpi sge, %22, %23 : vector<16x16xi32>
    %c3_i32 = arith.constant 3 : i32
    %25 = vector.broadcast %c3_i32 : i32 to vector<16x16xi32>
    %26 = arith.cmpi slt, %22, %25 : vector<16x16xi32>
    %cst_10 = arith.constant 0.000000e+00 : bf16
    %27 = vector.broadcast %cst_10 : bf16 to vector<16x16xbf16>
    %c0_11 = arith.constant 0 : index
    %c0_12 = arith.constant 0 : index
    %28 = vector.load %arg5[%c0_11, %c0_12] : memref<16x26xbf16, #tpu.memory_space<vmem>>, vector<16x16xbf16>
    %29 = arith.select %24, %28, %27 : vector<16x16xi1>, vector<16x16xbf16>
    %c0_13 = arith.constant 0 : index
    %c0_14 = arith.constant 0 : index
    %30 = vector.load %arg6[%c0_13, %c0_14] : memref<144x16xbf16, #tpu.memory_space<vmem>>, vector<16x16xbf16>
    tpu.vector_store %arg6[%c0_13, %c0_14], %29 {strides = array<i32>} : memref<144x16xbf16, #tpu.memory_space<vmem>>, vector<16x16xbf16>,
    %c0_15 = arith.constant 0 : index
    %c1 = arith.constant 1 : index
    %31 = vector.load %arg5[%c0_15, %c1] : memref<16x26xbf16, #tpu.memory_space<vmem>>, vector<16x16xbf16>
    %c16 = arith.constant 16 : index
    %c0_16 = arith.constant 0 : index
    %32 = vector.load %arg6[%c16, %c0_16] : memref<144x16xbf16, #tpu.memory_space<vmem>>, vector<16x16xbf16>
    tpu.vector_store %arg6[%c16, %c0_16], %31 {strides = array<i32>} : memref<144x16xbf16, #tpu.memory_space<vmem>>, vector<16x16xbf16>,
    %c0_17 = arith.constant 0 : index
    %c2 = arith.constant 2 : index
    %33 = vector.load %arg5[%c0_17, %c2] : memref<16x26xbf16, #tpu.memory_space<vmem>>, vector<16x16xbf16>
    %34 = arith.select %26, %33, %27 : vector<16x16xi1>, vector<16x16xbf16>
    %c32 = arith.constant 32 : index
    %c0_18 = arith.constant 0 : index
    %35 = vector.load %arg6[%c32, %c0_18] : memref<144x16xbf16, #tpu.memory_space<vmem>>, vector<16x16xbf16>
    tpu.vector_store %arg6[%c32, %c0_18], %34 {strides = array<i32>} : memref<144x16xbf16, #tpu.memory_space<vmem>>, vector<16x16xbf16>,
    %c0_19 = arith.constant 0 : index
    %c4 = arith.constant 4 : index
    %36 = vector.load %arg5[%c0_19, %c4] : memref<16x26xbf16, #tpu.memory_space<vmem>>, vector<16x16xbf16>
    %37 = arith.select %24, %36, %27 : vector<16x16xi1>, vector<16x16xbf16>
    %c48 = arith.constant 48 : index
    %c0_20 = arith.constant 0 : index
    %38 = vector.load %arg6[%c48, %c0_20] : memref<144x16xbf16, #tpu.memory_space<vmem>>, vector<16x16xbf16>
    tpu.vector_store %arg6[%c48, %c0_20], %37 {strides = array<i32>} : memref<144x16xbf16, #tpu.memory_space<vmem>>, vector<16x16xbf16>,
    %c0_21 = arith.constant 0 : index
    %c5_22 = arith.constant 5 : index
    %39 = vector.load %arg5[%c0_21, %c5_22] : memref<16x26xbf16, #tpu.memory_space<vmem>>, vector<16x16xbf16>
    %c64 = arith.constant 64 : index
    %c0_23 = arith.constant 0 : index
    %40 = vector.load %arg6[%c64, %c0_23] : memref<144x16xbf16, #tpu.memory_space<vmem>>, vector<16x16xbf16>
    tpu.vector_store %arg6[%c64, %c0_23], %39 {strides = array<i32>} : memref<144x16xbf16, #tpu.memory_space<vmem>>, vector<16x16xbf16>,
    %c0_24 = arith.constant 0 : index
    %c6 = arith.constant 6 : index
    %41 = vector.load %arg5[%c0_24, %c6] : memref<16x26xbf16, #tpu.memory_space<vmem>>, vector<16x16xbf16>
    %42 = arith.select %26, %41, %27 : vector<16x16xi1>, vector<16x16xbf16>
    %c80 = arith.constant 80 : index
    %c0_25 = arith.constant 0 : index
    %43 = vector.load %arg6[%c80, %c0_25] : memref<144x16xbf16, #tpu.memory_space<vmem>>, vector<16x16xbf16>
    tpu.vector_store %arg6[%c80, %c0_25], %42 {strides = array<i32>} : memref<144x16xbf16, #tpu.memory_space<vmem>>, vector<16x16xbf16>,
    %c0_26 = arith.constant 0 : index
    %c8 = arith.constant 8 : index
    %44 = vector.load %arg5[%c0_26, %c8] : memref<16x26xbf16, #tpu.memory_space<vmem>>, vector<16x16xbf16>
    %45 = arith.select %24, %44, %27 : vector<16x16xi1>, vector<16x16xbf16>
    %c96 = arith.constant 96 : index
    %c0_27 = arith.constant 0 : index
    %46 = vector.load %arg6[%c96, %c0_27] : memref<144x16xbf16, #tpu.memory_space<vmem>>, vector<16x16xbf16>
    tpu.vector_store %arg6[%c96, %c0_27], %45 {strides = array<i32>} : memref<144x16xbf16, #tpu.memory_space<vmem>>, vector<16x16xbf16>,
    %c0_28 = arith.constant 0 : index
    %c9 = arith.constant 9 : index
    %47 = vector.load %arg5[%c0_28, %c9] : memref<16x26xbf16, #tpu.memory_space<vmem>>, vector<16x16xbf16>
    %c112 = arith.constant 112 : index
    %c0_29 = arith.constant 0 : index
    %48 = vector.load %arg6[%c112, %c0_29] : memref<144x16xbf16, #tpu.memory_space<vmem>>, vector<16x16xbf16>
    tpu.vector_store %arg6[%c112, %c0_29], %47 {strides = array<i32>} : memref<144x16xbf16, #tpu.memory_space<vmem>>, vector<16x16xbf16>,
    %c0_30 = arith.constant 0 : index
    %c10 = arith.constant 10 : index
    %49 = vector.load %arg5[%c0_30, %c10] : memref<16x26xbf16, #tpu.memory_space<vmem>>, vector<16x16xbf16>
    %50 = arith.select %26, %49, %27 : vector<16x16xi1>, vector<16x16xbf16>
    %c128 = arith.constant 128 : index
    %c0_31 = arith.constant 0 : index
    %51 = vector.load %arg6[%c128, %c0_31] : memref<144x16xbf16, #tpu.memory_space<vmem>>, vector<16x16xbf16>
    tpu.vector_store %arg6[%c128, %c0_31], %50 {strides = array<i32>} : memref<144x16xbf16, #tpu.memory_space<vmem>>, vector<16x16xbf16>,
    %c0_32 = arith.constant 0 : index
    %c0_33 = arith.constant 0 : index
    %52 = vector.load %arg2[%c0_32, %c0_33] : memref<16x144xbf16, #tpu.memory_space<vmem>>, vector<16x144xbf16>
    %c0_34 = arith.constant 0 : index
    %c0_35 = arith.constant 0 : index
    %53 = vector.load %arg6[%c0_34, %c0_35] : memref<144x16xbf16, #tpu.memory_space<vmem>>, vector<144x16xbf16>
    %cst_36 = arith.constant dense<0.000000e+00> : vector<16x16xf32>
    %54 = tpu.matmul %52, %53, %cst_36 {dimension_numbers = #tpu.dot_dimension_numbers<[1], [0], [0], [1], [0, 0, 1, 1], [], []>} : vector<16x144xbf16>, vector<144x16xbf16>, vector<16x16xf32> -> vector<16x16xf32>
    %c0_37 = arith.constant 0 : index
    %c0_38 = arith.constant 0 : index
    %55 = vector.load %arg3[%c0_37, %c0_38] : memref<16x1xf32, #tpu.memory_space<vmem>>, vector<16x1xf32>
    %56 = vector.broadcast %55 : vector<16x1xf32> to vector<16x16xf32>
    %57 = arith.addf %54, %56 : vector<16x16xf32>
    %cst_39 = arith.constant 0.000000e+00 : f32
    %58 = vector.broadcast %cst_39 : f32 to vector<16x16xf32>
    %59 = arith.maximumf %57, %58 : vector<16x16xf32>
    %60 = arith.truncf %59 : vector<16x16xf32> to vector<16x16xbf16>
    %c0_40 = arith.constant 0 : index
    %c0_41 = arith.constant 0 : index
    %c0_42 = arith.constant 0 : index
    %61 = vector.load %arg4[%c0_40, %c0_41, %c0_42] : memref<1x16x16xbf16, #tpu.memory_space<vmem>>, vector<1x16x16xbf16>
    %62 = vector.shape_cast %61 : vector<1x16x16xbf16> to vector<16x16xbf16>
    %63 = vector.shape_cast %60 : vector<16x16xbf16> to vector<1x16x16xbf16>
    tpu.vector_store %arg4[%c0_40, %c0_41, %c0_42], %63 {strides = array<i32>} : memref<1x16x16xbf16, #tpu.memory_space<vmem>>, vector<1x16x16xbf16>,
    return
  }
  func.func @transform_0(%arg0: i32) -> (i32, i32, i32) {
    %c0_i32 = arith.constant 0 : i32
    %c0_i32_0 = arith.constant 0 : i32
    %c0_i32_1 = arith.constant 0 : i32
    return %arg0, %c0_i32, %c0_i32_0 : i32, i32, i32
  }
  func.func @transform_1(%arg0: i32) -> (i32, i32) {
    %c0_i32 = arith.constant 0 : i32
    %c0_i32_0 = arith.constant 0 : i32
    %c0_i32_1 = arith.constant 0 : i32
    return %c0_i32, %c0_i32_0 : i32, i32
  }
  func.func @transform_2(%arg0: i32) -> (i32, i32) {
    %c0_i32 = arith.constant 0 : i32
    %c0_i32_0 = arith.constant 0 : i32
    %c0_i32_1 = arith.constant 0 : i32
    return %c0_i32, %c0_i32_0 : i32, i32
  }
  func.func @transform_3(%arg0: i32) -> (i32, i32, i32) {
    %c0_i32 = arith.constant 0 : i32
    %c0_i32_0 = arith.constant 0 : i32
    %c0_i32_1 = arith.constant 0 : i32
    return %arg0, %c0_i32, %c0_i32_0 : i32, i32, i32
  }
}

module attributes {stable_mosaic.version = 11 : i64} {
  func.func @_rebnconv_kernel(%arg0: i32, %arg1: memref<1x16x16xbf16, #tpu.memory_space<vmem>>, %arg2: memref<1x16x16xbf16, #tpu.memory_space<vmem>>, %arg3: memref<16x288xbf16, #tpu.memory_space<vmem>>, %arg4: memref<16x1xf32, #tpu.memory_space<vmem>>, %arg5: memref<1x16x16xbf16, #tpu.memory_space<vmem>>, %arg6: memref<32x26xbf16, #tpu.memory_space<vmem>>, %arg7: memref<288x16xbf16, #tpu.memory_space<vmem>>) attributes {dimension_semantics = [#tpu.dimension_semantics<parallel>], iteration_bounds = array<i64: 2>, scalar_prefetch = 0 : i64, scratch_operands = 2 : i64, tpu.core_type = #tpu.core_type<tc>, window_params = [{transform_indices = @transform_0, window_bounds = array<i64: 1, 16, 16>}, {transform_indices = @transform_1, window_bounds = array<i64: 1, 16, 16>}, {pipeline_mode = #tpu.pipeline_mode<synchronous>, transform_indices = @transform_2, window_bounds = array<i64: 16, 288>}, {pipeline_mode = #tpu.pipeline_mode<synchronous>, transform_indices = @transform_3, window_bounds = array<i64: 16, 1>}, {transform_indices = @transform_4, window_bounds = array<i64: 1, 16, 16>}]} {
    %cst = arith.constant 0.000000e+00 : bf16
    %0 = vector.broadcast %cst : bf16 to vector<32x5xbf16>
    %c0 = arith.constant 0 : index
    %c0_0 = arith.constant 0 : index
    %1 = vector.load %arg6[%c0, %c0_0] : memref<32x26xbf16, #tpu.memory_space<vmem>>, vector<32x5xbf16>
    tpu.vector_store %arg6[%c0, %c0_0], %0 {strides = array<i32>} : memref<32x26xbf16, #tpu.memory_space<vmem>>, vector<32x5xbf16>,
    %c0_1 = arith.constant 0 : index
    %c21 = arith.constant 21 : index
    %2 = vector.load %arg6[%c0_1, %c21] : memref<32x26xbf16, #tpu.memory_space<vmem>>, vector<32x5xbf16>
    tpu.vector_store %arg6[%c0_1, %c21], %0 {strides = array<i32>} : memref<32x26xbf16, #tpu.memory_space<vmem>>, vector<32x5xbf16>,
    %c0_2 = arith.constant 0 : index
    %c0_3 = arith.constant 0 : index
    %c0_4 = arith.constant 0 : index
    %3 = vector.load %arg1[%c0_2, %c0_3, %c0_4] : memref<1x16x16xbf16, #tpu.memory_space<vmem>>, vector<1x16x16xbf16>
    %4 = vector.shape_cast %3 : vector<1x16x16xbf16> to vector<16x16xbf16>
    %c0_5 = arith.constant 0 : index
    %c5 = arith.constant 5 : index
    %5 = vector.load %arg6[%c0_5, %c5] : memref<32x26xbf16, #tpu.memory_space<vmem>>, vector<16x16xbf16>
    tpu.vector_store %arg6[%c0_5, %c5], %4 {strides = array<i32>} : memref<32x26xbf16, #tpu.memory_space<vmem>>, vector<16x16xbf16>,
    %c0_6 = arith.constant 0 : index
    %c0_7 = arith.constant 0 : index
    %c0_8 = arith.constant 0 : index
    %6 = vector.load %arg2[%c0_6, %c0_7, %c0_8] : memref<1x16x16xbf16, #tpu.memory_space<vmem>>, vector<1x16x16xbf16>
    %7 = vector.shape_cast %6 : vector<1x16x16xbf16> to vector<16x16xbf16>
    %c16 = arith.constant 16 : index
    %c5_9 = arith.constant 5 : index
    %8 = vector.load %arg6[%c16, %c5_9] : memref<32x26xbf16, #tpu.memory_space<vmem>>, vector<16x16xbf16>
    tpu.vector_store %arg6[%c16, %c5_9], %7 {strides = array<i32>} : memref<32x26xbf16, #tpu.memory_space<vmem>>, vector<16x16xbf16>,
    %9 = tpu.iota {dimensions = array<i32: 1>} : vector<32x16xi32>
    %c4_i32 = arith.constant 4 : i32
    %c0_i32 = arith.constant 0 : i32
    %10 = arith.cmpi eq, %c4_i32, %c0_i32 : i32
    %c1_i32 = arith.constant 1 : i32
    %11 = arith.select %10, %c1_i32, %c4_i32 : i32
    %12 = vector.broadcast %11 : i32 to vector<32x16xi32>
    %13 = arith.remsi %9, %12 : vector<32x16xi32>
    %c0_i32_10 = arith.constant 0 : i32
    %14 = vector.broadcast %c0_i32_10 : i32 to vector<32x16xi32>
    %15 = arith.cmpi ne, %13, %14 : vector<32x16xi32>
    %c0_i32_11 = arith.constant 0 : i32
    %16 = vector.broadcast %c0_i32_11 : i32 to vector<32x16xi32>
    %17 = arith.cmpi slt, %13, %16 : vector<32x16xi32>
    %c0_i32_12 = arith.constant 0 : i32
    %18 = arith.cmpi slt, %11, %c0_i32_12 : i32
    %19 = vector.broadcast %18 : i1 to vector<32x16xi1>
    %20 = vector.broadcast %19 : vector<32x16xi1> to vector<32x16xi1>
    %21 = arith.xori %17, %20 : vector<32x16xi1>
    %22 = arith.andi %21, %15 : vector<32x16xi1>
    %23 = vector.broadcast %11 : i32 to vector<32x16xi32>
    %24 = arith.addi %13, %23 : vector<32x16xi32>
    %25 = arith.select %22, %24, %13 : vector<32x16xi1>, vector<32x16xi32>
    %c1_i32_13 = arith.constant 1 : i32
    %26 = vector.broadcast %c1_i32_13 : i32 to vector<32x16xi32>
    %27 = arith.cmpi sge, %25, %26 : vector<32x16xi32>
    %c3_i32 = arith.constant 3 : i32
    %28 = vector.broadcast %c3_i32 : i32 to vector<32x16xi32>
    %29 = arith.cmpi slt, %25, %28 : vector<32x16xi32>
    %cst_14 = arith.constant 0.000000e+00 : bf16
    %30 = vector.broadcast %cst_14 : bf16 to vector<32x16xbf16>
    %c0_15 = arith.constant 0 : index
    %c0_16 = arith.constant 0 : index
    %31 = vector.load %arg6[%c0_15, %c0_16] : memref<32x26xbf16, #tpu.memory_space<vmem>>, vector<32x16xbf16>
    %32 = arith.select %27, %31, %30 : vector<32x16xi1>, vector<32x16xbf16>
    %c0_17 = arith.constant 0 : index
    %c0_18 = arith.constant 0 : index
    %33 = vector.load %arg7[%c0_17, %c0_18] : memref<288x16xbf16, #tpu.memory_space<vmem>>, vector<32x16xbf16>
    tpu.vector_store %arg7[%c0_17, %c0_18], %32 {strides = array<i32>} : memref<288x16xbf16, #tpu.memory_space<vmem>>, vector<32x16xbf16>,
    %c0_19 = arith.constant 0 : index
    %c1 = arith.constant 1 : index
    %34 = vector.load %arg6[%c0_19, %c1] : memref<32x26xbf16, #tpu.memory_space<vmem>>, vector<32x16xbf16>
    %c32 = arith.constant 32 : index
    %c0_20 = arith.constant 0 : index
    %35 = vector.load %arg7[%c32, %c0_20] : memref<288x16xbf16, #tpu.memory_space<vmem>>, vector<32x16xbf16>
    tpu.vector_store %arg7[%c32, %c0_20], %34 {strides = array<i32>} : memref<288x16xbf16, #tpu.memory_space<vmem>>, vector<32x16xbf16>,
    %c0_21 = arith.constant 0 : index
    %c2 = arith.constant 2 : index
    %36 = vector.load %arg6[%c0_21, %c2] : memref<32x26xbf16, #tpu.memory_space<vmem>>, vector<32x16xbf16>
    %37 = arith.select %29, %36, %30 : vector<32x16xi1>, vector<32x16xbf16>
    %c64 = arith.constant 64 : index
    %c0_22 = arith.constant 0 : index
    %38 = vector.load %arg7[%c64, %c0_22] : memref<288x16xbf16, #tpu.memory_space<vmem>>, vector<32x16xbf16>
    tpu.vector_store %arg7[%c64, %c0_22], %37 {strides = array<i32>} : memref<288x16xbf16, #tpu.memory_space<vmem>>, vector<32x16xbf16>,
    %c0_23 = arith.constant 0 : index
    %c4 = arith.constant 4 : index
    %39 = vector.load %arg6[%c0_23, %c4] : memref<32x26xbf16, #tpu.memory_space<vmem>>, vector<32x16xbf16>
    %40 = arith.select %27, %39, %30 : vector<32x16xi1>, vector<32x16xbf16>
    %c96 = arith.constant 96 : index
    %c0_24 = arith.constant 0 : index
    %41 = vector.load %arg7[%c96, %c0_24] : memref<288x16xbf16, #tpu.memory_space<vmem>>, vector<32x16xbf16>
    tpu.vector_store %arg7[%c96, %c0_24], %40 {strides = array<i32>} : memref<288x16xbf16, #tpu.memory_space<vmem>>, vector<32x16xbf16>,
    %c0_25 = arith.constant 0 : index
    %c5_26 = arith.constant 5 : index
    %42 = vector.load %arg6[%c0_25, %c5_26] : memref<32x26xbf16, #tpu.memory_space<vmem>>, vector<32x16xbf16>
    %c128 = arith.constant 128 : index
    %c0_27 = arith.constant 0 : index
    %43 = vector.load %arg7[%c128, %c0_27] : memref<288x16xbf16, #tpu.memory_space<vmem>>, vector<32x16xbf16>
    tpu.vector_store %arg7[%c128, %c0_27], %42 {strides = array<i32>} : memref<288x16xbf16, #tpu.memory_space<vmem>>, vector<32x16xbf16>,
    %c0_28 = arith.constant 0 : index
    %c6 = arith.constant 6 : index
    %44 = vector.load %arg6[%c0_28, %c6] : memref<32x26xbf16, #tpu.memory_space<vmem>>, vector<32x16xbf16>
    %45 = arith.select %29, %44, %30 : vector<32x16xi1>, vector<32x16xbf16>
    %c160 = arith.constant 160 : index
    %c0_29 = arith.constant 0 : index
    %46 = vector.load %arg7[%c160, %c0_29] : memref<288x16xbf16, #tpu.memory_space<vmem>>, vector<32x16xbf16>
    tpu.vector_store %arg7[%c160, %c0_29], %45 {strides = array<i32>} : memref<288x16xbf16, #tpu.memory_space<vmem>>, vector<32x16xbf16>,
    %c0_30 = arith.constant 0 : index
    %c8 = arith.constant 8 : index
    %47 = vector.load %arg6[%c0_30, %c8] : memref<32x26xbf16, #tpu.memory_space<vmem>>, vector<32x16xbf16>
    %48 = arith.select %27, %47, %30 : vector<32x16xi1>, vector<32x16xbf16>
    %c192 = arith.constant 192 : index
    %c0_31 = arith.constant 0 : index
    %49 = vector.load %arg7[%c192, %c0_31] : memref<288x16xbf16, #tpu.memory_space<vmem>>, vector<32x16xbf16>
    tpu.vector_store %arg7[%c192, %c0_31], %48 {strides = array<i32>} : memref<288x16xbf16, #tpu.memory_space<vmem>>, vector<32x16xbf16>,
    %c0_32 = arith.constant 0 : index
    %c9 = arith.constant 9 : index
    %50 = vector.load %arg6[%c0_32, %c9] : memref<32x26xbf16, #tpu.memory_space<vmem>>, vector<32x16xbf16>
    %c224 = arith.constant 224 : index
    %c0_33 = arith.constant 0 : index
    %51 = vector.load %arg7[%c224, %c0_33] : memref<288x16xbf16, #tpu.memory_space<vmem>>, vector<32x16xbf16>
    tpu.vector_store %arg7[%c224, %c0_33], %50 {strides = array<i32>} : memref<288x16xbf16, #tpu.memory_space<vmem>>, vector<32x16xbf16>,
    %c0_34 = arith.constant 0 : index
    %c10 = arith.constant 10 : index
    %52 = vector.load %arg6[%c0_34, %c10] : memref<32x26xbf16, #tpu.memory_space<vmem>>, vector<32x16xbf16>
    %53 = arith.select %29, %52, %30 : vector<32x16xi1>, vector<32x16xbf16>
    %c256 = arith.constant 256 : index
    %c0_35 = arith.constant 0 : index
    %54 = vector.load %arg7[%c256, %c0_35] : memref<288x16xbf16, #tpu.memory_space<vmem>>, vector<32x16xbf16>
    tpu.vector_store %arg7[%c256, %c0_35], %53 {strides = array<i32>} : memref<288x16xbf16, #tpu.memory_space<vmem>>, vector<32x16xbf16>,
    %c0_36 = arith.constant 0 : index
    %c0_37 = arith.constant 0 : index
    %55 = vector.load %arg3[%c0_36, %c0_37] : memref<16x288xbf16, #tpu.memory_space<vmem>>, vector<16x288xbf16>
    %c0_38 = arith.constant 0 : index
    %c0_39 = arith.constant 0 : index
    %56 = vector.load %arg7[%c0_38, %c0_39] : memref<288x16xbf16, #tpu.memory_space<vmem>>, vector<288x16xbf16>
    %cst_40 = arith.constant dense<0.000000e+00> : vector<16x16xf32>
    %57 = tpu.matmul %55, %56, %cst_40 {dimension_numbers = #tpu.dot_dimension_numbers<[1], [0], [0], [1], [0, 0, 1, 1], [], []>} : vector<16x288xbf16>, vector<288x16xbf16>, vector<16x16xf32> -> vector<16x16xf32>
    %c0_41 = arith.constant 0 : index
    %c0_42 = arith.constant 0 : index
    %58 = vector.load %arg4[%c0_41, %c0_42] : memref<16x1xf32, #tpu.memory_space<vmem>>, vector<16x1xf32>
    %59 = vector.broadcast %58 : vector<16x1xf32> to vector<16x16xf32>
    %60 = arith.addf %57, %59 : vector<16x16xf32>
    %cst_43 = arith.constant 0.000000e+00 : f32
    %61 = vector.broadcast %cst_43 : f32 to vector<16x16xf32>
    %62 = arith.maximumf %60, %61 : vector<16x16xf32>
    %63 = arith.truncf %62 : vector<16x16xf32> to vector<16x16xbf16>
    %c0_44 = arith.constant 0 : index
    %c0_45 = arith.constant 0 : index
    %c0_46 = arith.constant 0 : index
    %64 = vector.load %arg5[%c0_44, %c0_45, %c0_46] : memref<1x16x16xbf16, #tpu.memory_space<vmem>>, vector<1x16x16xbf16>
    %65 = vector.shape_cast %64 : vector<1x16x16xbf16> to vector<16x16xbf16>
    %66 = vector.shape_cast %63 : vector<16x16xbf16> to vector<1x16x16xbf16>
    tpu.vector_store %arg5[%c0_44, %c0_45, %c0_46], %66 {strides = array<i32>} : memref<1x16x16xbf16, #tpu.memory_space<vmem>>, vector<1x16x16xbf16>,
    return
  }
  func.func @transform_0(%arg0: i32) -> (i32, i32, i32) {
    %c0_i32 = arith.constant 0 : i32
    %c0_i32_0 = arith.constant 0 : i32
    %c0_i32_1 = arith.constant 0 : i32
    return %arg0, %c0_i32, %c0_i32_0 : i32, i32, i32
  }
  func.func @transform_1(%arg0: i32) -> (i32, i32, i32) {
    %c0_i32 = arith.constant 0 : i32
    %c0_i32_0 = arith.constant 0 : i32
    %c0_i32_1 = arith.constant 0 : i32
    return %arg0, %c0_i32, %c0_i32_0 : i32, i32, i32
  }
  func.func @transform_2(%arg0: i32) -> (i32, i32) {
    %c0_i32 = arith.constant 0 : i32
    %c0_i32_0 = arith.constant 0 : i32
    %c0_i32_1 = arith.constant 0 : i32
    return %c0_i32, %c0_i32_0 : i32, i32
  }
  func.func @transform_3(%arg0: i32) -> (i32, i32) {
    %c0_i32 = arith.constant 0 : i32
    %c0_i32_0 = arith.constant 0 : i32
    %c0_i32_1 = arith.constant 0 : i32
    return %c0_i32, %c0_i32_0 : i32, i32
  }
  func.func @transform_4(%arg0: i32) -> (i32, i32, i32) {
    %c0_i32 = arith.constant 0 : i32
    %c0_i32_0 = arith.constant 0 : i32
    %c0_i32_1 = arith.constant 0 : i32
    return %arg0, %c0_i32, %c0_i32_0 : i32, i32, i32
  }
}

module attributes {stable_mosaic.version = 11 : i64} {
  func.func @_rebnconv_kernel(%arg0: i32, %arg1: memref<1x16x16xbf16, #tpu.memory_space<vmem>>, %arg2: memref<16x144xbf16, #tpu.memory_space<vmem>>, %arg3: memref<16x1xf32, #tpu.memory_space<vmem>>, %arg4: memref<1x16x16xbf16, #tpu.memory_space<vmem>>, %arg5: memref<16x36xbf16, #tpu.memory_space<vmem>>, %arg6: memref<144x16xbf16, #tpu.memory_space<vmem>>) attributes {dimension_semantics = [#tpu.dimension_semantics<parallel>], iteration_bounds = array<i64: 2>, scalar_prefetch = 0 : i64, scratch_operands = 2 : i64, tpu.core_type = #tpu.core_type<tc>, window_params = [{transform_indices = @transform_0, window_bounds = array<i64: 1, 16, 16>}, {pipeline_mode = #tpu.pipeline_mode<synchronous>, transform_indices = @transform_1, window_bounds = array<i64: 16, 144>}, {pipeline_mode = #tpu.pipeline_mode<synchronous>, transform_indices = @transform_2, window_bounds = array<i64: 16, 1>}, {transform_indices = @transform_3, window_bounds = array<i64: 1, 16, 16>}]} {
    %cst = arith.constant 0.000000e+00 : bf16
    %0 = vector.broadcast %cst : bf16 to vector<16x10xbf16>
    %c0 = arith.constant 0 : index
    %c0_0 = arith.constant 0 : index
    %1 = vector.load %arg5[%c0, %c0_0] : memref<16x36xbf16, #tpu.memory_space<vmem>>, vector<16x10xbf16>
    tpu.vector_store %arg5[%c0, %c0_0], %0 {strides = array<i32>} : memref<16x36xbf16, #tpu.memory_space<vmem>>, vector<16x10xbf16>,
    %c0_1 = arith.constant 0 : index
    %c26 = arith.constant 26 : index
    %2 = vector.load %arg5[%c0_1, %c26] : memref<16x36xbf16, #tpu.memory_space<vmem>>, vector<16x10xbf16>
    tpu.vector_store %arg5[%c0_1, %c26], %0 {strides = array<i32>} : memref<16x36xbf16, #tpu.memory_space<vmem>>, vector<16x10xbf16>,
    %c0_2 = arith.constant 0 : index
    %c0_3 = arith.constant 0 : index
    %c0_4 = arith.constant 0 : index
    %3 = vector.load %arg1[%c0_2, %c0_3, %c0_4] : memref<1x16x16xbf16, #tpu.memory_space<vmem>>, vector<1x16x16xbf16>
    %4 = vector.shape_cast %3 : vector<1x16x16xbf16> to vector<16x16xbf16>
    %c0_5 = arith.constant 0 : index
    %c10 = arith.constant 10 : index
    %5 = vector.load %arg5[%c0_5, %c10] : memref<16x36xbf16, #tpu.memory_space<vmem>>, vector<16x16xbf16>
    tpu.vector_store %arg5[%c0_5, %c10], %4 {strides = array<i32>} : memref<16x36xbf16, #tpu.memory_space<vmem>>, vector<16x16xbf16>,
    %6 = tpu.iota {dimensions = array<i32: 1>} : vector<16x16xi32>
    %c4_i32 = arith.constant 4 : i32
    %c0_i32 = arith.constant 0 : i32
    %7 = arith.cmpi eq, %c4_i32, %c0_i32 : i32
    %c1_i32 = arith.constant 1 : i32
    %8 = arith.select %7, %c1_i32, %c4_i32 : i32
    %9 = vector.broadcast %8 : i32 to vector<16x16xi32>
    %10 = arith.remsi %6, %9 : vector<16x16xi32>
    %c0_i32_6 = arith.constant 0 : i32
    %11 = vector.broadcast %c0_i32_6 : i32 to vector<16x16xi32>
    %12 = arith.cmpi ne, %10, %11 : vector<16x16xi32>
    %c0_i32_7 = arith.constant 0 : i32
    %13 = vector.broadcast %c0_i32_7 : i32 to vector<16x16xi32>
    %14 = arith.cmpi slt, %10, %13 : vector<16x16xi32>
    %c0_i32_8 = arith.constant 0 : i32
    %15 = arith.cmpi slt, %8, %c0_i32_8 : i32
    %16 = vector.broadcast %15 : i1 to vector<16x16xi1>
    %17 = vector.broadcast %16 : vector<16x16xi1> to vector<16x16xi1>
    %18 = arith.xori %14, %17 : vector<16x16xi1>
    %19 = arith.andi %18, %12 : vector<16x16xi1>
    %20 = vector.broadcast %8 : i32 to vector<16x16xi32>
    %21 = arith.addi %10, %20 : vector<16x16xi32>
    %22 = arith.select %19, %21, %10 : vector<16x16xi1>, vector<16x16xi32>
    %c2_i32 = arith.constant 2 : i32
    %23 = vector.broadcast %c2_i32 : i32 to vector<16x16xi32>
    %24 = arith.cmpi sge, %22, %23 : vector<16x16xi32>
    %c2_i32_9 = arith.constant 2 : i32
    %25 = vector.broadcast %c2_i32_9 : i32 to vector<16x16xi32>
    %26 = arith.cmpi slt, %22, %25 : vector<16x16xi32>
    %cst_10 = arith.constant 0.000000e+00 : bf16
    %27 = vector.broadcast %cst_10 : bf16 to vector<16x16xbf16>
    %c0_11 = arith.constant 0 : index
    %c0_12 = arith.constant 0 : index
    %28 = vector.load %arg5[%c0_11, %c0_12] : memref<16x36xbf16, #tpu.memory_space<vmem>>, vector<16x16xbf16>
    %29 = arith.select %24, %28, %27 : vector<16x16xi1>, vector<16x16xbf16>
    %c0_13 = arith.constant 0 : index
    %c0_14 = arith.constant 0 : index
    %30 = vector.load %arg6[%c0_13, %c0_14] : memref<144x16xbf16, #tpu.memory_space<vmem>>, vector<16x16xbf16>
    tpu.vector_store %arg6[%c0_13, %c0_14], %29 {strides = array<i32>} : memref<144x16xbf16, #tpu.memory_space<vmem>>, vector<16x16xbf16>,
    %c0_15 = arith.constant 0 : index
    %c2 = arith.constant 2 : index
    %31 = vector.load %arg5[%c0_15, %c2] : memref<16x36xbf16, #tpu.memory_space<vmem>>, vector<16x16xbf16>
    %c16 = arith.constant 16 : index
    %c0_16 = arith.constant 0 : index
    %32 = vector.load %arg6[%c16, %c0_16] : memref<144x16xbf16, #tpu.memory_space<vmem>>, vector<16x16xbf16>
    tpu.vector_store %arg6[%c16, %c0_16], %31 {strides = array<i32>} : memref<144x16xbf16, #tpu.memory_space<vmem>>, vector<16x16xbf16>,
    %c0_17 = arith.constant 0 : index
    %c4 = arith.constant 4 : index
    %33 = vector.load %arg5[%c0_17, %c4] : memref<16x36xbf16, #tpu.memory_space<vmem>>, vector<16x16xbf16>
    %34 = arith.select %26, %33, %27 : vector<16x16xi1>, vector<16x16xbf16>
    %c32 = arith.constant 32 : index
    %c0_18 = arith.constant 0 : index
    %35 = vector.load %arg6[%c32, %c0_18] : memref<144x16xbf16, #tpu.memory_space<vmem>>, vector<16x16xbf16>
    tpu.vector_store %arg6[%c32, %c0_18], %34 {strides = array<i32>} : memref<144x16xbf16, #tpu.memory_space<vmem>>, vector<16x16xbf16>,
    %c0_19 = arith.constant 0 : index
    %c8 = arith.constant 8 : index
    %36 = vector.load %arg5[%c0_19, %c8] : memref<16x36xbf16, #tpu.memory_space<vmem>>, vector<16x16xbf16>
    %37 = arith.select %24, %36, %27 : vector<16x16xi1>, vector<16x16xbf16>
    %c48 = arith.constant 48 : index
    %c0_20 = arith.constant 0 : index
    %38 = vector.load %arg6[%c48, %c0_20] : memref<144x16xbf16, #tpu.memory_space<vmem>>, vector<16x16xbf16>
    tpu.vector_store %arg6[%c48, %c0_20], %37 {strides = array<i32>} : memref<144x16xbf16, #tpu.memory_space<vmem>>, vector<16x16xbf16>,
    %c0_21 = arith.constant 0 : index
    %c10_22 = arith.constant 10 : index
    %39 = vector.load %arg5[%c0_21, %c10_22] : memref<16x36xbf16, #tpu.memory_space<vmem>>, vector<16x16xbf16>
    %c64 = arith.constant 64 : index
    %c0_23 = arith.constant 0 : index
    %40 = vector.load %arg6[%c64, %c0_23] : memref<144x16xbf16, #tpu.memory_space<vmem>>, vector<16x16xbf16>
    tpu.vector_store %arg6[%c64, %c0_23], %39 {strides = array<i32>} : memref<144x16xbf16, #tpu.memory_space<vmem>>, vector<16x16xbf16>,
    %c0_24 = arith.constant 0 : index
    %c12 = arith.constant 12 : index
    %41 = vector.load %arg5[%c0_24, %c12] : memref<16x36xbf16, #tpu.memory_space<vmem>>, vector<16x16xbf16>
    %42 = arith.select %26, %41, %27 : vector<16x16xi1>, vector<16x16xbf16>
    %c80 = arith.constant 80 : index
    %c0_25 = arith.constant 0 : index
    %43 = vector.load %arg6[%c80, %c0_25] : memref<144x16xbf16, #tpu.memory_space<vmem>>, vector<16x16xbf16>
    tpu.vector_store %arg6[%c80, %c0_25], %42 {strides = array<i32>} : memref<144x16xbf16, #tpu.memory_space<vmem>>, vector<16x16xbf16>,
    %c0_26 = arith.constant 0 : index
    %c16_27 = arith.constant 16 : index
    %44 = vector.load %arg5[%c0_26, %c16_27] : memref<16x36xbf16, #tpu.memory_space<vmem>>, vector<16x16xbf16>
    %45 = arith.select %24, %44, %27 : vector<16x16xi1>, vector<16x16xbf16>
    %c96 = arith.constant 96 : index
    %c0_28 = arith.constant 0 : index
    %46 = vector.load %arg6[%c96, %c0_28] : memref<144x16xbf16, #tpu.memory_space<vmem>>, vector<16x16xbf16>
    tpu.vector_store %arg6[%c96, %c0_28], %45 {strides = array<i32>} : memref<144x16xbf16, #tpu.memory_space<vmem>>, vector<16x16xbf16>,
    %c0_29 = arith.constant 0 : index
    %c18 = arith.constant 18 : index
    %47 = vector.load %arg5[%c0_29, %c18] : memref<16x36xbf16, #tpu.memory_space<vmem>>, vector<16x16xbf16>
    %c112 = arith.constant 112 : index
    %c0_30 = arith.constant 0 : index
    %48 = vector.load %arg6[%c112, %c0_30] : memref<144x16xbf16, #tpu.memory_space<vmem>>, vector<16x16xbf16>
    tpu.vector_store %arg6[%c112, %c0_30], %47 {strides = array<i32>} : memref<144x16xbf16, #tpu.memory_space<vmem>>, vector<16x16xbf16>,
    %c0_31 = arith.constant 0 : index
    %c20 = arith.constant 20 : index
    %49 = vector.load %arg5[%c0_31, %c20] : memref<16x36xbf16, #tpu.memory_space<vmem>>, vector<16x16xbf16>
    %50 = arith.select %26, %49, %27 : vector<16x16xi1>, vector<16x16xbf16>
    %c128 = arith.constant 128 : index
    %c0_32 = arith.constant 0 : index
    %51 = vector.load %arg6[%c128, %c0_32] : memref<144x16xbf16, #tpu.memory_space<vmem>>, vector<16x16xbf16>
    tpu.vector_store %arg6[%c128, %c0_32], %50 {strides = array<i32>} : memref<144x16xbf16, #tpu.memory_space<vmem>>, vector<16x16xbf16>,
    %c0_33 = arith.constant 0 : index
    %c0_34 = arith.constant 0 : index
    %52 = vector.load %arg2[%c0_33, %c0_34] : memref<16x144xbf16, #tpu.memory_space<vmem>>, vector<16x144xbf16>
    %c0_35 = arith.constant 0 : index
    %c0_36 = arith.constant 0 : index
    %53 = vector.load %arg6[%c0_35, %c0_36] : memref<144x16xbf16, #tpu.memory_space<vmem>>, vector<144x16xbf16>
    %cst_37 = arith.constant dense<0.000000e+00> : vector<16x16xf32>
    %54 = tpu.matmul %52, %53, %cst_37 {dimension_numbers = #tpu.dot_dimension_numbers<[1], [0], [0], [1], [0, 0, 1, 1], [], []>} : vector<16x144xbf16>, vector<144x16xbf16>, vector<16x16xf32> -> vector<16x16xf32>
    %c0_38 = arith.constant 0 : index
    %c0_39 = arith.constant 0 : index
    %55 = vector.load %arg3[%c0_38, %c0_39] : memref<16x1xf32, #tpu.memory_space<vmem>>, vector<16x1xf32>
    %56 = vector.broadcast %55 : vector<16x1xf32> to vector<16x16xf32>
    %57 = arith.addf %54, %56 : vector<16x16xf32>
    %cst_40 = arith.constant 0.000000e+00 : f32
    %58 = vector.broadcast %cst_40 : f32 to vector<16x16xf32>
    %59 = arith.maximumf %57, %58 : vector<16x16xf32>
    %60 = arith.truncf %59 : vector<16x16xf32> to vector<16x16xbf16>
    %c0_41 = arith.constant 0 : index
    %c0_42 = arith.constant 0 : index
    %c0_43 = arith.constant 0 : index
    %61 = vector.load %arg4[%c0_41, %c0_42, %c0_43] : memref<1x16x16xbf16, #tpu.memory_space<vmem>>, vector<1x16x16xbf16>
    %62 = vector.shape_cast %61 : vector<1x16x16xbf16> to vector<16x16xbf16>
    %63 = vector.shape_cast %60 : vector<16x16xbf16> to vector<1x16x16xbf16>
    tpu.vector_store %arg4[%c0_41, %c0_42, %c0_43], %63 {strides = array<i32>} : memref<1x16x16xbf16, #tpu.memory_space<vmem>>, vector<1x16x16xbf16>,
    return
  }
  func.func @transform_0(%arg0: i32) -> (i32, i32, i32) {
    %c0_i32 = arith.constant 0 : i32
    %c0_i32_0 = arith.constant 0 : i32
    %c0_i32_1 = arith.constant 0 : i32
    return %arg0, %c0_i32, %c0_i32_0 : i32, i32, i32
  }
  func.func @transform_1(%arg0: i32) -> (i32, i32) {
    %c0_i32 = arith.constant 0 : i32
    %c0_i32_0 = arith.constant 0 : i32
    %c0_i32_1 = arith.constant 0 : i32
    return %c0_i32, %c0_i32_0 : i32, i32
  }
  func.func @transform_2(%arg0: i32) -> (i32, i32) {
    %c0_i32 = arith.constant 0 : i32
    %c0_i32_0 = arith.constant 0 : i32
    %c0_i32_1 = arith.constant 0 : i32
    return %c0_i32, %c0_i32_0 : i32, i32
  }
  func.func @transform_3(%arg0: i32) -> (i32, i32, i32) {
    %c0_i32 = arith.constant 0 : i32
    %c0_i32_0 = arith.constant 0 : i32
    %c0_i32_1 = arith.constant 0 : i32
    return %arg0, %c0_i32, %c0_i32_0 : i32, i32, i32
  }
}

module attributes {stable_mosaic.version = 11 : i64} {
  func.func @_rebnconv_kernel(%arg0: i32, %arg1: memref<1x16x64xbf16, #tpu.memory_space<vmem>>, %arg2: memref<1x16x64xbf16, #tpu.memory_space<vmem>>, %arg3: memref<16x288xbf16, #tpu.memory_space<vmem>>, %arg4: memref<16x1xf32, #tpu.memory_space<vmem>>, %arg5: memref<1x16x64xbf16, #tpu.memory_space<vmem>>, %arg6: memref<32x82xbf16, #tpu.memory_space<vmem>>, %arg7: memref<288x64xbf16, #tpu.memory_space<vmem>>) attributes {dimension_semantics = [#tpu.dimension_semantics<parallel>], iteration_bounds = array<i64: 2>, scalar_prefetch = 0 : i64, scratch_operands = 2 : i64, tpu.core_type = #tpu.core_type<tc>, window_params = [{transform_indices = @transform_0, window_bounds = array<i64: 1, 16, 64>}, {transform_indices = @transform_1, window_bounds = array<i64: 1, 16, 64>}, {pipeline_mode = #tpu.pipeline_mode<synchronous>, transform_indices = @transform_2, window_bounds = array<i64: 16, 288>}, {pipeline_mode = #tpu.pipeline_mode<synchronous>, transform_indices = @transform_3, window_bounds = array<i64: 16, 1>}, {transform_indices = @transform_4, window_bounds = array<i64: 1, 16, 64>}]} {
    %cst = arith.constant 0.000000e+00 : bf16
    %0 = vector.broadcast %cst : bf16 to vector<32x9xbf16>
    %c0 = arith.constant 0 : index
    %c0_0 = arith.constant 0 : index
    %1 = vector.load %arg6[%c0, %c0_0] : memref<32x82xbf16, #tpu.memory_space<vmem>>, vector<32x9xbf16>
    tpu.vector_store %arg6[%c0, %c0_0], %0 {strides = array<i32>} : memref<32x82xbf16, #tpu.memory_space<vmem>>, vector<32x9xbf16>,
    %c0_1 = arith.constant 0 : index
    %c73 = arith.constant 73 : index
    %2 = vector.load %arg6[%c0_1, %c73] : memref<32x82xbf16, #tpu.memory_space<vmem>>, vector<32x9xbf16>
    tpu.vector_store %arg6[%c0_1, %c73], %0 {strides = array<i32>} : memref<32x82xbf16, #tpu.memory_space<vmem>>, vector<32x9xbf16>,
    %c0_2 = arith.constant 0 : index
    %c0_3 = arith.constant 0 : index
    %c0_4 = arith.constant 0 : index
    %3 = vector.load %arg1[%c0_2, %c0_3, %c0_4] : memref<1x16x64xbf16, #tpu.memory_space<vmem>>, vector<1x16x64xbf16>
    %4 = vector.shape_cast %3 : vector<1x16x64xbf16> to vector<16x64xbf16>
    %c0_5 = arith.constant 0 : index
    %c9 = arith.constant 9 : index
    %5 = vector.load %arg6[%c0_5, %c9] : memref<32x82xbf16, #tpu.memory_space<vmem>>, vector<16x64xbf16>
    tpu.vector_store %arg6[%c0_5, %c9], %4 {strides = array<i32>} : memref<32x82xbf16, #tpu.memory_space<vmem>>, vector<16x64xbf16>,
    %c0_6 = arith.constant 0 : index
    %c0_7 = arith.constant 0 : index
    %c0_8 = arith.constant 0 : index
    %6 = vector.load %arg2[%c0_6, %c0_7, %c0_8] : memref<1x16x64xbf16, #tpu.memory_space<vmem>>, vector<1x16x64xbf16>
    %7 = vector.shape_cast %6 : vector<1x16x64xbf16> to vector<16x64xbf16>
    %c16 = arith.constant 16 : index
    %c9_9 = arith.constant 9 : index
    %8 = vector.load %arg6[%c16, %c9_9] : memref<32x82xbf16, #tpu.memory_space<vmem>>, vector<16x64xbf16>
    tpu.vector_store %arg6[%c16, %c9_9], %7 {strides = array<i32>} : memref<32x82xbf16, #tpu.memory_space<vmem>>, vector<16x64xbf16>,
    %9 = tpu.iota {dimensions = array<i32: 1>} : vector<32x64xi32>
    %c8_i32 = arith.constant 8 : i32
    %c0_i32 = arith.constant 0 : i32
    %10 = arith.cmpi eq, %c8_i32, %c0_i32 : i32
    %c1_i32 = arith.constant 1 : i32
    %11 = arith.select %10, %c1_i32, %c8_i32 : i32
    %12 = vector.broadcast %11 : i32 to vector<32x64xi32>
    %13 = arith.remsi %9, %12 : vector<32x64xi32>
    %c0_i32_10 = arith.constant 0 : i32
    %14 = vector.broadcast %c0_i32_10 : i32 to vector<32x64xi32>
    %15 = arith.cmpi ne, %13, %14 : vector<32x64xi32>
    %c0_i32_11 = arith.constant 0 : i32
    %16 = vector.broadcast %c0_i32_11 : i32 to vector<32x64xi32>
    %17 = arith.cmpi slt, %13, %16 : vector<32x64xi32>
    %c0_i32_12 = arith.constant 0 : i32
    %18 = arith.cmpi slt, %11, %c0_i32_12 : i32
    %19 = vector.broadcast %18 : i1 to vector<32x64xi1>
    %20 = vector.broadcast %19 : vector<32x64xi1> to vector<32x64xi1>
    %21 = arith.xori %17, %20 : vector<32x64xi1>
    %22 = arith.andi %21, %15 : vector<32x64xi1>
    %23 = vector.broadcast %11 : i32 to vector<32x64xi32>
    %24 = arith.addi %13, %23 : vector<32x64xi32>
    %25 = arith.select %22, %24, %13 : vector<32x64xi1>, vector<32x64xi32>
    %c1_i32_13 = arith.constant 1 : i32
    %26 = vector.broadcast %c1_i32_13 : i32 to vector<32x64xi32>
    %27 = arith.cmpi sge, %25, %26 : vector<32x64xi32>
    %c7_i32 = arith.constant 7 : i32
    %28 = vector.broadcast %c7_i32 : i32 to vector<32x64xi32>
    %29 = arith.cmpi slt, %25, %28 : vector<32x64xi32>
    %cst_14 = arith.constant 0.000000e+00 : bf16
    %30 = vector.broadcast %cst_14 : bf16 to vector<32x64xbf16>
    %c0_15 = arith.constant 0 : index
    %c0_16 = arith.constant 0 : index
    %31 = vector.load %arg6[%c0_15, %c0_16] : memref<32x82xbf16, #tpu.memory_space<vmem>>, vector<32x64xbf16>
    %32 = arith.select %27, %31, %30 : vector<32x64xi1>, vector<32x64xbf16>
    %c0_17 = arith.constant 0 : index
    %c0_18 = arith.constant 0 : index
    %33 = vector.load %arg7[%c0_17, %c0_18] : memref<288x64xbf16, #tpu.memory_space<vmem>>, vector<32x64xbf16>
    tpu.vector_store %arg7[%c0_17, %c0_18], %32 {strides = array<i32>} : memref<288x64xbf16, #tpu.memory_space<vmem>>, vector<32x64xbf16>,
    %c0_19 = arith.constant 0 : index
    %c1 = arith.constant 1 : index
    %34 = vector.load %arg6[%c0_19, %c1] : memref<32x82xbf16, #tpu.memory_space<vmem>>, vector<32x64xbf16>
    %c32 = arith.constant 32 : index
    %c0_20 = arith.constant 0 : index
    %35 = vector.load %arg7[%c32, %c0_20] : memref<288x64xbf16, #tpu.memory_space<vmem>>, vector<32x64xbf16>
    tpu.vector_store %arg7[%c32, %c0_20], %34 {strides = array<i32>} : memref<288x64xbf16, #tpu.memory_space<vmem>>, vector<32x64xbf16>,
    %c0_21 = arith.constant 0 : index
    %c2 = arith.constant 2 : index
    %36 = vector.load %arg6[%c0_21, %c2] : memref<32x82xbf16, #tpu.memory_space<vmem>>, vector<32x64xbf16>
    %37 = arith.select %29, %36, %30 : vector<32x64xi1>, vector<32x64xbf16>
    %c64 = arith.constant 64 : index
    %c0_22 = arith.constant 0 : index
    %38 = vector.load %arg7[%c64, %c0_22] : memref<288x64xbf16, #tpu.memory_space<vmem>>, vector<32x64xbf16>
    tpu.vector_store %arg7[%c64, %c0_22], %37 {strides = array<i32>} : memref<288x64xbf16, #tpu.memory_space<vmem>>, vector<32x64xbf16>,
    %c0_23 = arith.constant 0 : index
    %c8 = arith.constant 8 : index
    %39 = vector.load %arg6[%c0_23, %c8] : memref<32x82xbf16, #tpu.memory_space<vmem>>, vector<32x64xbf16>
    %40 = arith.select %27, %39, %30 : vector<32x64xi1>, vector<32x64xbf16>
    %c96 = arith.constant 96 : index
    %c0_24 = arith.constant 0 : index
    %41 = vector.load %arg7[%c96, %c0_24] : memref<288x64xbf16, #tpu.memory_space<vmem>>, vector<32x64xbf16>
    tpu.vector_store %arg7[%c96, %c0_24], %40 {strides = array<i32>} : memref<288x64xbf16, #tpu.memory_space<vmem>>, vector<32x64xbf16>,
    %c0_25 = arith.constant 0 : index
    %c9_26 = arith.constant 9 : index
    %42 = vector.load %arg6[%c0_25, %c9_26] : memref<32x82xbf16, #tpu.memory_space<vmem>>, vector<32x64xbf16>
    %c128 = arith.constant 128 : index
    %c0_27 = arith.constant 0 : index
    %43 = vector.load %arg7[%c128, %c0_27] : memref<288x64xbf16, #tpu.memory_space<vmem>>, vector<32x64xbf16>
    tpu.vector_store %arg7[%c128, %c0_27], %42 {strides = array<i32>} : memref<288x64xbf16, #tpu.memory_space<vmem>>, vector<32x64xbf16>,
    %c0_28 = arith.constant 0 : index
    %c10 = arith.constant 10 : index
    %44 = vector.load %arg6[%c0_28, %c10] : memref<32x82xbf16, #tpu.memory_space<vmem>>, vector<32x64xbf16>
    %45 = arith.select %29, %44, %30 : vector<32x64xi1>, vector<32x64xbf16>
    %c160 = arith.constant 160 : index
    %c0_29 = arith.constant 0 : index
    %46 = vector.load %arg7[%c160, %c0_29] : memref<288x64xbf16, #tpu.memory_space<vmem>>, vector<32x64xbf16>
    tpu.vector_store %arg7[%c160, %c0_29], %45 {strides = array<i32>} : memref<288x64xbf16, #tpu.memory_space<vmem>>, vector<32x64xbf16>,
    %c0_30 = arith.constant 0 : index
    %c16_31 = arith.constant 16 : index
    %47 = vector.load %arg6[%c0_30, %c16_31] : memref<32x82xbf16, #tpu.memory_space<vmem>>, vector<32x64xbf16>
    %48 = arith.select %27, %47, %30 : vector<32x64xi1>, vector<32x64xbf16>
    %c192 = arith.constant 192 : index
    %c0_32 = arith.constant 0 : index
    %49 = vector.load %arg7[%c192, %c0_32] : memref<288x64xbf16, #tpu.memory_space<vmem>>, vector<32x64xbf16>
    tpu.vector_store %arg7[%c192, %c0_32], %48 {strides = array<i32>} : memref<288x64xbf16, #tpu.memory_space<vmem>>, vector<32x64xbf16>,
    %c0_33 = arith.constant 0 : index
    %c17 = arith.constant 17 : index
    %50 = vector.load %arg6[%c0_33, %c17] : memref<32x82xbf16, #tpu.memory_space<vmem>>, vector<32x64xbf16>
    %c224 = arith.constant 224 : index
    %c0_34 = arith.constant 0 : index
    %51 = vector.load %arg7[%c224, %c0_34] : memref<288x64xbf16, #tpu.memory_space<vmem>>, vector<32x64xbf16>
    tpu.vector_store %arg7[%c224, %c0_34], %50 {strides = array<i32>} : memref<288x64xbf16, #tpu.memory_space<vmem>>, vector<32x64xbf16>,
    %c0_35 = arith.constant 0 : index
    %c18 = arith.constant 18 : index
    %52 = vector.load %arg6[%c0_35, %c18] : memref<32x82xbf16, #tpu.memory_space<vmem>>, vector<32x64xbf16>
    %53 = arith.select %29, %52, %30 : vector<32x64xi1>, vector<32x64xbf16>
    %c256 = arith.constant 256 : index
    %c0_36 = arith.constant 0 : index
    %54 = vector.load %arg7[%c256, %c0_36] : memref<288x64xbf16, #tpu.memory_space<vmem>>, vector<32x64xbf16>
    tpu.vector_store %arg7[%c256, %c0_36], %53 {strides = array<i32>} : memref<288x64xbf16, #tpu.memory_space<vmem>>, vector<32x64xbf16>,
    %c0_37 = arith.constant 0 : index
    %c0_38 = arith.constant 0 : index
    %55 = vector.load %arg3[%c0_37, %c0_38] : memref<16x288xbf16, #tpu.memory_space<vmem>>, vector<16x288xbf16>
    %c0_39 = arith.constant 0 : index
    %c0_40 = arith.constant 0 : index
    %56 = vector.load %arg7[%c0_39, %c0_40] : memref<288x64xbf16, #tpu.memory_space<vmem>>, vector<288x64xbf16>
    %cst_41 = arith.constant dense<0.000000e+00> : vector<16x64xf32>
    %57 = tpu.matmul %55, %56, %cst_41 {dimension_numbers = #tpu.dot_dimension_numbers<[1], [0], [0], [1], [0, 0, 1, 1], [], []>} : vector<16x288xbf16>, vector<288x64xbf16>, vector<16x64xf32> -> vector<16x64xf32>
    %c0_42 = arith.constant 0 : index
    %c0_43 = arith.constant 0 : index
    %58 = vector.load %arg4[%c0_42, %c0_43] : memref<16x1xf32, #tpu.memory_space<vmem>>, vector<16x1xf32>
    %59 = vector.broadcast %58 : vector<16x1xf32> to vector<16x64xf32>
    %60 = arith.addf %57, %59 : vector<16x64xf32>
    %cst_44 = arith.constant 0.000000e+00 : f32
    %61 = vector.broadcast %cst_44 : f32 to vector<16x64xf32>
    %62 = arith.maximumf %60, %61 : vector<16x64xf32>
    %63 = arith.truncf %62 : vector<16x64xf32> to vector<16x64xbf16>
    %c0_45 = arith.constant 0 : index
    %c0_46 = arith.constant 0 : index
    %c0_47 = arith.constant 0 : index
    %64 = vector.load %arg5[%c0_45, %c0_46, %c0_47] : memref<1x16x64xbf16, #tpu.memory_space<vmem>>, vector<1x16x64xbf16>
    %65 = vector.shape_cast %64 : vector<1x16x64xbf16> to vector<16x64xbf16>
    %66 = vector.shape_cast %63 : vector<16x64xbf16> to vector<1x16x64xbf16>
    tpu.vector_store %arg5[%c0_45, %c0_46, %c0_47], %66 {strides = array<i32>} : memref<1x16x64xbf16, #tpu.memory_space<vmem>>, vector<1x16x64xbf16>,
    return
  }
  func.func @transform_0(%arg0: i32) -> (i32, i32, i32) {
    %c0_i32 = arith.constant 0 : i32
    %c0_i32_0 = arith.constant 0 : i32
    %c0_i32_1 = arith.constant 0 : i32
    return %arg0, %c0_i32, %c0_i32_0 : i32, i32, i32
  }
  func.func @transform_1(%arg0: i32) -> (i32, i32, i32) {
    %c0_i32 = arith.constant 0 : i32
    %c0_i32_0 = arith.constant 0 : i32
    %c0_i32_1 = arith.constant 0 : i32
    return %arg0, %c0_i32, %c0_i32_0 : i32, i32, i32
  }
  func.func @transform_2(%arg0: i32) -> (i32, i32) {
    %c0_i32 = arith.constant 0 : i32
    %c0_i32_0 = arith.constant 0 : i32
    %c0_i32_1 = arith.constant 0 : i32
    return %c0_i32, %c0_i32_0 : i32, i32
  }
  func.func @transform_3(%arg0: i32) -> (i32, i32) {
    %c0_i32 = arith.constant 0 : i32
    %c0_i32_0 = arith.constant 0 : i32
    %c0_i32_1 = arith.constant 0 : i32
    return %c0_i32, %c0_i32_0 : i32, i32
  }
  func.func @transform_4(%arg0: i32) -> (i32, i32, i32) {
    %c0_i32 = arith.constant 0 : i32
    %c0_i32_0 = arith.constant 0 : i32
    %c0_i32_1 = arith.constant 0 : i32
    return %arg0, %c0_i32, %c0_i32_0 : i32, i32, i32
  }
}

module attributes {stable_mosaic.version = 11 : i64} {
  func.func @_rebnconv_kernel(%arg0: i32, %arg1: memref<1x16x256xbf16, #tpu.memory_space<vmem>>, %arg2: memref<1x16x256xbf16, #tpu.memory_space<vmem>>, %arg3: memref<16x288xbf16, #tpu.memory_space<vmem>>, %arg4: memref<16x1xf32, #tpu.memory_space<vmem>>, %arg5: memref<1x16x256xbf16, #tpu.memory_space<vmem>>, %arg6: memref<32x290xbf16, #tpu.memory_space<vmem>>, %arg7: memref<288x256xbf16, #tpu.memory_space<vmem>>) attributes {dimension_semantics = [#tpu.dimension_semantics<parallel>], iteration_bounds = array<i64: 2>, scalar_prefetch = 0 : i64, scratch_operands = 2 : i64, tpu.core_type = #tpu.core_type<tc>, window_params = [{transform_indices = @transform_0, window_bounds = array<i64: 1, 16, 256>}, {transform_indices = @transform_1, window_bounds = array<i64: 1, 16, 256>}, {pipeline_mode = #tpu.pipeline_mode<synchronous>, transform_indices = @transform_2, window_bounds = array<i64: 16, 288>}, {pipeline_mode = #tpu.pipeline_mode<synchronous>, transform_indices = @transform_3, window_bounds = array<i64: 16, 1>}, {transform_indices = @transform_4, window_bounds = array<i64: 1, 16, 256>}]} {
    %cst = arith.constant 0.000000e+00 : bf16
    %0 = vector.broadcast %cst : bf16 to vector<32x17xbf16>
    %c0 = arith.constant 0 : index
    %c0_0 = arith.constant 0 : index
    %1 = vector.load %arg6[%c0, %c0_0] : memref<32x290xbf16, #tpu.memory_space<vmem>>, vector<32x17xbf16>
    tpu.vector_store %arg6[%c0, %c0_0], %0 {strides = array<i32>} : memref<32x290xbf16, #tpu.memory_space<vmem>>, vector<32x17xbf16>,
    %c0_1 = arith.constant 0 : index
    %c273 = arith.constant 273 : index
    %2 = vector.load %arg6[%c0_1, %c273] : memref<32x290xbf16, #tpu.memory_space<vmem>>, vector<32x17xbf16>
    tpu.vector_store %arg6[%c0_1, %c273], %0 {strides = array<i32>} : memref<32x290xbf16, #tpu.memory_space<vmem>>, vector<32x17xbf16>,
    %c0_2 = arith.constant 0 : index
    %c0_3 = arith.constant 0 : index
    %c0_4 = arith.constant 0 : index
    %3 = vector.load %arg1[%c0_2, %c0_3, %c0_4] : memref<1x16x256xbf16, #tpu.memory_space<vmem>>, vector<1x16x256xbf16>
    %4 = vector.shape_cast %3 : vector<1x16x256xbf16> to vector<16x256xbf16>
    %c0_5 = arith.constant 0 : index
    %c17 = arith.constant 17 : index
    %5 = vector.load %arg6[%c0_5, %c17] : memref<32x290xbf16, #tpu.memory_space<vmem>>, vector<16x256xbf16>
    tpu.vector_store %arg6[%c0_5, %c17], %4 {strides = array<i32>} : memref<32x290xbf16, #tpu.memory_space<vmem>>, vector<16x256xbf16>,
    %c0_6 = arith.constant 0 : index
    %c0_7 = arith.constant 0 : index
    %c0_8 = arith.constant 0 : index
    %6 = vector.load %arg2[%c0_6, %c0_7, %c0_8] : memref<1x16x256xbf16, #tpu.memory_space<vmem>>, vector<1x16x256xbf16>
    %7 = vector.shape_cast %6 : vector<1x16x256xbf16> to vector<16x256xbf16>
    %c16 = arith.constant 16 : index
    %c17_9 = arith.constant 17 : index
    %8 = vector.load %arg6[%c16, %c17_9] : memref<32x290xbf16, #tpu.memory_space<vmem>>, vector<16x256xbf16>
    tpu.vector_store %arg6[%c16, %c17_9], %7 {strides = array<i32>} : memref<32x290xbf16, #tpu.memory_space<vmem>>, vector<16x256xbf16>,
    %9 = tpu.iota {dimensions = array<i32: 1>} : vector<32x256xi32>
    %c16_i32 = arith.constant 16 : i32
    %c0_i32 = arith.constant 0 : i32
    %10 = arith.cmpi eq, %c16_i32, %c0_i32 : i32
    %c1_i32 = arith.constant 1 : i32
    %11 = arith.select %10, %c1_i32, %c16_i32 : i32
    %12 = vector.broadcast %11 : i32 to vector<32x256xi32>
    %13 = arith.remsi %9, %12 : vector<32x256xi32>
    %c0_i32_10 = arith.constant 0 : i32
    %14 = vector.broadcast %c0_i32_10 : i32 to vector<32x256xi32>
    %15 = arith.cmpi ne, %13, %14 : vector<32x256xi32>
    %c0_i32_11 = arith.constant 0 : i32
    %16 = vector.broadcast %c0_i32_11 : i32 to vector<32x256xi32>
    %17 = arith.cmpi slt, %13, %16 : vector<32x256xi32>
    %c0_i32_12 = arith.constant 0 : i32
    %18 = arith.cmpi slt, %11, %c0_i32_12 : i32
    %19 = vector.broadcast %18 : i1 to vector<32x256xi1>
    %20 = vector.broadcast %19 : vector<32x256xi1> to vector<32x256xi1>
    %21 = arith.xori %17, %20 : vector<32x256xi1>
    %22 = arith.andi %21, %15 : vector<32x256xi1>
    %23 = vector.broadcast %11 : i32 to vector<32x256xi32>
    %24 = arith.addi %13, %23 : vector<32x256xi32>
    %25 = arith.select %22, %24, %13 : vector<32x256xi1>, vector<32x256xi32>
    %c1_i32_13 = arith.constant 1 : i32
    %26 = vector.broadcast %c1_i32_13 : i32 to vector<32x256xi32>
    %27 = arith.cmpi sge, %25, %26 : vector<32x256xi32>
    %c15_i32 = arith.constant 15 : i32
    %28 = vector.broadcast %c15_i32 : i32 to vector<32x256xi32>
    %29 = arith.cmpi slt, %25, %28 : vector<32x256xi32>
    %cst_14 = arith.constant 0.000000e+00 : bf16
    %30 = vector.broadcast %cst_14 : bf16 to vector<32x256xbf16>
    %c0_15 = arith.constant 0 : index
    %c0_16 = arith.constant 0 : index
    %31 = vector.load %arg6[%c0_15, %c0_16] : memref<32x290xbf16, #tpu.memory_space<vmem>>, vector<32x256xbf16>
    %32 = arith.select %27, %31, %30 : vector<32x256xi1>, vector<32x256xbf16>
    %c0_17 = arith.constant 0 : index
    %c0_18 = arith.constant 0 : index
    %33 = vector.load %arg7[%c0_17, %c0_18] : memref<288x256xbf16, #tpu.memory_space<vmem>>, vector<32x256xbf16>
    tpu.vector_store %arg7[%c0_17, %c0_18], %32 {strides = array<i32>} : memref<288x256xbf16, #tpu.memory_space<vmem>>, vector<32x256xbf16>,
    %c0_19 = arith.constant 0 : index
    %c1 = arith.constant 1 : index
    %34 = vector.load %arg6[%c0_19, %c1] : memref<32x290xbf16, #tpu.memory_space<vmem>>, vector<32x256xbf16>
    %c32 = arith.constant 32 : index
    %c0_20 = arith.constant 0 : index
    %35 = vector.load %arg7[%c32, %c0_20] : memref<288x256xbf16, #tpu.memory_space<vmem>>, vector<32x256xbf16>
    tpu.vector_store %arg7[%c32, %c0_20], %34 {strides = array<i32>} : memref<288x256xbf16, #tpu.memory_space<vmem>>, vector<32x256xbf16>,
    %c0_21 = arith.constant 0 : index
    %c2 = arith.constant 2 : index
    %36 = vector.load %arg6[%c0_21, %c2] : memref<32x290xbf16, #tpu.memory_space<vmem>>, vector<32x256xbf16>
    %37 = arith.select %29, %36, %30 : vector<32x256xi1>, vector<32x256xbf16>
    %c64 = arith.constant 64 : index
    %c0_22 = arith.constant 0 : index
    %38 = vector.load %arg7[%c64, %c0_22] : memref<288x256xbf16, #tpu.memory_space<vmem>>, vector<32x256xbf16>
    tpu.vector_store %arg7[%c64, %c0_22], %37 {strides = array<i32>} : memref<288x256xbf16, #tpu.memory_space<vmem>>, vector<32x256xbf16>,
    %c0_23 = arith.constant 0 : index
    %c16_24 = arith.constant 16 : index
    %39 = vector.load %arg6[%c0_23, %c16_24] : memref<32x290xbf16, #tpu.memory_space<vmem>>, vector<32x256xbf16>
    %40 = arith.select %27, %39, %30 : vector<32x256xi1>, vector<32x256xbf16>
    %c96 = arith.constant 96 : index
    %c0_25 = arith.constant 0 : index
    %41 = vector.load %arg7[%c96, %c0_25] : memref<288x256xbf16, #tpu.memory_space<vmem>>, vector<32x256xbf16>
    tpu.vector_store %arg7[%c96, %c0_25], %40 {strides = array<i32>} : memref<288x256xbf16, #tpu.memory_space<vmem>>, vector<32x256xbf16>,
    %c0_26 = arith.constant 0 : index
    %c17_27 = arith.constant 17 : index
    %42 = vector.load %arg6[%c0_26, %c17_27] : memref<32x290xbf16, #tpu.memory_space<vmem>>, vector<32x256xbf16>
    %c128 = arith.constant 128 : index
    %c0_28 = arith.constant 0 : index
    %43 = vector.load %arg7[%c128, %c0_28] : memref<288x256xbf16, #tpu.memory_space<vmem>>, vector<32x256xbf16>
    tpu.vector_store %arg7[%c128, %c0_28], %42 {strides = array<i32>} : memref<288x256xbf16, #tpu.memory_space<vmem>>, vector<32x256xbf16>,
    %c0_29 = arith.constant 0 : index
    %c18 = arith.constant 18 : index
    %44 = vector.load %arg6[%c0_29, %c18] : memref<32x290xbf16, #tpu.memory_space<vmem>>, vector<32x256xbf16>
    %45 = arith.select %29, %44, %30 : vector<32x256xi1>, vector<32x256xbf16>
    %c160 = arith.constant 160 : index
    %c0_30 = arith.constant 0 : index
    %46 = vector.load %arg7[%c160, %c0_30] : memref<288x256xbf16, #tpu.memory_space<vmem>>, vector<32x256xbf16>
    tpu.vector_store %arg7[%c160, %c0_30], %45 {strides = array<i32>} : memref<288x256xbf16, #tpu.memory_space<vmem>>, vector<32x256xbf16>,
    %c0_31 = arith.constant 0 : index
    %c32_32 = arith.constant 32 : index
    %47 = vector.load %arg6[%c0_31, %c32_32] : memref<32x290xbf16, #tpu.memory_space<vmem>>, vector<32x256xbf16>
    %48 = arith.select %27, %47, %30 : vector<32x256xi1>, vector<32x256xbf16>
    %c192 = arith.constant 192 : index
    %c0_33 = arith.constant 0 : index
    %49 = vector.load %arg7[%c192, %c0_33] : memref<288x256xbf16, #tpu.memory_space<vmem>>, vector<32x256xbf16>
    tpu.vector_store %arg7[%c192, %c0_33], %48 {strides = array<i32>} : memref<288x256xbf16, #tpu.memory_space<vmem>>, vector<32x256xbf16>,
    %c0_34 = arith.constant 0 : index
    %c33 = arith.constant 33 : index
    %50 = vector.load %arg6[%c0_34, %c33] : memref<32x290xbf16, #tpu.memory_space<vmem>>, vector<32x256xbf16>
    %c224 = arith.constant 224 : index
    %c0_35 = arith.constant 0 : index
    %51 = vector.load %arg7[%c224, %c0_35] : memref<288x256xbf16, #tpu.memory_space<vmem>>, vector<32x256xbf16>
    tpu.vector_store %arg7[%c224, %c0_35], %50 {strides = array<i32>} : memref<288x256xbf16, #tpu.memory_space<vmem>>, vector<32x256xbf16>,
    %c0_36 = arith.constant 0 : index
    %c34 = arith.constant 34 : index
    %52 = vector.load %arg6[%c0_36, %c34] : memref<32x290xbf16, #tpu.memory_space<vmem>>, vector<32x256xbf16>
    %53 = arith.select %29, %52, %30 : vector<32x256xi1>, vector<32x256xbf16>
    %c256 = arith.constant 256 : index
    %c0_37 = arith.constant 0 : index
    %54 = vector.load %arg7[%c256, %c0_37] : memref<288x256xbf16, #tpu.memory_space<vmem>>, vector<32x256xbf16>
    tpu.vector_store %arg7[%c256, %c0_37], %53 {strides = array<i32>} : memref<288x256xbf16, #tpu.memory_space<vmem>>, vector<32x256xbf16>,
    %c0_38 = arith.constant 0 : index
    %c0_39 = arith.constant 0 : index
    %55 = vector.load %arg3[%c0_38, %c0_39] : memref<16x288xbf16, #tpu.memory_space<vmem>>, vector<16x288xbf16>
    %c0_40 = arith.constant 0 : index
    %c0_41 = arith.constant 0 : index
    %56 = vector.load %arg7[%c0_40, %c0_41] : memref<288x256xbf16, #tpu.memory_space<vmem>>, vector<288x256xbf16>
    %cst_42 = arith.constant dense<0.000000e+00> : vector<16x256xf32>
    %57 = tpu.matmul %55, %56, %cst_42 {dimension_numbers = #tpu.dot_dimension_numbers<[1], [0], [0], [1], [0, 0, 1, 1], [], []>} : vector<16x288xbf16>, vector<288x256xbf16>, vector<16x256xf32> -> vector<16x256xf32>
    %c0_43 = arith.constant 0 : index
    %c0_44 = arith.constant 0 : index
    %58 = vector.load %arg4[%c0_43, %c0_44] : memref<16x1xf32, #tpu.memory_space<vmem>>, vector<16x1xf32>
    %59 = vector.broadcast %58 : vector<16x1xf32> to vector<16x256xf32>
    %60 = arith.addf %57, %59 : vector<16x256xf32>
    %cst_45 = arith.constant 0.000000e+00 : f32
    %61 = vector.broadcast %cst_45 : f32 to vector<16x256xf32>
    %62 = arith.maximumf %60, %61 : vector<16x256xf32>
    %63 = arith.truncf %62 : vector<16x256xf32> to vector<16x256xbf16>
    %c0_46 = arith.constant 0 : index
    %c0_47 = arith.constant 0 : index
    %c0_48 = arith.constant 0 : index
    %64 = vector.load %arg5[%c0_46, %c0_47, %c0_48] : memref<1x16x256xbf16, #tpu.memory_space<vmem>>, vector<1x16x256xbf16>
    %65 = vector.shape_cast %64 : vector<1x16x256xbf16> to vector<16x256xbf16>
    %66 = vector.shape_cast %63 : vector<16x256xbf16> to vector<1x16x256xbf16>
    tpu.vector_store %arg5[%c0_46, %c0_47, %c0_48], %66 {strides = array<i32>} : memref<1x16x256xbf16, #tpu.memory_space<vmem>>, vector<1x16x256xbf16>,
    return
  }
  func.func @transform_0(%arg0: i32) -> (i32, i32, i32) {
    %c0_i32 = arith.constant 0 : i32
    %c0_i32_0 = arith.constant 0 : i32
    %c0_i32_1 = arith.constant 0 : i32
    return %arg0, %c0_i32, %c0_i32_0 : i32, i32, i32
  }
  func.func @transform_1(%arg0: i32) -> (i32, i32, i32) {
    %c0_i32 = arith.constant 0 : i32
    %c0_i32_0 = arith.constant 0 : i32
    %c0_i32_1 = arith.constant 0 : i32
    return %arg0, %c0_i32, %c0_i32_0 : i32, i32, i32
  }
  func.func @transform_2(%arg0: i32) -> (i32, i32) {
    %c0_i32 = arith.constant 0 : i32
    %c0_i32_0 = arith.constant 0 : i32
    %c0_i32_1 = arith.constant 0 : i32
    return %c0_i32, %c0_i32_0 : i32, i32
  }
  func.func @transform_3(%arg0: i32) -> (i32, i32) {
    %c0_i32 = arith.constant 0 : i32
    %c0_i32_0 = arith.constant 0 : i32
    %c0_i32_1 = arith.constant 0 : i32
    return %c0_i32, %c0_i32_0 : i32, i32
  }
  func.func @transform_4(%arg0: i32) -> (i32, i32, i32) {
    %c0_i32 = arith.constant 0 : i32
    %c0_i32_0 = arith.constant 0 : i32
    %c0_i32_1 = arith.constant 0 : i32
    return %arg0, %c0_i32, %c0_i32_0 : i32, i32, i32
  }
}

</mosaic_0001>

<bundles_post_ra>
// kernel: rsu_forward.8
= control target key start
LH: loop header
LB: loop body
LE: loop exit
PB: predicated region body
PF: predicated region fallthrough
CT: control target
= control target key end

     0   :  { %s893_s12 = smov 0   ;;  %s1008_s0 = inlined_call_operand.vmem [shape: bf16[2,16,256], index: 0, kind: input, shape index: {}]   ;;  %s1009_s1 = inlined_call_operand.vmem [shape: bf16[16,144], index: 1, kind: input, shape index: {}]   ;;  %s1010_s2 = inlined_call_operand.vmem [shape: f32[16,1], index: 2, kind: input, shape index: {}]   ;;  %s1011_s3 = inlined_call_operand.vmem [shape: bf16[2,16,256], index: 3, kind: output, shape index: {}]  }
   0x1 LB: > { %s784_s13 = sadd.s32 4294967295, %s856_s12   ;;  %p788_p0 = scmp.ge.s32.totalorder %s856_s12, 1  ;;  %s856_s12 = sphi %s893_s12, %s13_s12  }
   0x2   : > { %p137_p1 = scmp.lt.s32.totalorder %s856_s12, 3 }
   0x4   : > { %p138_p2 = pnand %p788_p0, %p137_p1 }
   0x5   : > { %p161_p3 = scmp.lt.s32.totalorder (!%p138_p2), %s784_s13, 1  ;;  %s859_s18 = smov (!%p138_p2), 17  }
   0x6   : > { %141 = sbr.rel (%p138_p2) target bundleno = 532 (0x214), region = 32  ;;  %s860_s19 = smov (!%p138_p2), 32  }
   0x7   : > { %s861_s20 = smov (!%p138_p2), 18   ;;  %s862_s21 = smov (!%p138_p2), 16  }
   0x8   : > { %s863_s22 = smov (!%p138_p2), 2   ;;  %s864_s23 = smov (!%p138_p2), 34  }
   0x9   : > { %s865_s24 = smov (!%p138_p2), 95   ;;  %s866_s25 = smov (!%p138_p2), 111  }
   0xa   : > { %s867_s26 = smov (!%p138_p2), 127   ;;  %s868_s27 = smov (!%p138_p2), 96  }
   0xb   : > { %v204_v0 = vlaneseq  ;;  %vm174_vm0 = vcmask 134144   ;;  %vm177_vm1 = vcmask 273544   ;;  %v858_v1 = vmov 0   ;;  %s1015_s13 = smov (!%p161_p3, %s784_s13), 1  ;;  %s869_s28 = smov 110  }
   0xc   : > { %175 = vst.msk [vmem:[#allocation2] sm:$0xf] %vm174_vm0, %v858_v1  ;;  %176 = vst.msk [vmem:[#allocation2 + $0xc] sm:$0xf] %vm174_vm0, %v858_v1  ;;  %845 = vset.pattern.permute.xlu1 %v858_v1  ;;  %846 = vset.pattern.permute.xlu0 %v858_v1  ;;  %s818_s14 = sshll.u32 %s1015_s13, 4  ;;  %vm197_vm8 = vcmask 1043592  }
   0xd   : > { %178 = vst.msk [vmem:[#allocation2 + $0x8] sm:$0xf] %vm177_vm1, %v858_v1  ;;  %179 = vst.msk [vmem:[#allocation2 + $0x14] sm:$0xf] %vm177_vm1, %v858_v1  ;;  %v205_v2 = vand.u32 127, %v204_v0  ;;  %s165_s17 = scalar_lea.vmem %s1008_s0, %s818_s14  ;;  %vm198_vm9 = vcmask 1047556  }
   0xe   : > { %v180_v5 = vld [vmem:[%s165_s17] sm:$0xff]  ;;  %v181_v7 = vld [vmem:[%s165_s17 + $0x8] sm:$0xff]  ;;  %vm190_vm10 = vcmask 138240   ;;  %vm199_vm11 = vmor %vm198_vm9, %vm197_vm8  ;;  %vm431_vm12 = vcmask 261120   ;;  %vm391_vm15 = vcmask 146432   ;;  %s870_s29 = smov 112  }
   0xf   : > { %v206_v3 = vadd.s32 128, %v205_v2  ;;  %v211_v4 = vand.u32 15, %v205_v2  ;;  %184 = vrot.lane.b32.xlu0 %v180_v5, %s859_s18  ;;  %s871_s30 = smov 126   ;;  %vm500_vm8 = vcmask 277504   ;;  %s872_s6 = smov 94  }
  0x11   : > { %v218_v6 = vand.u32 15, %v206_v3  ;;  %vm231_vm2 = vcmp.ge.s32.totalorder %v211_v4, 1  ;;  %vm233_vm3 = vcmp.lt.s32.totalorder %v211_v4, 15 }
  0x13   : > { %vm232_vm4 = vcmp.ge.s32.totalorder %v218_v6, 1  ;;  %vm234_vm5 = vcmp.lt.s32.totalorder %v218_v6, 15  ;;  %186 = vrot.lane.b32.xlu0 %v181_v7, %s859_s18  ;;  %v849_v6 = vld [vmem:[%s1009_s1 + $0x4] ss:$8 sps:$4 sm:$0xff]   ;;  %s170_s18 = scalar_lea.vmem %s1011_s3, %s818_s14 }
  0x14   : > { %vm911_vm6 = vmpackc.low %vm232_vm4, %vm231_vm2  ;;  %vm322_vm2 = vcmask 130048  }
  0x15   : > { %v318_v9 = vsel %vm911_vm6, 65537, %v858_v1  ;;  %vm276_vm7 = vmpackc.low %vm234_vm5, %vm233_vm3  ;;  %vm281_vm5 = vcmask 15360   ;;  %813 = vmatprep.mubr.msk.bf16.mxu0 %vm322_vm2, %v849_v6 }
  0x16   : > { %428 = vrot.lane.b32.xlu1 %v318_v9, %s860_s19  ;;  %v277_v10 = vsel %vm276_vm7, 65537, %v858_v1 }
  0x17   : > { %319 = vrot.lane.b32.xlu0 %v318_v9, %s862_s21 }
  0x1a   : > { %388 = vrot.lane.b32.xlu1 %v277_v10, %s861_s20 }
  0x1b   : > { %497 = vrot.lane.b32.xlu0 %v277_v10, %s864_s23 }
  0x1e   : > { %278 = vrot.lane.b32.xlu1 %v277_v10, %s863_s22 }
  0x81   : > { %v185_v11 = vpop.permute.xlu0 %184 }
  0x82   : > { %v188_v12 = vrot.slane %v185_v11, 4 }
  0x84   : > { %v191_v13 = vsel %vm190_vm10, %v188_v12, %v185_v11  ;;  %201 = vst.msk [vmem:[#allocation2 + $0x8] sm:$0xf] %vm174_vm0, %v188_v12  ;;  %v554_v11 = vld [vmem:[%s1010_s2 + $0x8] sm:$0xff]  ;;  %v553_v12 = vld [vmem:[%s1010_s2] sm:$0xff] }
  0x85   : > { %200 = vst.msk [vmem:[#allocation2] sm:$0xff] %vm199_vm11, %v191_v13  ;;  %v187_v14 = vpop.permute.xlu0 %186 }
  0x86   : > { %v189_v15 = vrot.slane %v187_v14, 4 }
  0x88   : > { %v192_v16 = vsel %vm190_vm10, %v189_v15, %v187_v14  ;;  %203 = vst.msk [vmem:[#allocation2 + $0x14] sm:$0xf] %vm174_vm0, %v189_v15  ;;  %v429_v22 = vpop.permute.xlu1 %428 }
  0x89   : > { %202 = vst.msk [vmem:[#allocation2 + $0xc] sm:$0xff] %vm199_vm11, %v192_v16  ;;  %v430_v23 = vrot.slane %v429_v22, 4  ;;  %v320_v38 = vpop.permute.xlu0 %319  ;;  %vm262_vm11 = vcmask 1043456  }
  0x8a   : > { %v321_v42 = vrot.slane %v320_v38, 4 }
  0x8b   : > { %v465_v17 = vld [vmem:[#allocation2 + $0x8] sm:$0xf]  ;;  %v432_v29 = vsel %vm431_vm12, %v430_v23, %v429_v22  ;;  %vm434_vm13 = vcmp.ne.s16.totalorder %v430_v23, 0  ;;  %vm485_vm12 = vcmask 777216  }
  0x8c   : > { %474 = vrot.lane.b32.xlu0 %v465_v17, %s865_s24  ;;  %v919_v18 = vld [vmem:[#allocation2] sm:$0xff]  ;;  %v356_v21 = vld [vmem:[#allocation2 + $0x8] sm:$0xf]  ;;  %v389_v30 = vpop.permute.xlu1 %388  ;;  %vm433_vm14 = vcmp.ne.s16.totalorder %v432_v29, 0  ;;  %v323_v46 = vsel %vm322_vm2, %v321_v42, %v320_v38  ;;  %vm325_vm3 = vcmp.ne.s16.totalorder %v321_v42, 0  ;;  %vm264_vm2 = vcmask 1039360  }
  0x8d   : > { %472 = vrot.lane.b32.xlu1 %v919_v18, %s865_s24  ;;  %v929_v24 = vsel %vm911_vm6, %v919_v18, 0  ;;  %v243_v31 = vld [vmem:[#allocation2 + $0x8] sm:$0xf]  ;;  %v390_v33 = vrot.slane %v389_v30, 4  ;;  %v435_v35 = vsel %vm433_vm14, %v919_v18, 0  ;;  %vm324_vm4 = vcmp.ne.s16.totalorder %v323_v46, 0  ;;  %v498_v59 = vpop.permute.xlu0 %497 }
  0x8e   : > { %v425_v32 = vld [vmem:[#allocation2 + $0x8] sm:$0xf]  ;;  %v326_v53 = vsel %vm324_vm4, %v919_v18, 0  ;;  %v499_v63 = vrot.slane %v498_v59, 4 }
  0x8f   : > { %v467_v19 = vld [vmem:[#allocation2 + $0x14] sm:$0xf]  ;;  %v436_v34 = vsel %vm434_vm13, %v425_v32, 0  ;;  %v392_v37 = vsel %vm391_vm15, %v390_v33, %v389_v30  ;;  %v385_v41 = vld [vmem:[#allocation2 + $0x8] sm:$0xf]  ;;  %vm394_vm0 = vcmp.ne.s16.totalorder %v390_v33, 0 }
  0x90   : > { %478 = vrot.lane.b32.xlu0 %v467_v19, %s865_s24  ;;  %v922_v20 = vld [vmem:[#allocation2 + $0xc] sm:$0xff]  ;;  %v358_v26 = vld [vmem:[#allocation2 + $0x14] sm:$0xf]  ;;  %vm393_vm1 = vcmp.ne.s16.totalorder %v392_v37, 0  ;;  %v396_v43 = vsel %vm394_vm0, %v385_v41, 0  ;;  %v279_v47 = vpop.permute.xlu1 %278  ;;  %v501_v2 = vsel %vm500_vm8, %v499_v63, %v498_v59  ;;  %vm503_vm9 = vcmp.ne.s16.totalorder %v499_v63, 0 }
  0x91   : > { %476 = vrot.lane.b32.xlu1 %v922_v20, %s865_s24  ;;  %v934_v25 = vsel %vm911_vm6, %v922_v20, 0  ;;  %v427_v36 = vld [vmem:[#allocation2 + $0x14] sm:$0xf]  ;;  %v437_v40 = vsel %vm433_vm14, %v922_v20, 0  ;;  %v395_v44 = vsel %vm393_vm1, %v919_v18, 0  ;;  %v397_v49 = vsel %vm393_vm1, %v922_v20, 0 }
  0x92   : > { %v796_v27 = vcombine.high %v929_v24, %v934_v25  ;;  %v795_v28 = vcombine.low %v929_v24, %v934_v25  ;;  %v438_v39 = vsel %vm434_vm13, %v427_v36, 0  ;;  %v387_v45 = vld [vmem:[#allocation2 + $0x14] sm:$0xf]  ;;  %v315_v50 = vld [vmem:[#allocation2 + $0x8] sm:$0xf]  ;;  %v280_v51 = vrot.slane %v279_v47, 4 }
  0x93   : > { %v398_v48 = vsel %vm394_vm0, %v387_v45, 0  ;;  %v327_v52 = vsel %vm325_vm3, %v315_v50, 0  ;;  %v317_v54 = vld [vmem:[#allocation2 + $0x14] sm:$0xf]  ;;  %v328_v57 = vsel %vm324_vm4, %v922_v20, 0  ;;  %vm502_vm10 = vcmp.ne.s16.totalorder %v501_v2, 0 }
  0x94   : > { %365 = vrot.lane.b32.xlu0 %v356_v21, %s866_s25  ;;  %v282_v55 = vsel %vm281_vm5, %v280_v51, %v279_v47  ;;  %v329_v56 = vsel %vm325_vm3, %v317_v54, 0  ;;  %vm284_vm6 = vcmp.ne.s16.totalorder %v280_v51, 0  ;;  %v273_v58 = vld [vmem:[#allocation2 + $0x8] sm:$0xf]  ;;  %v275_v62 = vld [vmem:[#allocation2 + $0x14] sm:$0xf] }
  0x95   : > { %363 = vrot.lane.b32.xlu1 %v919_v18, %s866_s25  ;;  %vm283_vm7 = vcmp.ne.s16.totalorder %v282_v55, 0  ;;  %v286_v60 = vsel %vm284_vm6, %v273_v58, 0  ;;  %v288_v0 = vsel %vm284_vm6, %v275_v62, 0  ;;  %v245_v3 = vld [vmem:[#allocation2 + $0x14] sm:$0xf]  ;;  %v504_v7 = vsel %vm502_vm10, %v919_v18, 0 }
  0x96   : > { %v285_v61 = vsel %vm283_vm7, %v919_v18, 0  ;;  %v287_v1 = vsel %vm283_vm7, %v922_v20, 0  ;;  %v494_v4 = vld [vmem:[#allocation2 + $0x8] sm:$0xf]  ;;  %v496_v8 = vld [vmem:[#allocation2 + $0x14] sm:$0xf] }
  0x97   : > { %v505_v5 = vsel %vm503_vm9, %v494_v4, 0  ;;  %v507_v9 = vsel %vm503_vm9, %v496_v8, 0  ;;  %v506_v10 = vsel %vm502_vm10, %v922_v20, 0  ;;  %vm456_vm13 = vcmask 785408  }
  0x98   : > { %369 = vrot.lane.b32.xlu0 %v358_v26, %s866_s25  ;;  %vm416_vm14 = vcmask 900096   ;;  %vm376_vm15 = vcmask 908288   ;;  %vm347_vm0 = vcmask 916480   ;;  %vm306_vm1 = vcmask 1031168  }
  0x99   : > { %367 = vrot.lane.b32.xlu1 %v922_v20, %s866_s25  ;;  %vm525_vm3 = vcmask 769024  }
  0x9c   : > { %252 = vrot.lane.b32.xlu0 %v243_v31, %s867_s26 }
  0x9d   : > { %250 = vrot.lane.b32.xlu1 %v919_v18, %s867_s26 }
  0xa0   : > { %445 = vrot.lane.b32.xlu0 %v436_v34, %s868_s27 }
  0xa1   : > { %443 = vrot.lane.b32.xlu1 %v435_v35, %s868_s27 }
  0xa4   : > { %449 = vrot.lane.b32.xlu0 %v438_v39, %s868_s27 }
  0xa5   : > { %447 = vrot.lane.b32.xlu1 %v437_v40, %s868_s27 }
  0xa8   : > { %405 = vrot.lane.b32.xlu0 %v396_v43, %s869_s28 }
  0xa9   : > { %403 = vrot.lane.b32.xlu1 %v395_v44, %s869_s28 }
  0xac   : > { %409 = vrot.lane.b32.xlu0 %v398_v48, %s869_s28 }
  0xad   : > { %407 = vrot.lane.b32.xlu1 %v397_v49, %s869_s28 }
  0xb0   : > { %336 = vrot.lane.b32.xlu0 %v327_v52, %s870_s29 }
  0xb1   : > { %334 = vrot.lane.b32.xlu1 %v326_v53, %s870_s29 }
  0xb4   : > { %340 = vrot.lane.b32.xlu0 %v329_v56, %s870_s29 }
  0xb5   : > { %338 = vrot.lane.b32.xlu1 %v328_v57, %s870_s29 }
  0xb8   : > { %295 = vrot.lane.b32.xlu0 %v286_v60, %s871_s30 }
  0xb9   : > { %293 = vrot.lane.b32.xlu1 %v285_v61, %s871_s30 }
  0xbc   : > { %299 = vrot.lane.b32.xlu0 %v288_v0, %s871_s30 }
  0xbd   : > { %297 = vrot.lane.b32.xlu1 %v287_v1, %s871_s30 }
  0xc0   : > { %256 = vrot.lane.b32.xlu0 %v245_v3, %s867_s26 }
  0xc1   : > { %254 = vrot.lane.b32.xlu1 %v922_v20, %s867_s26 }
  0xc4   : > { %514 = vrot.lane.b32.xlu0 %v505_v5, %s872_s6 }
  0xc5   : > { %512 = vrot.lane.b32.xlu1 %v504_v7, %s872_s6 }
  0xc8   : > { %518 = vrot.lane.b32.xlu0 %v507_v9, %s872_s6 }
  0xc9   : > { %516 = vrot.lane.b32.xlu1 %v506_v10, %s872_s6 }
  0xcc   : > { %562 = vperm.xlu0 %846, %v554_v11  }
  0xcd   : > { %557 = vperm.xlu1 %845, %v553_v12  }
  0xfe   : > { %v475_v13 = vpop.permute.xlu0 %474 }
  0xff   : > { %v473_v14 = vpop.permute.xlu1 %472  ;;  %v481_v15 = vrot.slane %v475_v13, 4 }
 0x100   : > { %v480_v16 = vrot.slane %v473_v14, 4 }
 0x102   : > { %v479_v17 = vpop.permute.xlu0 %478  ;;  %v484_v21 = vsel %vm262_vm11, %v480_v16, %v481_v15 }
 0x103   : > { %v483_v18 = vrot.slane %v479_v17, 4  ;;  %v477_v19 = vpop.permute.xlu1 %476  ;;  %v486_v29 = vsel %vm485_vm12, %v473_v14, %v484_v21 }
 0x104   : > { %v482_v20 = vrot.slane %v477_v19, 4 }
 0x106   : > { %v366_v22 = vpop.permute.xlu0 %365  ;;  %v487_v23 = vsel %vm262_vm11, %v482_v20, %v483_v18 }
 0x107   : > { %v364_v26 = vpop.permute.xlu1 %363  ;;  %v488_v30 = vsel %vm485_vm12, %v477_v19, %v487_v23  ;;  %v372_v57 = vrot.slane %v366_v22, 4 }
 0x108   : > { %v810_v31 = vcombine.high %v486_v29, %v488_v30  ;;  %v809_v32 = vcombine.low %v486_v29, %v488_v30  ;;  %v371_v58 = vrot.slane %v364_v26, 4 }
 0x10a   : > { %668 = vmatprep.subr.bf16.mxu0 %v810_v31  ;;  %v370_v33 = vpop.permute.xlu0 %369  ;;  %v375_v1 = vsel %vm262_vm11, %v371_v58, %v372_v57 }
 0x10b   : > { %v368_v34 = vpop.permute.xlu1 %367  ;;  %669 = vmatpush1.bf16.msra.mxu0 %v809_v32  ;;  %v374_v48 = vrot.slane %v370_v33, 4  ;;  %v377_v12 = vsel %vm376_vm15, %v364_v26, %v375_v1 }
 0x10c   : > { %v373_v49 = vrot.slane %v368_v34, 4 }
 0x10e   : > { %v970_v35 = vpop.permute.xlu0 %252  ;;  %v378_v62 = vsel %vm262_vm11, %v373_v49, %v374_v48 }
 0x10f   : > { %v972_v36 = vpop.permute.xlu1 %250  ;;  %v379_v4 = vsel %vm376_vm15, %v368_v34, %v378_v62 }
 0x110   : > { %v804_v13 = vcombine.high %v377_v12, %v379_v4  ;;  %v803_v19 = vcombine.low %v377_v12, %v379_v4 }
 0x112   : > { %v446_v37 = vpop.permute.xlu0 %445 }
 0x113   : > { %v444_v38 = vpop.permute.xlu1 %443  ;;  %v452_v39 = vrot.slane %v446_v37, 4 }
 0x114   : > { %v451_v40 = vrot.slane %v444_v38, 4 }
 0x116   : > { %v450_v41 = vpop.permute.xlu0 %449  ;;  %v455_v44 = vsel %vm262_vm11, %v451_v40, %v452_v39  ;;  %v258_v39 = vrot.slane %v972_v36, 4 }
 0x117   : > { %v454_v42 = vrot.slane %v450_v41, 4  ;;  %v448_v43 = vpop.permute.xlu1 %447  ;;  %v457_v50 = vsel %vm456_vm13, %v444_v38, %v455_v44  ;;  %v259_v38 = vrot.slane %v970_v35, 4 }
 0x118   : > { %v453_v45 = vrot.slane %v448_v43, 4 }
 0x119   : > { %v263_v48 = vsel %vm262_vm11, %v258_v39, %v259_v38 }
 0x11a   : > { %v458_v46 = vsel %vm262_vm11, %v453_v45, %v454_v42  ;;  %v406_v47 = vpop.permute.xlu0 %405 }
 0x11b   : > { %v459_v51 = vsel %vm456_vm13, %v448_v43, %v458_v46  ;;  %v404_v52 = vpop.permute.xlu1 %403  ;;  %v412_v55 = vrot.slane %v406_v47, 4 }
 0x11c   : > { %v807_v53 = vcombine.low %v457_v50, %v459_v51  ;;  %v808_v54 = vcombine.high %v457_v50, %v459_v51  ;;  %v411_v56 = vrot.slane %v404_v52, 4 }
 0x11e   : > { %670 = vmatprep.subr.bf16.mxu0 %v808_v54  ;;  %v410_v59 = vpop.permute.xlu0 %409  ;;  %v415_v63 = vsel %vm262_vm11, %v411_v56, %v412_v55 }
 0x11f   : > { %v414_v60 = vrot.slane %v410_v59, 4  ;;  %v408_v61 = vpop.permute.xlu1 %407  ;;  %671 = vmatpush1.bf16.msra.mxu0 %v807_v53  ;;  %v417_v5 = vsel %vm416_vm14, %v404_v52, %v415_v63  ;;  %v265_v53 = vsel %vm264_vm2, %v972_v36, %v263_v48 }
 0x120   : > { %v413_v0 = vrot.slane %v408_v61, 4 }
 0x122   : > { %v418_v2 = vsel %vm262_vm11, %v413_v0, %v414_v60  ;;  %v337_v3 = vpop.permute.xlu0 %336 }
 0x123   : > { %v419_v6 = vsel %vm416_vm14, %v408_v61, %v418_v2  ;;  %v335_v7 = vpop.permute.xlu1 %334  ;;  %v343_v10 = vrot.slane %v337_v3, 4 }
 0x124   : > { %v805_v8 = vcombine.low %v417_v5, %v419_v6  ;;  %v806_v9 = vcombine.high %v417_v5, %v419_v6  ;;  %v342_v11 = vrot.slane %v335_v7, 4  ;;  %v847_v5 = vld [vmem:[%s1009_s1] ss:$8 sps:$4 sm:$0xff]  }
 0x126   : > { %672 = vmatprep.subr.bf16.mxu0 %v806_v9  ;;  %v341_v14 = vpop.permute.xlu0 %340  ;;  %v346_v17 = vsel %vm262_vm11, %v342_v11, %v343_v10 }
 0x127   : > { %v345_v15 = vrot.slane %v341_v14, 4  ;;  %v339_v16 = vpop.permute.xlu1 %338  ;;  %673 = vmatpush1.bf16.msra.mxu0 %v805_v8  ;;  %v348_v22 = vsel %vm347_vm0, %v335_v7, %v346_v17 }
 0x128   : > { %v344_v18 = vrot.slane %v339_v16, 4  ;;  %674 = vmatprep.subr.bf16.mxu0 %v804_v13 }
 0x12a   : > { %v349_v20 = vsel %vm262_vm11, %v344_v18, %v345_v15  ;;  %v296_v21 = vpop.permute.xlu0 %295 }
 0x12b   : > { %v350_v23 = vsel %vm347_vm0, %v339_v16, %v349_v20  ;;  %v294_v29 = vpop.permute.xlu1 %293  ;;  %675 = vmatpush1.bf16.msra.mxu0 %v803_v19  ;;  %v302_v31 = vrot.slane %v296_v21, 4 }
 0x12c   : > { %v801_v26 = vcombine.low %v348_v22, %v350_v23  ;;  %v802_v30 = vcombine.high %v348_v22, %v350_v23  ;;  %v301_v32 = vrot.slane %v294_v29, 4 }
 0x12e   : > { %676 = vmatprep.subr.bf16.mxu0 %v802_v30  ;;  %v300_v33 = vpop.permute.xlu0 %299  ;;  %v305_v40 = vsel %vm262_vm11, %v301_v32, %v302_v31 }
 0x12f   : > { %v304_v34 = vrot.slane %v300_v33, 4  ;;  %v298_v37 = vpop.permute.xlu1 %297  ;;  %677 = vmatpush1.bf16.msra.mxu0 %v801_v26  ;;  %v307_v44 = vsel %vm306_vm1, %v294_v29, %v305_v40 }
 0x130   : > { %v303_v41 = vrot.slane %v298_v37, 4 }
 0x132   : > { %v308_v42 = vsel %vm262_vm11, %v303_v41, %v304_v34  ;;  %v257_v43 = vpop.permute.xlu0 %256 }
 0x133   : > { %v309_v45 = vsel %vm306_vm1, %v298_v37, %v308_v42  ;;  %v261_v46 = vrot.slane %v257_v43, 4  ;;  %v255_v47 = vpop.permute.xlu1 %254 }
 0x134   : > { %v799_v49 = vcombine.low %v307_v44, %v309_v45  ;;  %v800_v50 = vcombine.high %v307_v44, %v309_v45  ;;  %v260_v51 = vrot.slane %v255_v47, 4 }
 0x136   : > { %v266_v35 = vsel %vm262_vm11, %v260_v51, %v261_v46  ;;  %678 = vmatprep.subr.bf16.mxu0 %v800_v50  ;;  %v515_v52 = vpop.permute.xlu0 %514 }
 0x137   : > { %v267_v54 = vsel %vm264_vm2, %v255_v47, %v266_v35  ;;  %v513_v55 = vpop.permute.xlu1 %512  ;;  %679 = vmatpush1.bf16.msra.mxu0 %v799_v49  ;;  %v521_v58 = vrot.slane %v515_v52, 4 }
 0x138   : > { %v797_v56 = vcombine.low %v265_v53, %v267_v54  ;;  %v798_v57 = vcombine.high %v265_v53, %v267_v54  ;;  %v520_v59 = vrot.slane %v513_v55, 4 }
 0x13a   : > { %680 = vmatprep.subr.bf16.mxu0 %v798_v57  ;;  %v519_v60 = vpop.permute.xlu0 %518  ;;  %v524_v63 = vsel %vm262_vm11, %v520_v59, %v521_v58 }
 0x13b   : > { %v523_v61 = vrot.slane %v519_v60, 4  ;;  %v517_v62 = vpop.permute.xlu1 %516  ;;  %681 = vmatpush1.bf16.msra.mxu0 %v797_v56  ;;  %v526_v1 = vsel %vm525_vm3, %v513_v55, %v524_v63 }
 0x13c   : > { %v522_v0 = vrot.slane %v517_v62, 4  ;;  %682 = vmatprep.subr.bf16.mxu0 %v796_v27 }
 0x13e   : > { %v527_v36 = vsel %vm262_vm11, %v522_v0, %v523_v61 }
 0x13f   : > { %v528_v2 = vsel %vm525_vm3, %v517_v62, %v527_v36  ;;  %683 = vmatpush1.bf16.msra.mxu0 %v795_v28 }
 0x140   : > { %v811_v3 = vcombine.low %v526_v1, %v528_v2  ;;  %v812_v4 = vcombine.high %v526_v1, %v528_v2 }
 0x142   : > { %698 = vmatprep.subr.bf16.mxu0 %v812_v4 }
 0x143   : > { %699 = vmatpush2.bf16.msra.mxu0 %v811_v3 }
 0x146   : > { %701 = vmatmul.mubr.bf16.vlgmr.msra.gmra.mxu0 %v847_v5 }
 0x147   : > { %v563_v9 = vpop.permute.xlu0 %562 }
 0x148   : > { %v558_v6 = vpop.permute.xlu1 %557 }
 0x206   : > { %v702_v27 = vpop.f32.mrf.mxu0 }
 0x207   : > { %v703_v7 = vadd.f32 %v702_v27, %v558_v6 }
 0x208   : > { %v704_v8 = vpop.f32.mrf.mxu0 }
 0x209   : > { %v705_v10 = vadd.f32 %v704_v8, %v558_v6  ;;  %v711_v12 = vmax.f32 %v703_v7, 0.0 }
 0x20a   : > { %v706_v11 = vpop.f32.mrf.mxu0 }
 0x20b   : > { %v712_v24 = vmax.f32 %v705_v10, 0.0  ;;  %v707_v25 = vadd.f32 %v706_v11, %v563_v9 }
 0x20c   : > { %v708_v28 = vpop.f32.mrf.mxu0 }
 0x20d   : > { %v820_v13 = vpack.c.bf16 %v712_v24, %v711_v12  ;;  %v709_v14 = vadd.f32 %v708_v28, %v563_v9  ;;  %v713_v15 = vmax.f32 %v707_v25, 0.0 }
 0x20f   : > { %727 = vst [vmem:[%s170_s18] sm:$0xff] %v820_v13  ;;  %v714_v16 = vmax.f32 %v709_v14, 0.0 }
 0x211   : > { %v821_v17 = vpack.c.bf16 %v714_v16, %v713_v15 }
 0x213   : > { %728 = vst [vmem:[%s170_s18 + $0x8] sm:$0xff] %v821_v17 }
 0x214 PF: > { %s13_s12 = sadd.s32 1, %s856_s12  }
 0x215   : > { %p10_p4 = scmp.ge.s32.totalorder %s13_s12, 4  }
 0x217   :  { %12 = sbr.rel (!%p10_p4) target bundleno = 1 (0x1), region = 62 }

// kernel: rsu_forward.10
= control target key start
LH: loop header
LB: loop body
LE: loop exit
PB: predicated region body
PF: predicated region fallthrough
CT: control target
= control target key end

     0   :  { %s657_s12 = smov 0   ;;  %s742_s0 = inlined_call_operand.vmem [shape: bf16[2,16,64], index: 0, kind: input, shape index: {}]   ;;  %s743_s1 = inlined_call_operand.vmem [shape: bf16[16,144], index: 1, kind: input, shape index: {}]   ;;  %s744_s2 = inlined_call_operand.vmem [shape: f32[16,1], index: 2, kind: input, shape index: {}]   ;;  %s745_s3 = inlined_call_operand.vmem [shape: bf16[2,16,64], index: 3, kind: output, shape index: {}]  }
   0x1 LB: > { %s548_s13 = sadd.s32 4294967295, %s620_s12   ;;  %p552_p0 = scmp.ge.s32.totalorder %s620_s12, 1  ;;  %s620_s12 = sphi %s657_s12, %s13_s12  }
   0x2   : > { %p137_p1 = scmp.lt.s32.totalorder %s620_s12, 3 }
   0x4   : > { %p138_p2 = pnand %p552_p0, %p137_p1 }
   0x5   : > { %p161_p3 = scmp.lt.s32.totalorder (!%p138_p2), %s548_s13, 1  ;;  %s623_s18 = smov (!%p138_p2), 9  }
   0x6   : > { %141 = sbr.rel (%p138_p2) target bundleno = 505 (0x1f9), region = 32  ;;  %s624_s19 = smov (!%p138_p2), 16  }
   0x7   : > { %s625_s20 = smov (!%p138_p2), 10   ;;  %s626_s21 = smov (!%p138_p2), 8  }
   0x8   : > { %s627_s22 = smov (!%p138_p2), 2   ;;  %s628_s23 = smov (!%p138_p2), 18  }
   0x9   : > { %s629_s24 = smov (!%p138_p2), 111   ;;  %s630_s25 = smov (!%p138_p2), 112  }
   0xa   : > { %s631_s26 = smov (!%p138_p2), 118   ;;  %s632_s27 = smov (!%p138_p2), 119  }
   0xb   : > { %v193_v0 = vlaneseq  ;;  %vm174_vm0 = vcmask 68608   ;;  %vm177_vm1 = vcmask 667208   ;;  %v622_v1 = vmov 0   ;;  %s749_s13 = smov (!%p161_p3, %s548_s13), 1  ;;  %s633_s28 = smov 120   ;;  %v361_v47 = vld [vmem:[%s744_s2] sm:$0xff] }
   0xc   : > { %175 = vst.msk [vmem:[#allocation2] sm:$0xf] %vm174_vm0, %v622_v1  ;;  %176 = vst.msk [vmem:[#allocation2 + $0x4] sm:$0xf] %vm174_vm0, %v622_v1  ;;  %440 = vmatprep.subr.bf16.mxu0 %v622_v1  ;;  %600 = vset.pattern.permute.xlu1 %v622_v1  ;;  %s573_s14 = sshll.u32 %s749_s13, 3  ;;  %vm190_vm6 = vcmask 592968  }
   0xd   : > { %v194_v2 = vand.u32 127, %v193_v0  ;;  %178 = vst.msk [vmem:[#allocation2] sm:$0xf] %vm177_vm1, %v622_v1  ;;  %179 = vst.msk [vmem:[#allocation2 + $0x4] sm:$0xf] %vm177_vm1, %v622_v1  ;;  %601 = vset.pattern.permute.xlu0 %v622_v1  ;;  %s165_s17 = scalar_lea.vmem %s742_s0, %s573_s14  ;;  %vm214_vm7 = vcmask 519168  }
   0xe   : > { %v180_v4 = vld [vmem:[%s165_s17] sm:$0xf]  ;;  %v181_v7 = vld [vmem:[%s165_s17 + $0x4] sm:$0xf]  ;;  %s634_s29 = smov 126   ;;  %s635_s30 = smov 127  }
   0xf   : > { %v199_v3 = vand.u32 7, %v194_v2  ;;  %184 = vrot.lane.b32.xlu0 %v180_v4, %s623_s18  ;;  %s636_s4 = smov 110   ;;  %v613_v46 = vld [vmem:[%s743_s1 + $0x4] ss:$8 sps:$4 sm:$0xff]   ;;  %vm436_vm13 = vcmask 130048  }
  0x10   : > { %568 = vmatprep.mubr.msk.bf16.mxu0 %vm436_vm13, %v613_v46  ;;  %v362_v48 = vld [vmem:[%s744_s2 + $0x8] sm:$0xff] }
  0x11   : > { %vm207_vm2 = vcmp.ge.s32.totalorder %v199_v3, 1  ;;  %vm208_vm3 = vcmp.lt.s32.totalorder %v199_v3, 7 }
  0x12   : > { %vm680_vm4 = vmpackc.low %vm207_vm2, %vm207_vm2 }
  0x13   : > { %v250_v6 = vsel %vm680_vm4, 65537, %v622_v1  ;;  %vm231_vm5 = vmpackc.low %vm208_vm3, %vm208_vm3  ;;  %186 = vrot.lane.b32.xlu0 %v181_v7, %s623_s18  ;;  %s170_s18 = scalar_lea.vmem %s745_s3, %s573_s14 }
  0x14   : > { %297 = vrot.lane.b32.xlu1 %v250_v6, %s624_s19  ;;  %v232_v8 = vsel %vm231_vm5, 65537, %v622_v1 }
  0x17   : > { %251 = vrot.lane.b32.xlu0 %v250_v6, %s626_s21 }
  0x18   : > { %280 = vrot.lane.b32.xlu1 %v232_v8, %s625_s20 }
  0x1b   : > { %326 = vrot.lane.b32.xlu0 %v232_v8, %s628_s23 }
  0x1c   : > { %233 = vrot.lane.b32.xlu1 %v232_v8, %s627_s22 }
  0x81   : > { %v185_v9 = vpop.permute.xlu0 %184 }
  0x82   : > { %191 = vst.msk [vmem:[#allocation2] sm:$0xf] %vm190_vm6, %v185_v9 }
  0x85   : > { %v187_v10 = vpop.permute.xlu0 %186 }
  0x86   : > { %192 = vst.msk [vmem:[#allocation2 + $0x4] sm:$0xf] %vm190_vm6, %v187_v10  ;;  %v298_v11 = vpop.permute.xlu1 %297 }
  0x87   : > { %vm299_vm8 = vcmp.ne.s16.totalorder %v298_v11, 0  ;;  %v611_v11 = vld [vmem:[%s743_s1] ss:$8 sps:$4 sm:$0xff]  }
  0x89   : > { %v209_v12 = vld [vmem:[#allocation2] sm:$0xf]  ;;  %v252_v26 = vpop.permute.xlu0 %251 }
  0x8a   : > { %v212_v13 = vsel %vm680_vm4, %v209_v12, 0  ;;  %v312_v14 = vld [vmem:[#allocation2] sm:$0xf]  ;;  %v281_v17 = vpop.permute.xlu1 %280  ;;  %vm253_vm10 = vcmp.ne.s16.totalorder %v252_v26, 0 }
  0x8b   : > { %215 = vst.msk [vmem:[#allocation3] sm:$0xf] %vm214_vm7, %v212_v13  ;;  %v295_v15 = vld [vmem:[#allocation2] sm:$0xf]  ;;  %316 = vrot.lane.b32.xlu1 %v312_v14, %s629_s24  ;;  %vm282_vm9 = vcmp.ne.s16.totalorder %v281_v17, 0 }
  0x8c   : > { %v300_v19 = vsel %vm299_vm8, %v295_v15, 0  ;;  %v278_v21 = vld [vmem:[#allocation2] sm:$0xf] }
  0x8d   : > { %v210_v16 = vld [vmem:[#allocation2 + $0x4] sm:$0xf]  ;;  %v283_v23 = vsel %vm282_vm9, %v278_v21, 0  ;;  %v266_v28 = vld [vmem:[#allocation2] sm:$0xf]  ;;  %v327_v38 = vpop.permute.xlu0 %326 }
  0x8e   : > { %v213_v18 = vsel %vm680_vm4, %v210_v16, 0  ;;  %v313_v20 = vld [vmem:[#allocation2 + $0x4] sm:$0xf]  ;;  %v248_v29 = vld [vmem:[#allocation2] sm:$0xf]  ;;  %v234_v30 = vpop.permute.xlu1 %233  ;;  %vm328_vm12 = vcmp.ne.s16.totalorder %v327_v38, 0 }
  0x8f   : > { %216 = vst.msk [vmem:[#allocation3 + $0x4] sm:$0xf] %vm214_vm7, %v213_v18  ;;  %304 = vrot.lane.b32.xlu1 %v300_v19, %s630_s25  ;;  %318 = vrot.lane.b32.xlu0 %v313_v20, %s629_s24  ;;  %v296_v22 = vld [vmem:[#allocation2 + $0x4] sm:$0xf]  ;;  %v254_v31 = vsel %vm253_vm10, %v248_v29, 0  ;;  %vm235_vm11 = vcmp.ne.s16.totalorder %v234_v30, 0 }
  0x90   : > { %v301_v24 = vsel %vm299_vm8, %v296_v22, 0  ;;  %v279_v25 = vld [vmem:[#allocation2 + $0x4] sm:$0xf]  ;;  %v229_v34 = vld [vmem:[#allocation2] sm:$0xf] }
  0x91   : > { %v284_v27 = vsel %vm282_vm9, %v279_v25, 0  ;;  %v267_v32 = vld [vmem:[#allocation2 + $0x4] sm:$0xf]  ;;  %v236_v36 = vsel %vm235_vm11, %v229_v34, 0  ;;  %v217_v40 = vld [vmem:[#allocation2] sm:$0xf] }
  0x92   : > { %v249_v33 = vld [vmem:[#allocation2 + $0x4] sm:$0xf]  ;;  %v324_v41 = vld [vmem:[#allocation2] sm:$0xf] }
  0x93   : > { %287 = vrot.lane.b32.xlu1 %v283_v23, %s631_s26  ;;  %306 = vrot.lane.b32.xlu0 %v301_v24, %s630_s25  ;;  %v255_v35 = vsel %vm253_vm10, %v249_v33, 0  ;;  %v230_v37 = vld [vmem:[#allocation2 + $0x4] sm:$0xf]  ;;  %v329_v42 = vsel %vm328_vm12, %v324_v41, 0 }
  0x94   : > { %v237_v39 = vsel %vm235_vm11, %v230_v37, 0  ;;  %v218_v43 = vld [vmem:[#allocation2 + $0x4] sm:$0xf] }
  0x95   : > { %v325_v44 = vld [vmem:[#allocation2 + $0x4] sm:$0xf] }
  0x96   : > { %v330_v45 = vsel %vm328_vm12, %v325_v44, 0  ;;  %v609_v9 = vld [vmem:[#allocation3] sm:$0xff]  }
  0x97   : > { %270 = vrot.lane.b32.xlu1 %v266_v28, %s632_s27  ;;  %289 = vrot.lane.b32.xlu0 %v284_v27, %s631_s26 }
  0x9b   : > { %272 = vrot.lane.b32.xlu0 %v267_v32, %s632_s27  ;;  %258 = vrot.lane.b32.xlu1 %v254_v31, %s633_s28 }
  0x9f   : > { %260 = vrot.lane.b32.xlu0 %v255_v35, %s633_s28  ;;  %240 = vrot.lane.b32.xlu1 %v236_v36, %s634_s29 }
  0xa3   : > { %242 = vrot.lane.b32.xlu0 %v237_v39, %s634_s29  ;;  %221 = vrot.lane.b32.xlu1 %v217_v40, %s635_s30 }
  0xa7   : > { %223 = vrot.lane.b32.xlu0 %v218_v43, %s635_s30  ;;  %333 = vrot.lane.b32.xlu1 %v329_v42, %s636_s4 }
  0xab   : > { %335 = vrot.lane.b32.xlu0 %v330_v45, %s636_s4  ;;  %365 = vperm.xlu1 %600, %v361_v47  }
  0xaf   : > { %370 = vperm.xlu0 %601, %v362_v48  }
  0xfd   : > { %v317_v49 = vpop.permute.xlu1 %316 }
  0xfe   : > { %322 = vst.msk [vmem:[#allocation3 + $0x38] sm:$0xf] %vm214_vm7, %v317_v49 }
 0x101   : > { %v305_v50 = vpop.permute.xlu1 %304  ;;  %v319_v51 = vpop.permute.xlu0 %318 }
 0x102   : > { %310 = vst.msk [vmem:[#allocation3 + $0x30] sm:$0xf] %vm214_vm7, %v305_v50  ;;  %323 = vst.msk [vmem:[#allocation3 + $0x3c] sm:$0xf] %vm214_vm7, %v319_v51 }
 0x105   : > { %v288_v52 = vpop.permute.xlu1 %287  ;;  %v307_v53 = vpop.permute.xlu0 %306 }
 0x106   : > { %293 = vst.msk [vmem:[#allocation3 + $0x28] sm:$0xf] %vm214_vm7, %v288_v52  ;;  %311 = vst.msk [vmem:[#allocation3 + $0x34] sm:$0xf] %vm214_vm7, %v307_v53 }
 0x109   : > { %v271_v54 = vpop.permute.xlu1 %270  ;;  %v290_v55 = vpop.permute.xlu0 %289  ;;  %v602_v56 = vld [vmem:[#allocation3 + $0x38] sm:$0xff]  }
 0x10a   : > { %276 = vst.msk [vmem:[#allocation3 + $0x20] sm:$0xf] %vm214_vm7, %v271_v54  ;;  %294 = vst.msk [vmem:[#allocation3 + $0x2c] sm:$0xf] %vm214_vm7, %v290_v55  ;;  %441 = vmatpush1.bf16.msra.mxu0 %v602_v56 }
 0x10b   : > { %442 = vmatprep.subr.bf16.mxu0 %v622_v1 }
 0x10d   : > { %v259_v57 = vpop.permute.xlu1 %258  ;;  %v273_v58 = vpop.permute.xlu0 %272  ;;  %v603_v59 = vld [vmem:[#allocation3 + $0x30] sm:$0xff]  }
 0x10e   : > { %264 = vst.msk [vmem:[#allocation3 + $0x18] sm:$0xf] %vm214_vm7, %v259_v57  ;;  %277 = vst.msk [vmem:[#allocation3 + $0x24] sm:$0xf] %vm214_vm7, %v273_v58  ;;  %443 = vmatpush1.bf16.msra.mxu0 %v603_v59 }
 0x10f   : > { %444 = vmatprep.subr.bf16.mxu0 %v622_v1 }
 0x111   : > { %v241_v60 = vpop.permute.xlu1 %240  ;;  %v261_v61 = vpop.permute.xlu0 %260  ;;  %v604_v62 = vld [vmem:[#allocation3 + $0x28] sm:$0xff]  }
 0x112   : > { %246 = vst.msk [vmem:[#allocation3 + $0x10] sm:$0xf] %vm214_vm7, %v241_v60  ;;  %265 = vst.msk [vmem:[#allocation3 + $0x1c] sm:$0xf] %vm214_vm7, %v261_v61  ;;  %445 = vmatpush1.bf16.msra.mxu0 %v604_v62 }
 0x113   : > { %446 = vmatprep.subr.bf16.mxu0 %v622_v1 }
 0x115   : > { %v222_v63 = vpop.permute.xlu1 %221  ;;  %v243_v0 = vpop.permute.xlu0 %242  ;;  %v605_v2 = vld [vmem:[#allocation3 + $0x20] sm:$0xff]  }
 0x116   : > { %227 = vst.msk [vmem:[#allocation3 + $0x8] sm:$0xf] %vm214_vm7, %v222_v63  ;;  %247 = vst.msk [vmem:[#allocation3 + $0x14] sm:$0xf] %vm214_vm7, %v243_v0  ;;  %447 = vmatpush1.bf16.msra.mxu0 %v605_v2 }
 0x117   : > { %448 = vmatprep.subr.bf16.mxu0 %v622_v1 }
 0x119   : > { %v334_v3 = vpop.permute.xlu1 %333  ;;  %v224_v4 = vpop.permute.xlu0 %223  ;;  %v606_v5 = vld [vmem:[#allocation3 + $0x18] sm:$0xff]  }
 0x11a   : > { %339 = vst.msk [vmem:[#allocation3 + $0x40] sm:$0xf] %vm214_vm7, %v334_v3  ;;  %228 = vst.msk [vmem:[#allocation3 + $0xc] sm:$0xf] %vm214_vm7, %v224_v4  ;;  %449 = vmatpush1.bf16.msra.mxu0 %v606_v5 }
 0x11b   : > { %450 = vmatprep.subr.bf16.mxu0 %v622_v1 }
 0x11d   : > { %v336_v6 = vpop.permute.xlu0 %335  ;;  %v607_v7 = vld [vmem:[#allocation3 + $0x10] sm:$0xff]  }
 0x11e   : > { %340 = vst.msk [vmem:[#allocation3 + $0x44] sm:$0xf] %vm214_vm7, %v336_v6  ;;  %451 = vmatpush1.bf16.msra.mxu0 %v607_v7 }
 0x11f   : > { %452 = vmatprep.subr.bf16.mxu0 %v622_v1 }
 0x121   : > { %v608_v8 = vld [vmem:[#allocation3 + $0x8] sm:$0xff]  }
 0x122   : > { %453 = vmatpush1.bf16.msra.mxu0 %v608_v8 }
 0x123   : > { %454 = vmatprep.subr.bf16.mxu0 %v622_v1 }
 0x125   : > { %v610_v10 = vld [vmem:[#allocation3 + $0x40] sm:$0xff]  }
 0x126   : > { %455 = vmatpush1.bf16.msra.mxu0 %v609_v9  ;;  %v366_v12 = vpop.permute.xlu1 %365 }
 0x127   : > { %470 = vmatprep.subr.bf16.mxu0 %v622_v1 }
 0x12a   : > { %471 = vmatpush2.bf16.msra.mxu0 %v610_v10  ;;  %v371_v16 = vpop.permute.xlu0 %370 }
 0x12d   : > { %473 = vmatmul.mubr.bf16.vlgmr.msra.gmra.mxu0 %v611_v11 }
 0x1ed   : > { %v474_v13 = vpop.f32.mrf.mxu0 }
 0x1ee   : > { %v475_v14 = vadd.f32 %v474_v13, %v366_v12 }
 0x1ef   : > { %v476_v15 = vpop.f32.mrf.mxu0 }
 0x1f0   : > { %v481_v17 = vmax.f32 %v475_v14, 0.0 }
 0x1f1   : > { %v477_v18 = vpop.f32.mrf.mxu0 }
 0x1f2   : > { %v575_v1 = vpack.c.bf16 %v481_v17, %v481_v17  ;;  %v478_v19 = vadd.f32 %v477_v18, %v371_v16 }
 0x1f3   : > { %v479_v20 = vpop.f32.mrf.mxu0 }
 0x1f4   : > { %491 = vst.msk [vmem:[%s170_s18] sm:$0xf] %vm214_vm7, %v575_v1  ;;  %v482_v21 = vmax.f32 %v478_v19, 0.0 }
 0x1f6   : > { %v576_v22 = vpack.c.bf16 %v482_v21, %v482_v21 }
 0x1f8   : > { %492 = vst.msk [vmem:[%s170_s18 + $0x4] sm:$0xf] %vm214_vm7, %v576_v22 }
 0x1f9 PF: > { %s13_s12 = sadd.s32 1, %s620_s12  }
 0x1fa   : > { %p10_p4 = scmp.ge.s32.totalorder %s13_s12, 4  }
 0x1fc   :  { %12 = sbr.rel (!%p10_p4) target bundleno = 1 (0x1), region = 62 }

// kernel: rsu_forward.11
= control target key start
LH: loop header
LB: loop body
LE: loop exit
PB: predicated region body
PF: predicated region fallthrough
CT: control target
= control target key end

     0   :  { %s657_s12 = smov 0   ;;  %s742_s0 = inlined_call_operand.vmem [shape: bf16[2,16,16], index: 0, kind: input, shape index: {}]   ;;  %s743_s1 = inlined_call_operand.vmem [shape: bf16[16,144], index: 1, kind: input, shape index: {}]   ;;  %s744_s2 = inlined_call_operand.vmem [shape: f32[16,1], index: 2, kind: input, shape index: {}]   ;;  %s745_s3 = inlined_call_operand.vmem [shape: bf16[2,16,16], index: 3, kind: output, shape index: {}]  }
   0x1 LB: > { %s548_s13 = sadd.s32 4294967295, %s620_s12   ;;  %p552_p0 = scmp.ge.s32.totalorder %s620_s12, 1  ;;  %s620_s12 = sphi %s657_s12, %s13_s12  }
   0x2   : > { %p137_p1 = scmp.lt.s32.totalorder %s620_s12, 3 }
   0x4   : > { %p138_p2 = pnand %p552_p0, %p137_p1 }
   0x5   : > { %p161_p3 = scmp.lt.s32.totalorder (!%p138_p2), %s548_s13, 1  ;;  %s623_s18 = smov (!%p138_p2), 5  }
   0x6   : > { %141 = sbr.rel (%p138_p2) target bundleno = 505 (0x1f9), region = 32  ;;  %s624_s19 = smov (!%p138_p2), 8  }
   0x7   : > { %s625_s20 = smov (!%p138_p2), 6   ;;  %s626_s21 = smov (!%p138_p2), 4  }
   0x8   : > { %s627_s22 = smov (!%p138_p2), 2   ;;  %s628_s23 = smov (!%p138_p2), 10  }
   0x9   : > { %s629_s24 = smov (!%p138_p2), 119   ;;  %s630_s25 = smov (!%p138_p2), 120  }
   0xa   : > { %s631_s26 = smov (!%p138_p2), 122   ;;  %s632_s27 = smov (!%p138_p2), 123  }
   0xb   : > { %v193_v0 = vlaneseq  ;;  %vm174_vm0 = vcmask 35840   ;;  %vm177_vm1 = vcmask 208040   ;;  %v622_v1 = vmov 0   ;;  %s749_s13 = smov (!%p161_p3, %s548_s13), 1  ;;  %s633_s28 = smov 124   ;;  %v361_v47 = vld [vmem:[%s744_s2] sm:$0xff] }
   0xc   : > { %175 = vst.msk [vmem:[#allocation2] sm:$0xf] %vm174_vm0, %v622_v1  ;;  %176 = vst.msk [vmem:[#allocation2 + $0x4] sm:$0xf] %vm174_vm0, %v622_v1  ;;  %440 = vmatprep.subr.bf16.mxu0 %v622_v1  ;;  %600 = vset.pattern.permute.xlu1 %v622_v1  ;;  %s573_s14 = sshll.u32 %s749_s13, 3  ;;  %vm190_vm6 = vcmask 166952  }
   0xd   : > { %v194_v2 = vand.u32 127, %v193_v0  ;;  %178 = vst.msk [vmem:[#allocation2] sm:$0xf] %vm177_vm1, %v622_v1  ;;  %179 = vst.msk [vmem:[#allocation2 + $0x4] sm:$0xf] %vm177_vm1, %v622_v1  ;;  %601 = vset.pattern.permute.xlu0 %v622_v1  ;;  %s165_s17 = scalar_lea.vmem %s742_s0, %s573_s14  ;;  %vm214_vm7 = vcmask 125952  }
   0xe   : > { %v180_v4 = vld [vmem:[%s165_s17] sm:$0xf]  ;;  %v181_v7 = vld [vmem:[%s165_s17 + $0x4] sm:$0xf]  ;;  %s634_s29 = smov 126   ;;  %s635_s30 = smov 127  }
   0xf   : > { %v199_v3 = vand.u32 3, %v194_v2  ;;  %184 = vrot.lane.b32.xlu0 %v180_v4, %s623_s18  ;;  %s636_s4 = smov 118   ;;  %v613_v46 = vld [vmem:[%s743_s1 + $0x4] ss:$8 sps:$4 sm:$0xff]   ;;  %vm436_vm13 = vcmask 130048  }
  0x10   : > { %568 = vmatprep.mubr.msk.bf16.mxu0 %vm436_vm13, %v613_v46  ;;  %v362_v48 = vld [vmem:[%s744_s2 + $0x8] sm:$0xff] }
  0x11   : > { %vm207_vm2 = vcmp.ge.s32.totalorder %v199_v3, 1  ;;  %vm208_vm3 = vcmp.lt.s32.totalorder %v199_v3, 3 }
  0x12   : > { %vm680_vm4 = vmpackc.low %vm207_vm2, %vm207_vm2 }
  0x13   : > { %v250_v6 = vsel %vm680_vm4, 65537, %v622_v1  ;;  %vm231_vm5 = vmpackc.low %vm208_vm3, %vm208_vm3  ;;  %186 = vrot.lane.b32.xlu0 %v181_v7, %s623_s18  ;;  %s170_s18 = scalar_lea.vmem %s745_s3, %s573_s14 }
  0x14   : > { %297 = vrot.lane.b32.xlu1 %v250_v6, %s624_s19  ;;  %v232_v8 = vsel %vm231_vm5, 65537, %v622_v1 }
  0x17   : > { %251 = vrot.lane.b32.xlu0 %v250_v6, %s626_s21 }
  0x18   : > { %280 = vrot.lane.b32.xlu1 %v232_v8, %s625_s20 }
  0x1b   : > { %326 = vrot.lane.b32.xlu0 %v232_v8, %s628_s23 }
  0x1c   : > { %233 = vrot.lane.b32.xlu1 %v232_v8, %s627_s22 }
  0x81   : > { %v185_v9 = vpop.permute.xlu0 %184 }
  0x82   : > { %191 = vst.msk [vmem:[#allocation2] sm:$0xf] %vm190_vm6, %v185_v9 }
  0x85   : > { %v187_v10 = vpop.permute.xlu0 %186 }
  0x86   : > { %192 = vst.msk [vmem:[#allocation2 + $0x4] sm:$0xf] %vm190_vm6, %v187_v10  ;;  %v298_v11 = vpop.permute.xlu1 %297 }
  0x87   : > { %vm299_vm8 = vcmp.ne.s16.totalorder %v298_v11, 0  ;;  %v611_v11 = vld [vmem:[%s743_s1] ss:$8 sps:$4 sm:$0xff]  }
  0x89   : > { %v209_v12 = vld [vmem:[#allocation2] sm:$0xf]  ;;  %v252_v26 = vpop.permute.xlu0 %251 }
  0x8a   : > { %v212_v13 = vsel %vm680_vm4, %v209_v12, 0  ;;  %v312_v14 = vld [vmem:[#allocation2] sm:$0xf]  ;;  %v281_v17 = vpop.permute.xlu1 %280  ;;  %vm253_vm10 = vcmp.ne.s16.totalorder %v252_v26, 0 }
  0x8b   : > { %215 = vst.msk [vmem:[#allocation3] sm:$0xf] %vm214_vm7, %v212_v13  ;;  %v295_v15 = vld [vmem:[#allocation2] sm:$0xf]  ;;  %316 = vrot.lane.b32.xlu1 %v312_v14, %s629_s24  ;;  %vm282_vm9 = vcmp.ne.s16.totalorder %v281_v17, 0 }
  0x8c   : > { %v300_v19 = vsel %vm299_vm8, %v295_v15, 0  ;;  %v278_v21 = vld [vmem:[#allocation2] sm:$0xf] }
  0x8d   : > { %v210_v16 = vld [vmem:[#allocation2 + $0x4] sm:$0xf]  ;;  %v283_v23 = vsel %vm282_vm9, %v278_v21, 0  ;;  %v266_v28 = vld [vmem:[#allocation2] sm:$0xf]  ;;  %v327_v38 = vpop.permute.xlu0 %326 }
  0x8e   : > { %v213_v18 = vsel %vm680_vm4, %v210_v16, 0  ;;  %v313_v20 = vld [vmem:[#allocation2 + $0x4] sm:$0xf]  ;;  %v248_v29 = vld [vmem:[#allocation2] sm:$0xf]  ;;  %v234_v30 = vpop.permute.xlu1 %233  ;;  %vm328_vm12 = vcmp.ne.s16.totalorder %v327_v38, 0 }
  0x8f   : > { %216 = vst.msk [vmem:[#allocation3 + $0x4] sm:$0xf] %vm214_vm7, %v213_v18  ;;  %304 = vrot.lane.b32.xlu1 %v300_v19, %s630_s25  ;;  %318 = vrot.lane.b32.xlu0 %v313_v20, %s629_s24  ;;  %v296_v22 = vld [vmem:[#allocation2 + $0x4] sm:$0xf]  ;;  %v254_v31 = vsel %vm253_vm10, %v248_v29, 0  ;;  %vm235_vm11 = vcmp.ne.s16.totalorder %v234_v30, 0 }
  0x90   : > { %v301_v24 = vsel %vm299_vm8, %v296_v22, 0  ;;  %v279_v25 = vld [vmem:[#allocation2 + $0x4] sm:$0xf]  ;;  %v229_v34 = vld [vmem:[#allocation2] sm:$0xf] }
  0x91   : > { %v284_v27 = vsel %vm282_vm9, %v279_v25, 0  ;;  %v267_v32 = vld [vmem:[#allocation2 + $0x4] sm:$0xf]  ;;  %v236_v36 = vsel %vm235_vm11, %v229_v34, 0  ;;  %v217_v40 = vld [vmem:[#allocation2] sm:$0xf] }
  0x92   : > { %v249_v33 = vld [vmem:[#allocation2 + $0x4] sm:$0xf]  ;;  %v324_v41 = vld [vmem:[#allocation2] sm:$0xf] }
  0x93   : > { %287 = vrot.lane.b32.xlu1 %v283_v23, %s631_s26  ;;  %306 = vrot.lane.b32.xlu0 %v301_v24, %s630_s25  ;;  %v255_v35 = vsel %vm253_vm10, %v249_v33, 0  ;;  %v230_v37 = vld [vmem:[#allocation2 + $0x4] sm:$0xf]  ;;  %v329_v42 = vsel %vm328_vm12, %v324_v41, 0 }
  0x94   : > { %v237_v39 = vsel %vm235_vm11, %v230_v37, 0  ;;  %v218_v43 = vld [vmem:[#allocation2 + $0x4] sm:$0xf] }
  0x95   : > { %v325_v44 = vld [vmem:[#allocation2 + $0x4] sm:$0xf] }
  0x96   : > { %v330_v45 = vsel %vm328_vm12, %v325_v44, 0  ;;  %v609_v9 = vld [vmem:[#allocation3] sm:$0xff]  }
  0x97   : > { %270 = vrot.lane.b32.xlu1 %v266_v28, %s632_s27  ;;  %289 = vrot.lane.b32.xlu0 %v284_v27, %s631_s26 }
  0x9b   : > { %272 = vrot.lane.b32.xlu0 %v267_v32, %s632_s27  ;;  %258 = vrot.lane.b32.xlu1 %v254_v31, %s633_s28 }
  0x9f   : > { %260 = vrot.lane.b32.xlu0 %v255_v35, %s633_s28  ;;  %240 = vrot.lane.b32.xlu1 %v236_v36, %s634_s29 }
  0xa3   : > { %242 = vrot.lane.b32.xlu0 %v237_v39, %s634_s29  ;;  %221 = vrot.lane.b32.xlu1 %v217_v40, %s635_s30 }
  0xa7   : > { %223 = vrot.lane.b32.xlu0 %v218_v43, %s635_s30  ;;  %333 = vrot.lane.b32.xlu1 %v329_v42, %s636_s4 }
  0xab   : > { %335 = vrot.lane.b32.xlu0 %v330_v45, %s636_s4  ;;  %365 = vperm.xlu1 %600, %v361_v47  }
  0xaf   : > { %370 = vperm.xlu0 %601, %v362_v48  }
  0xfd   : > { %v317_v49 = vpop.permute.xlu1 %316 }
  0xfe   : > { %322 = vst.msk [vmem:[#allocation3 + $0x38] sm:$0xf] %vm214_vm7, %v317_v49 }
 0x101   : > { %v305_v50 = vpop.permute.xlu1 %304  ;;  %v319_v51 = vpop.permute.xlu0 %318 }
 0x102   : > { %310 = vst.msk [vmem:[#allocation3 + $0x30] sm:$0xf] %vm214_vm7, %v305_v50  ;;  %323 = vst.msk [vmem:[#allocation3 + $0x3c] sm:$0xf] %vm214_vm7, %v319_v51 }
 0x105   : > { %v288_v52 = vpop.permute.xlu1 %287  ;;  %v307_v53 = vpop.permute.xlu0 %306 }
 0x106   : > { %293 = vst.msk [vmem:[#allocation3 + $0x28] sm:$0xf] %vm214_vm7, %v288_v52  ;;  %311 = vst.msk [vmem:[#allocation3 + $0x34] sm:$0xf] %vm214_vm7, %v307_v53 }
 0x109   : > { %v271_v54 = vpop.permute.xlu1 %270  ;;  %v290_v55 = vpop.permute.xlu0 %289  ;;  %v602_v56 = vld [vmem:[#allocation3 + $0x38] sm:$0xff]  }
 0x10a   : > { %276 = vst.msk [vmem:[#allocation3 + $0x20] sm:$0xf] %vm214_vm7, %v271_v54  ;;  %294 = vst.msk [vmem:[#allocation3 + $0x2c] sm:$0xf] %vm214_vm7, %v290_v55  ;;  %441 = vmatpush1.bf16.msra.mxu0 %v602_v56 }
 0x10b   : > { %442 = vmatprep.subr.bf16.mxu0 %v622_v1 }
 0x10d   : > { %v259_v57 = vpop.permute.xlu1 %258  ;;  %v273_v58 = vpop.permute.xlu0 %272  ;;  %v603_v59 = vld [vmem:[#allocation3 + $0x30] sm:$0xff]  }
 0x10e   : > { %264 = vst.msk [vmem:[#allocation3 + $0x18] sm:$0xf] %vm214_vm7, %v259_v57  ;;  %277 = vst.msk [vmem:[#allocation3 + $0x24] sm:$0xf] %vm214_vm7, %v273_v58  ;;  %443 = vmatpush1.bf16.msra.mxu0 %v603_v59 }
 0x10f   : > { %444 = vmatprep.subr.bf16.mxu0 %v622_v1 }
 0x111   : > { %v241_v60 = vpop.permute.xlu1 %240  ;;  %v261_v61 = vpop.permute.xlu0 %260  ;;  %v604_v62 = vld [vmem:[#allocation3 + $0x28] sm:$0xff]  }
 0x112   : > { %246 = vst.msk [vmem:[#allocation3 + $0x10] sm:$0xf] %vm214_vm7, %v241_v60  ;;  %265 = vst.msk [vmem:[#allocation3 + $0x1c] sm:$0xf] %vm214_vm7, %v261_v61  ;;  %445 = vmatpush1.bf16.msra.mxu0 %v604_v62 }
 0x113   : > { %446 = vmatprep.subr.bf16.mxu0 %v622_v1 }
 0x115   : > { %v222_v63 = vpop.permute.xlu1 %221  ;;  %v243_v0 = vpop.permute.xlu0 %242  ;;  %v605_v2 = vld [vmem:[#allocation3 + $0x20] sm:$0xff]  }
 0x116   : > { %227 = vst.msk [vmem:[#allocation3 + $0x8] sm:$0xf] %vm214_vm7, %v222_v63  ;;  %247 = vst.msk [vmem:[#allocation3 + $0x14] sm:$0xf] %vm214_vm7, %v243_v0  ;;  %447 = vmatpush1.bf16.msra.mxu0 %v605_v2 }
 0x117   : > { %448 = vmatprep.subr.bf16.mxu0 %v622_v1 }
 0x119   : > { %v334_v3 = vpop.permute.xlu1 %333  ;;  %v224_v4 = vpop.permute.xlu0 %223  ;;  %v606_v5 = vld [vmem:[#allocation3 + $0x18] sm:$0xff]  }
 0x11a   : > { %339 = vst.msk [vmem:[#allocation3 + $0x40] sm:$0xf] %vm214_vm7, %v334_v3  ;;  %228 = vst.msk [vmem:[#allocation3 + $0xc] sm:$0xf] %vm214_vm7, %v224_v4  ;;  %449 = vmatpush1.bf16.msra.mxu0 %v606_v5 }
 0x11b   : > { %450 = vmatprep.subr.bf16.mxu0 %v622_v1 }
 0x11d   : > { %v336_v6 = vpop.permute.xlu0 %335  ;;  %v607_v7 = vld [vmem:[#allocation3 + $0x10] sm:$0xff]  }
 0x11e   : > { %340 = vst.msk [vmem:[#allocation3 + $0x44] sm:$0xf] %vm214_vm7, %v336_v6  ;;  %451 = vmatpush1.bf16.msra.mxu0 %v607_v7 }
 0x11f   : > { %452 = vmatprep.subr.bf16.mxu0 %v622_v1 }
 0x121   : > { %v608_v8 = vld [vmem:[#allocation3 + $0x8] sm:$0xff]  }
 0x122   : > { %453 = vmatpush1.bf16.msra.mxu0 %v608_v8 }
 0x123   : > { %454 = vmatprep.subr.bf16.mxu0 %v622_v1 }
 0x125   : > { %v610_v10 = vld [vmem:[#allocation3 + $0x40] sm:$0xff]  }
 0x126   : > { %455 = vmatpush1.bf16.msra.mxu0 %v609_v9  ;;  %v366_v12 = vpop.permute.xlu1 %365 }
 0x127   : > { %470 = vmatprep.subr.bf16.mxu0 %v622_v1 }
 0x12a   : > { %471 = vmatpush2.bf16.msra.mxu0 %v610_v10  ;;  %v371_v16 = vpop.permute.xlu0 %370 }
 0x12d   : > { %473 = vmatmul.mubr.bf16.vlgmr.msra.gmra.mxu0 %v611_v11 }
 0x1ed   : > { %v474_v13 = vpop.f32.mrf.mxu0 }
 0x1ee   : > { %v475_v14 = vadd.f32 %v474_v13, %v366_v12 }
 0x1ef   : > { %v476_v15 = vpop.f32.mrf.mxu0 }
 0x1f0   : > { %v481_v17 = vmax.f32 %v475_v14, 0.0 }
 0x1f1   : > { %v477_v18 = vpop.f32.mrf.mxu0 }
 0x1f2   : > { %v575_v1 = vpack.c.bf16 %v481_v17, %v481_v17  ;;  %v478_v19 = vadd.f32 %v477_v18, %v371_v16 }
 0x1f3   : > { %v479_v20 = vpop.f32.mrf.mxu0 }
 0x1f4   : > { %491 = vst.msk [vmem:[%s170_s18] sm:$0xf] %vm214_vm7, %v575_v1  ;;  %v482_v21 = vmax.f32 %v478_v19, 0.0 }
 0x1f6   : > { %v576_v22 = vpack.c.bf16 %v482_v21, %v482_v21 }
 0x1f8   : > { %492 = vst.msk [vmem:[%s170_s18 + $0x4] sm:$0xf] %vm214_vm7, %v576_v22 }
 0x1f9 PF: > { %s13_s12 = sadd.s32 1, %s620_s12  }
 0x1fa   : > { %p10_p4 = scmp.ge.s32.totalorder %s13_s12, 4  }
 0x1fc   :  { %12 = sbr.rel (!%p10_p4) target bundleno = 1 (0x1), region = 62 }

// kernel: rsu_forward.12
= control target key start
LH: loop header
LB: loop body
LE: loop exit
PB: predicated region body
PF: predicated region fallthrough
CT: control target
= control target key end

     0   :  { %s657_s12 = smov 0   ;;  %s742_s0 = inlined_call_operand.vmem [shape: bf16[2,16,16], index: 0, kind: input, shape index: {}]   ;;  %s743_s1 = inlined_call_operand.vmem [shape: bf16[16,144], index: 1, kind: input, shape index: {}]   ;;  %s744_s2 = inlined_call_operand.vmem [shape: f32[16,1], index: 2, kind: input, shape index: {}]   ;;  %s745_s3 = inlined_call_operand.vmem [shape: bf16[2,16,16], index: 3, kind: output, shape index: {}]  }
   0x1 LB: > { %s548_s13 = sadd.s32 4294967295, %s620_s12   ;;  %p552_p0 = scmp.ge.s32.totalorder %s620_s12, 1  ;;  %s620_s12 = sphi %s657_s12, %s13_s12  }
   0x2   : > { %p137_p1 = scmp.lt.s32.totalorder %s620_s12, 3 }
   0x4   : > { %p138_p2 = pnand %p552_p0, %p137_p1 }
   0x5   : > { %p161_p3 = scmp.lt.s32.totalorder (!%p138_p2), %s548_s13, 1  ;;  %s623_s18 = smov (!%p138_p2), 10  }
   0x6   : > { %141 = sbr.rel (%p138_p2) target bundleno = 505 (0x1f9), region = 32  ;;  %s624_s19 = smov (!%p138_p2), 16  }
   0x7   : > { %s625_s20 = smov (!%p138_p2), 12   ;;  %s626_s21 = smov (!%p138_p2), 8  }
   0x8   : > { %s627_s22 = smov (!%p138_p2), 4   ;;  %s628_s23 = smov (!%p138_p2), 20  }
   0x9   : > { %s629_s24 = smov (!%p138_p2), 110   ;;  %s630_s25 = smov (!%p138_p2), 112  }
   0xa   : > { %s631_s26 = smov (!%p138_p2), 116   ;;  %s632_s27 = smov (!%p138_p2), 118  }
   0xb   : > { %v193_v0 = vlaneseq  ;;  %vm174_vm0 = vcmask 76800   ;;  %vm177_vm1 = vcmask 290000   ;;  %v622_v1 = vmov 0   ;;  %s749_s13 = smov (!%p161_p3, %s548_s13), 1  ;;  %s633_s28 = smov 120   ;;  %v361_v47 = vld [vmem:[%s744_s2] sm:$0xff] }
   0xc   : > { %175 = vst.msk [vmem:[#allocation2] sm:$0xf] %vm174_vm0, %v622_v1  ;;  %176 = vst.msk [vmem:[#allocation2 + $0x4] sm:$0xf] %vm174_vm0, %v622_v1  ;;  %440 = vmatprep.subr.bf16.mxu0 %v622_v1  ;;  %600 = vset.pattern.permute.xlu1 %v622_v1  ;;  %s573_s14 = sshll.u32 %s749_s13, 3  ;;  %vm190_vm6 = vcmask 207952  }
   0xd   : > { %v194_v2 = vand.u32 127, %v193_v0  ;;  %178 = vst.msk [vmem:[#allocation2] sm:$0xf] %vm177_vm1, %v622_v1  ;;  %179 = vst.msk [vmem:[#allocation2 + $0x4] sm:$0xf] %vm177_vm1, %v622_v1  ;;  %601 = vset.pattern.permute.xlu0 %v622_v1  ;;  %s165_s17 = scalar_lea.vmem %s742_s0, %s573_s14  ;;  %vm214_vm7 = vcmask 125952  }
   0xe   : > { %v180_v4 = vld [vmem:[%s165_s17] sm:$0xf]  ;;  %v181_v7 = vld [vmem:[%s165_s17 + $0x4] sm:$0xf]  ;;  %s634_s29 = smov 124   ;;  %s635_s30 = smov 126  }
   0xf   : > { %v199_v3 = vand.u32 3, %v194_v2  ;;  %184 = vrot.lane.b32.xlu0 %v180_v4, %s623_s18  ;;  %s636_s4 = smov 108   ;;  %v613_v46 = vld [vmem:[%s743_s1 + $0x4] ss:$8 sps:$4 sm:$0xff]   ;;  %vm436_vm13 = vcmask 130048  }
  0x10   : > { %568 = vmatprep.mubr.msk.bf16.mxu0 %vm436_vm13, %v613_v46  ;;  %v362_v48 = vld [vmem:[%s744_s2 + $0x8] sm:$0xff] }
  0x11   : > { %vm207_vm2 = vcmp.ge.s32.totalorder %v199_v3, 2  ;;  %vm208_vm3 = vcmp.lt.s32.totalorder %v199_v3, 2 }
  0x12   : > { %vm680_vm4 = vmpackc.low %vm207_vm2, %vm207_vm2 }
  0x13   : > { %v250_v6 = vsel %vm680_vm4, 65537, %v622_v1  ;;  %vm231_vm5 = vmpackc.low %vm208_vm3, %vm208_vm3  ;;  %186 = vrot.lane.b32.xlu0 %v181_v7, %s623_s18  ;;  %s170_s18 = scalar_lea.vmem %s745_s3, %s573_s14 }
  0x14   : > { %297 = vrot.lane.b32.xlu1 %v250_v6, %s624_s19  ;;  %v232_v8 = vsel %vm231_vm5, 65537, %v622_v1 }
  0x17   : > { %251 = vrot.lane.b32.xlu0 %v250_v6, %s626_s21 }
  0x18   : > { %280 = vrot.lane.b32.xlu1 %v232_v8, %s625_s20 }
  0x1b   : > { %326 = vrot.lane.b32.xlu0 %v232_v8, %s628_s23 }
  0x1c   : > { %233 = vrot.lane.b32.xlu1 %v232_v8, %s627_s22 }
  0x81   : > { %v185_v9 = vpop.permute.xlu0 %184 }
  0x82   : > { %191 = vst.msk [vmem:[#allocation2] sm:$0xf] %vm190_vm6, %v185_v9 }
  0x85   : > { %v187_v10 = vpop.permute.xlu0 %186 }
  0x86   : > { %192 = vst.msk [vmem:[#allocation2 + $0x4] sm:$0xf] %vm190_vm6, %v187_v10  ;;  %v298_v11 = vpop.permute.xlu1 %297 }
  0x87   : > { %vm299_vm8 = vcmp.ne.s16.totalorder %v298_v11, 0  ;;  %v611_v11 = vld [vmem:[%s743_s1] ss:$8 sps:$4 sm:$0xff]  }
  0x89   : > { %v209_v12 = vld [vmem:[#allocation2] sm:$0xf]  ;;  %v252_v26 = vpop.permute.xlu0 %251 }
  0x8a   : > { %v212_v13 = vsel %vm680_vm4, %v209_v12, 0  ;;  %v312_v14 = vld [vmem:[#allocation2] sm:$0xf]  ;;  %v281_v17 = vpop.permute.xlu1 %280  ;;  %vm253_vm10 = vcmp.ne.s16.totalorder %v252_v26, 0 }
  0x8b   : > { %215 = vst.msk [vmem:[#allocation3] sm:$0xf] %vm214_vm7, %v212_v13  ;;  %v295_v15 = vld [vmem:[#allocation2] sm:$0xf]  ;;  %316 = vrot.lane.b32.xlu1 %v312_v14, %s629_s24  ;;  %vm282_vm9 = vcmp.ne.s16.totalorder %v281_v17, 0 }
  0x8c   : > { %v300_v19 = vsel %vm299_vm8, %v295_v15, 0  ;;  %v278_v21 = vld [vmem:[#allocation2] sm:$0xf] }
  0x8d   : > { %v210_v16 = vld [vmem:[#allocation2 + $0x4] sm:$0xf]  ;;  %v283_v23 = vsel %vm282_vm9, %v278_v21, 0  ;;  %v266_v28 = vld [vmem:[#allocation2] sm:$0xf]  ;;  %v327_v38 = vpop.permute.xlu0 %326 }
  0x8e   : > { %v213_v18 = vsel %vm680_vm4, %v210_v16, 0  ;;  %v313_v20 = vld [vmem:[#allocation2 + $0x4] sm:$0xf]  ;;  %v248_v29 = vld [vmem:[#allocation2] sm:$0xf]  ;;  %v234_v30 = vpop.permute.xlu1 %233  ;;  %vm328_vm12 = vcmp.ne.s16.totalorder %v327_v38, 0 }
  0x8f   : > { %216 = vst.msk [vmem:[#allocation3 + $0x4] sm:$0xf] %vm214_vm7, %v213_v18  ;;  %304 = vrot.lane.b32.xlu1 %v300_v19, %s630_s25  ;;  %318 = vrot.lane.b32.xlu0 %v313_v20, %s629_s24  ;;  %v296_v22 = vld [vmem:[#allocation2 + $0x4] sm:$0xf]  ;;  %v254_v31 = vsel %vm253_vm10, %v248_v29, 0  ;;  %vm235_vm11 = vcmp.ne.s16.totalorder %v234_v30, 0 }
  0x90   : > { %v301_v24 = vsel %vm299_vm8, %v296_v22, 0  ;;  %v279_v25 = vld [vmem:[#allocation2 + $0x4] sm:$0xf]  ;;  %v229_v34 = vld [vmem:[#allocation2] sm:$0xf] }
  0x91   : > { %v284_v27 = vsel %vm282_vm9, %v279_v25, 0  ;;  %v267_v32 = vld [vmem:[#allocation2 + $0x4] sm:$0xf]  ;;  %v236_v36 = vsel %vm235_vm11, %v229_v34, 0  ;;  %v217_v40 = vld [vmem:[#allocation2] sm:$0xf] }
  0x92   : > { %v249_v33 = vld [vmem:[#allocation2 + $0x4] sm:$0xf]  ;;  %v324_v41 = vld [vmem:[#allocation2] sm:$0xf] }
  0x93   : > { %287 = vrot.lane.b32.xlu1 %v283_v23, %s631_s26  ;;  %306 = vrot.lane.b32.xlu0 %v301_v24, %s630_s25  ;;  %v255_v35 = vsel %vm253_vm10, %v249_v33, 0  ;;  %v230_v37 = vld [vmem:[#allocation2 + $0x4] sm:$0xf]  ;;  %v329_v42 = vsel %vm328_vm12, %v324_v41, 0 }
  0x94   : > { %v237_v39 = vsel %vm235_vm11, %v230_v37, 0  ;;  %v218_v43 = vld [vmem:[#allocation2 + $0x4] sm:$0xf] }
  0x95   : > { %v325_v44 = vld [vmem:[#allocation2 + $0x4] sm:$0xf] }
  0x96   : > { %v330_v45 = vsel %vm328_vm12, %v325_v44, 0  ;;  %v609_v9 = vld [vmem:[#allocation3] sm:$0xff]  }
  0x97   : > { %270 = vrot.lane.b32.xlu1 %v266_v28, %s632_s27  ;;  %289 = vrot.lane.b32.xlu0 %v284_v27, %s631_s26 }
  0x9b   : > { %272 = vrot.lane.b32.xlu0 %v267_v32, %s632_s27  ;;  %258 = vrot.lane.b32.xlu1 %v254_v31, %s633_s28 }
  0x9f   : > { %260 = vrot.lane.b32.xlu0 %v255_v35, %s633_s28  ;;  %240 = vrot.lane.b32.xlu1 %v236_v36, %s634_s29 }
  0xa3   : > { %242 = vrot.lane.b32.xlu0 %v237_v39, %s634_s29  ;;  %221 = vrot.lane.b32.xlu1 %v217_v40, %s635_s30 }
  0xa7   : > { %223 = vrot.lane.b32.xlu0 %v218_v43, %s635_s30  ;;  %333 = vrot.lane.b32.xlu1 %v329_v42, %s636_s4 }
  0xab   : > { %335 = vrot.lane.b32.xlu0 %v330_v45, %s636_s4  ;;  %365 = vperm.xlu1 %600, %v361_v47  }
  0xaf   : > { %370 = vperm.xlu0 %601, %v362_v48  }
  0xfd   : > { %v317_v49 = vpop.permute.xlu1 %316 }
  0xfe   : > { %322 = vst.msk [vmem:[#allocation3 + $0x38] sm:$0xf] %vm214_vm7, %v317_v49 }
 0x101   : > { %v305_v50 = vpop.permute.xlu1 %304  ;;  %v319_v51 = vpop.permute.xlu0 %318 }
 0x102   : > { %310 = vst.msk [vmem:[#allocation3 + $0x30] sm:$0xf] %vm214_vm7, %v305_v50  ;;  %323 = vst.msk [vmem:[#allocation3 + $0x3c] sm:$0xf] %vm214_vm7, %v319_v51 }
 0x105   : > { %v288_v52 = vpop.permute.xlu1 %287  ;;  %v307_v53 = vpop.permute.xlu0 %306 }
 0x106   : > { %293 = vst.msk [vmem:[#allocation3 + $0x28] sm:$0xf] %vm214_vm7, %v288_v52  ;;  %311 = vst.msk [vmem:[#allocation3 + $0x34] sm:$0xf] %vm214_vm7, %v307_v53 }
 0x109   : > { %v271_v54 = vpop.permute.xlu1 %270  ;;  %v290_v55 = vpop.permute.xlu0 %289  ;;  %v602_v56 = vld [vmem:[#allocation3 + $0x38] sm:$0xff]  }
 0x10a   : > { %276 = vst.msk [vmem:[#allocation3 + $0x20] sm:$0xf] %vm214_vm7, %v271_v54  ;;  %294 = vst.msk [vmem:[#allocation3 + $0x2c] sm:$0xf] %vm214_vm7, %v290_v55  ;;  %441 = vmatpush1.bf16.msra.mxu0 %v602_v56 }
 0x10b   : > { %442 = vmatprep.subr.bf16.mxu0 %v622_v1 }
 0x10d   : > { %v259_v57 = vpop.permute.xlu1 %258  ;;  %v273_v58 = vpop.permute.xlu0 %272  ;;  %v603_v59 = vld [vmem:[#allocation3 + $0x30] sm:$0xff]  }
 0x10e   : > { %264 = vst.msk [vmem:[#allocation3 + $0x18] sm:$0xf] %vm214_vm7, %v259_v57  ;;  %277 = vst.msk [vmem:[#allocation3 + $0x24] sm:$0xf] %vm214_vm7, %v273_v58  ;;  %443 = vmatpush1.bf16.msra.mxu0 %v603_v59 }
 0x10f   : > { %444 = vmatprep.subr.bf16.mxu0 %v622_v1 }
 0x111   : > { %v241_v60 = vpop.permute.xlu1 %240  ;;  %v261_v61 = vpop.permute.xlu0 %260  ;;  %v604_v62 = vld [vmem:[#allocation3 + $0x28] sm:$0xff]  }
 0x112   : > { %246 = vst.msk [vmem:[#allocation3 + $0x10] sm:$0xf] %vm214_vm7, %v241_v60  ;;  %265 = vst.msk [vmem:[#allocation3 + $0x1c] sm:$0xf] %vm214_vm7, %v261_v61  ;;  %445 = vmatpush1.bf16.msra.mxu0 %v604_v62 }
 0x113   : > { %446 = vmatprep.subr.bf16.mxu0 %v622_v1 }
 0x115   : > { %v222_v63 = vpop.permute.xlu1 %221  ;;  %v243_v0 = vpop.permute.xlu0 %242  ;;  %v605_v2 = vld [vmem:[#allocation3 + $0x20] sm:$0xff]  }
 0x116   : > { %227 = vst.msk [vmem:[#allocation3 + $0x8] sm:$0xf] %vm214_vm7, %v222_v63  ;;  %247 = vst.msk [vmem:[#allocation3 + $0x14] sm:$0xf] %vm214_vm7, %v243_v0  ;;  %447 = vmatpush1.bf16.msra.mxu0 %v605_v2 }
 0x117   : > { %448 = vmatprep.subr.bf16.mxu0 %v622_v1 }
 0x119   : > { %v334_v3 = vpop.permute.xlu1 %333  ;;  %v224_v4 = vpop.permute.xlu0 %223  ;;  %v606_v5 = vld [vmem:[#allocation3 + $0x18] sm:$0xff]  }
 0x11a   : > { %339 = vst.msk [vmem:[#allocation3 + $0x40] sm:$0xf] %vm214_vm7, %v334_v3  ;;  %228 = vst.msk [vmem:[#allocation3 + $0xc] sm:$0xf] %vm214_vm7, %v224_v4  ;;  %449 = vmatpush1.bf16.msra.mxu0 %v606_v5 }
 0x11b   : > { %450 = vmatprep.subr.bf16.mxu0 %v622_v1 }
 0x11d   : > { %v336_v6 = vpop.permute.xlu0 %335  ;;  %v607_v7 = vld [vmem:[#allocation3 + $0x10] sm:$0xff]  }
 0x11e   : > { %340 = vst.msk [vmem:[#allocation3 + $0x44] sm:$0xf] %vm214_vm7, %v336_v6  ;;  %451 = vmatpush1.bf16.msra.mxu0 %v607_v7 }
 0x11f   : > { %452 = vmatprep.subr.bf16.mxu0 %v622_v1 }
 0x121   : > { %v608_v8 = vld [vmem:[#allocation3 + $0x8] sm:$0xff]  }
 0x122   : > { %453 = vmatpush1.bf16.msra.mxu0 %v608_v8 }
 0x123   : > { %454 = vmatprep.subr.bf16.mxu0 %v622_v1 }
 0x125   : > { %v610_v10 = vld [vmem:[#allocation3 + $0x40] sm:$0xff]  }
 0x126   : > { %455 = vmatpush1.bf16.msra.mxu0 %v609_v9  ;;  %v366_v12 = vpop.permute.xlu1 %365 }
 0x127   : > { %470 = vmatprep.subr.bf16.mxu0 %v622_v1 }
 0x12a   : > { %471 = vmatpush2.bf16.msra.mxu0 %v610_v10  ;;  %v371_v16 = vpop.permute.xlu0 %370 }
 0x12d   : > { %473 = vmatmul.mubr.bf16.vlgmr.msra.gmra.mxu0 %v611_v11 }
 0x1ed   : > { %v474_v13 = vpop.f32.mrf.mxu0 }
 0x1ee   : > { %v475_v14 = vadd.f32 %v474_v13, %v366_v12 }
 0x1ef   : > { %v476_v15 = vpop.f32.mrf.mxu0 }
 0x1f0   : > { %v481_v17 = vmax.f32 %v475_v14, 0.0 }
 0x1f1   : > { %v477_v18 = vpop.f32.mrf.mxu0 }
 0x1f2   : > { %v575_v1 = vpack.c.bf16 %v481_v17, %v481_v17  ;;  %v478_v19 = vadd.f32 %v477_v18, %v371_v16 }
 0x1f3   : > { %v479_v20 = vpop.f32.mrf.mxu0 }
 0x1f4   : > { %491 = vst.msk [vmem:[%s170_s18] sm:$0xf] %vm214_vm7, %v575_v1  ;;  %v482_v21 = vmax.f32 %v478_v19, 0.0 }
 0x1f6   : > { %v576_v22 = vpack.c.bf16 %v482_v21, %v482_v21 }
 0x1f8   : > { %492 = vst.msk [vmem:[%s170_s18 + $0x4] sm:$0xf] %vm214_vm7, %v576_v22 }
 0x1f9 PF: > { %s13_s12 = sadd.s32 1, %s620_s12  }
 0x1fa   : > { %p10_p4 = scmp.ge.s32.totalorder %s13_s12, 4  }
 0x1fc   :  { %12 = sbr.rel (!%p10_p4) target bundleno = 1 (0x1), region = 62 }

// kernel: rsu_forward.13
= control target key start
LH: loop header
LB: loop body
LE: loop exit
PB: predicated region body
PF: predicated region fallthrough
CT: control target
= control target key end

     0   :  { %s1030_s15 = smov 0   ;;  %s1145_s0 = inlined_call_operand.vmem [shape: bf16[2,16,16], index: 0, kind: input, shape index: {}]   ;;  %s1146_s1 = inlined_call_operand.vmem [shape: bf16[2,16,16], index: 1, kind: input, shape index: {}]   ;;  %s1147_s2 = inlined_call_operand.vmem [shape: bf16[16,288], index: 2, kind: input, shape index: {}]   ;;  %s1148_s3 = inlined_call_operand.vmem [shape: f32[16,1], index: 3, kind: input, shape index: {}]   ;;  %s1149_s4 = inlined_call_operand.vmem [shape: bf16[2,16,16], index: 4, kind: output, shape index: {}]  }
   0x1 LB: > { %s856_s16 = sadd.s32 4294967295, %s986_s15   ;;  %p860_p0 = scmp.ge.s32.totalorder %s986_s15, 1  ;;  %s986_s15 = sphi %s1030_s15, %s14_s15  }
   0x2   : > { %p172_p1 = scmp.lt.s32.totalorder %s986_s15, 3 }
   0x4   : > { %p173_p2 = pnand %p860_p0, %p172_p1 }
   0x5   : > { %p203_p3 = scmp.lt.s32.totalorder (!%p173_p2), %s856_s16, 1  ;;  %s989_s24 = smov (!%p173_p2), 5  }
   0x6   : > { %176 = sbr.rel (%p173_p2) target bundleno = 533 (0x215), region = 36  ;;  %s990_s25 = smov (!%p173_p2), 4  }
   0x7   : > { %s991_s26 = smov (!%p173_p2), 8   ;;  %s992_s27 = smov (!%p173_p2), 2  }
   0x8   : > { %s993_s28 = smov (!%p173_p2), 6   ;;  %s994_s29 = smov (!%p173_p2), 10  }
   0x9   : > { %s995_s30 = smov (!%p173_p2), 119   ;;  %s996_s5 = smov (!%p173_p2), 127  }
   0xa   : > { %s997_s6 = smov (!%p173_p2), 124   ;;  %s998_s7 = smov (!%p173_p2), 120  }
   0xb   : > { %v256_v0 = vlaneseq  ;;  %vm221_vm0 = vcmask 35840   ;;  %vm226_vm1 = vcmask 208040   ;;  %v988_v1 = vmov 0   ;;  %s1153_s16 = smov (!%p203_p3, %s856_s16), 1  ;;  %s999_s8 = smov 126  }
   0xc   : > { %224 = vst.msk [vmem:[#allocation2 + $0x8] sm:$0xf] %vm221_vm0, %v988_v1  ;;  %222 = vst.msk [vmem:[#allocation2] sm:$0xf] %vm221_vm0, %v988_v1  ;;  %956 = vset.pattern.permute.xlu1 %v988_v1  ;;  %957 = vset.pattern.permute.xlu0 %v988_v1  ;;  %s1038_s17 = sshll.u32 %s1153_s16, 3  ;;  %vm241_vm6 = vcmask 166952  }
   0xd   : > { %223 = vst.msk [vmem:[#allocation2 + $0x4] sm:$0xf] %vm221_vm0, %v988_v1  ;;  %225 = vst.msk [vmem:[#allocation2 + $0xc] sm:$0xf] %vm221_vm0, %v988_v1  ;;  %v257_v2 = vand.u32 127, %v256_v0  ;;  %s212_s20 = scalar_lea.vmem %s1146_s1, %s1038_s17  ;;  %s207_s23 = scalar_lea.vmem %s1145_s0, %s1038_s17  ;;  %vm281_vm7 = vcmask 125952  }
   0xe   : > { %229 = vst.msk [vmem:[#allocation2 + $0x8] sm:$0xf] %vm226_vm1, %v988_v1  ;;  %227 = vst.msk [vmem:[#allocation2] sm:$0xf] %vm226_vm1, %v988_v1  ;;  %v244_v4 = vld [vmem:[%s212_s20] sm:$0xf] }
   0xf   : > { %228 = vst.msk [vmem:[#allocation2 + $0x4] sm:$0xf] %vm226_vm1, %v988_v1  ;;  %230 = vst.msk [vmem:[#allocation2 + $0xc] sm:$0xf] %vm226_vm1, %v988_v1  ;;  %v262_v3 = vand.u32 3, %v257_v2  ;;  %248 = vrot.lane.b32.xlu0 %v244_v4, %s989_s24  ;;  %s1000_s9 = smov 122  }
  0x10   : > { %v231_v5 = vld [vmem:[%s207_s23] sm:$0xf]  ;;  %v245_v6 = vld [vmem:[%s212_s20 + $0x4] sm:$0xf]  ;;  %s1001_s10 = smov 123   ;;  %s1003_s13 = smov 118  }
  0x11   : > { %vm270_vm2 = vcmp.ge.s32.totalorder %v262_v3, 1  ;;  %235 = vrot.lane.b32.xlu1 %v231_v5, %s989_s24  ;;  %v232_v7 = vld [vmem:[%s207_s23 + $0x4] sm:$0xf]  ;;  %vm271_vm4 = vcmp.lt.s32.totalorder %v262_v3, 3  ;;  %vm1004_vm13 = vmmov 0   ;;  %vm691_vm14 = vcmask 261120  }
  0x12   : > { %vm1048_vm3 = vmpackc.low %vm270_vm2, %vm270_vm2 }
  0x13   : > { %250 = vrot.lane.b32.xlu0 %v245_v6, %s989_s24  ;;  %v347_v9 = vsel %vm1048_vm3, 65537, %v988_v1  ;;  %vm314_vm5 = vmpackc.low %vm271_vm4, %vm271_vm4 }
  0x14   : > { %v315_v10 = vsel %vm314_vm5, 65537, %v988_v1 }
  0x15   : > { %237 = vrot.lane.b32.xlu1 %v232_v7, %s989_s24  ;;  %v976_v7 = vld [vmem:[%s1147_s2 + $0x4] ss:$12 sps:$4 sm:$0xff]  }
  0x16   : > { %727 = vmatprep.mubr.bf16.mxu0 %v976_v7  ;;  %v979_v7 = vld [vmem:[%s1147_s2 + $0x8] ss:$12 sps:$4 sm:$0xff]  }
  0x17   : > { %348 = vrot.lane.b32.xlu0 %v347_v9, %s990_s25 }
  0x19   : > { %434 = vrot.lane.b32.xlu1 %v347_v9, %s991_s26  ;;  %v1002_v9 = vmov 0.0   ;;  %s217_s26 = scalar_lea.vmem %s1149_s4, %s1038_s17 }
  0x1a   : > { %923 = vmatprep.subr.bf16.mxu1 %v1002_v9  ;;  %927 = vmatprep.mubr.msk.bf16.mxu1 %vm1004_vm13, %v1002_v9 }
  0x1b   : > { %316 = vrot.lane.b32.xlu0 %v315_v10, %s992_s27 }
  0x1d   : > { %403 = vrot.lane.b32.xlu1 %v315_v10, %s993_s28 }
  0x1f   : > { %489 = vrot.lane.b32.xlu0 %v315_v10, %s994_s29 }
  0x81   : > { %v249_v11 = vpop.permute.xlu0 %248 }
  0x82   : > { %254 = vst.msk [vmem:[#allocation2 + $0x8] sm:$0xf] %vm241_vm6, %v249_v11 }
  0x83   : > { %v236_v12 = vpop.permute.xlu1 %235 }
  0x84   : > { %242 = vst.msk [vmem:[#allocation2] sm:$0xf] %vm241_vm6, %v236_v12 }
  0x85   : > { %v251_v13 = vpop.permute.xlu0 %250 }
  0x86   : > { %255 = vst.msk [vmem:[#allocation2 + $0xc] sm:$0xf] %vm241_vm6, %v251_v13 }
  0x87   : > { %v238_v14 = vpop.permute.xlu1 %237 }
  0x88   : > { %243 = vst.msk [vmem:[#allocation2 + $0x4] sm:$0xf] %vm241_vm6, %v238_v14 }
  0x89   : > { %v274_v15 = vld [vmem:[#allocation2 + $0x8] sm:$0xf]  ;;  %v349_v28 = vpop.permute.xlu0 %348 }
  0x8a   : > { %v463_v16 = vld [vmem:[#allocation2 + $0x8] sm:$0xf]  ;;  %v279_v17 = vsel %vm1048_vm3, %v274_v15, 0  ;;  %vm350_vm8 = vcmp.ne.s16.totalorder %v349_v28, 0 }
  0x8b   : > { %v272_v18 = vld [vmem:[#allocation2] sm:$0xf]  ;;  %473 = vrot.lane.b32.xlu1 %v463_v16, %s995_s30  ;;  %284 = vst.msk [vmem:[#allocation3 + $0x8] sm:$0xf] %vm281_vm7, %v279_v17  ;;  %v288_v27 = vld [vmem:[#allocation2 + $0x8] sm:$0xf]  ;;  %v435_v36 = vpop.permute.xlu1 %434 }
  0x8c   : > { %v277_v19 = vsel %vm1048_vm3, %v272_v18, 0  ;;  %v461_v20 = vld [vmem:[#allocation2] sm:$0xf]  ;;  %v345_v31 = vld [vmem:[#allocation2 + $0x8] sm:$0xf]  ;;  %vm436_vm9 = vcmp.ne.s16.totalorder %v435_v36, 0 }
  0x8d   : > { %282 = vst.msk [vmem:[#allocation3] sm:$0xf] %vm281_vm7, %v277_v19  ;;  %v275_v21 = vld [vmem:[#allocation2 + $0xc] sm:$0xf]  ;;  %v286_v29 = vld [vmem:[#allocation2] sm:$0xf]  ;;  %v317_v41 = vpop.permute.xlu0 %316 }
  0x8e   : > { %v464_v22 = vld [vmem:[#allocation2 + $0xc] sm:$0xf]  ;;  %v280_v23 = vsel %vm1048_vm3, %v275_v21, 0  ;;  %v353_v32 = vsel %vm350_vm8, %v345_v31, 0  ;;  %v343_v34 = vld [vmem:[#allocation2] sm:$0xf] }
  0x8f   : > { %v273_v24 = vld [vmem:[#allocation2 + $0x4] sm:$0xf]  ;;  %475 = vrot.lane.b32.xlu0 %v464_v22, %s995_s30  ;;  %469 = vrot.lane.b32.xlu1 %v461_v20, %s995_s30  ;;  %285 = vst.msk [vmem:[#allocation3 + $0xc] sm:$0xf] %vm281_vm7, %v280_v23  ;;  %v289_v30 = vld [vmem:[#allocation2 + $0xc] sm:$0xf]  ;;  %v404_v54 = vpop.permute.xlu1 %403 }
  0x90   : > { %v278_v25 = vsel %vm1048_vm3, %v273_v24, 0  ;;  %v462_v26 = vld [vmem:[#allocation2 + $0x4] sm:$0xf]  ;;  %v346_v35 = vld [vmem:[#allocation2 + $0xc] sm:$0xf]  ;;  %v351_v37 = vsel %vm350_vm8, %v343_v34, 0 }
  0x91   : > { %283 = vst.msk [vmem:[#allocation3 + $0x4] sm:$0xf] %vm281_vm7, %v278_v25  ;;  %v287_v33 = vld [vmem:[#allocation2 + $0x4] sm:$0xf]  ;;  %v354_v38 = vsel %vm350_vm8, %v346_v35, 0  ;;  %vm318_vm10 = vcmp.ne.s16.totalorder %v317_v41, 0  ;;  %v490_v4 = vpop.permute.xlu0 %489 }
  0x92   : > { %v344_v39 = vld [vmem:[#allocation2 + $0x4] sm:$0xf]  ;;  %v432_v40 = vld [vmem:[#allocation2 + $0x8] sm:$0xf]  ;;  %v433_v44 = vld [vmem:[#allocation2 + $0xc] sm:$0xf] }
  0x93   : > { %298 = vrot.lane.b32.xlu1 %v288_v27, %s996_s5  ;;  %471 = vrot.lane.b32.xlu0 %v462_v26, %s995_s30  ;;  %v352_v42 = vsel %vm350_vm8, %v344_v39, 0  ;;  %v439_v43 = vsel %vm436_vm9, %v432_v40, 0  ;;  %v312_v45 = vld [vmem:[#allocation2 + $0x8] sm:$0xf]  ;;  %v440_v46 = vsel %vm436_vm9, %v433_v44, 0  ;;  %vm405_vm11 = vcmp.ne.s16.totalorder %v404_v54, 0 }
  0x94   : > { %v321_v47 = vsel %vm318_vm10, %v312_v45, 0  ;;  %v313_v48 = vld [vmem:[#allocation2 + $0xc] sm:$0xf]  ;;  %v430_v49 = vld [vmem:[#allocation2] sm:$0xf]  ;;  %vm491_vm12 = vcmp.ne.s16.totalorder %v490_v4, 0 }
  0x95   : > { %v322_v50 = vsel %vm318_vm10, %v313_v48, 0  ;;  %v437_v51 = vsel %vm436_vm9, %v430_v49, 0  ;;  %v431_v52 = vld [vmem:[#allocation2 + $0x4] sm:$0xf]  ;;  %v310_v53 = vld [vmem:[#allocation2] sm:$0xf] }
  0x96   : > { %v438_v55 = vsel %vm436_vm9, %v431_v52, 0  ;;  %v319_v56 = vsel %vm318_vm10, %v310_v53, 0  ;;  %v311_v57 = vld [vmem:[#allocation2 + $0x4] sm:$0xf]  ;;  %v401_v58 = vld [vmem:[#allocation2 + $0x8] sm:$0xf] }
  0x97   : > { %294 = vrot.lane.b32.xlu1 %v286_v29, %s996_s5  ;;  %300 = vrot.lane.b32.xlu0 %v289_v30, %s996_s5  ;;  %v320_v59 = vsel %vm318_vm10, %v311_v57, 0  ;;  %v408_v60 = vsel %vm405_vm11, %v401_v58, 0  ;;  %v402_v61 = vld [vmem:[#allocation2 + $0xc] sm:$0xf]  ;;  %v399_v62 = vld [vmem:[#allocation2] sm:$0xf] }
  0x98   : > { %v409_v63 = vsel %vm405_vm11, %v402_v61, 0  ;;  %v406_v0 = vsel %vm405_vm11, %v399_v62, 0  ;;  %v400_v1 = vld [vmem:[#allocation2 + $0x4] sm:$0xf]  ;;  %v377_v3 = vld [vmem:[#allocation2 + $0x8] sm:$0xf] }
  0x99   : > { %v407_v2 = vsel %vm405_vm11, %v400_v1, 0  ;;  %v378_v5 = vld [vmem:[#allocation2 + $0xc] sm:$0xf]  ;;  %v375_v6 = vld [vmem:[#allocation2] sm:$0xf] }
  0x9a   : > { %v487_v8 = vld [vmem:[#allocation2 + $0x8] sm:$0xf]  ;;  %v376_v10 = vld [vmem:[#allocation2 + $0x4] sm:$0xf]  ;;  %v488_v12 = vld [vmem:[#allocation2 + $0xc] sm:$0xf] }
  0x9b   : > { %363 = vrot.lane.b32.xlu1 %v353_v32, %s997_s6  ;;  %296 = vrot.lane.b32.xlu0 %v287_v33, %s996_s5  ;;  %v494_v11 = vsel %vm491_vm12, %v487_v8, 0  ;;  %v485_v13 = vld [vmem:[#allocation2] sm:$0xf]  ;;  %v495_v14 = vsel %vm491_vm12, %v488_v12, 0  ;;  %v486_v16 = vld [vmem:[#allocation2 + $0x4] sm:$0xf] }
  0x9c   : > { %v492_v15 = vsel %vm491_vm12, %v485_v13, 0  ;;  %v493_v17 = vsel %vm491_vm12, %v486_v16, 0  ;;  %v556_v18 = vld [vmem:[%s1148_s3] sm:$0xff]  ;;  %v557_v19 = vld [vmem:[%s1148_s3 + $0x8] sm:$0xff] }
  0x9d   : > { %v974_v4 = vld [vmem:[%s1147_s2] ss:$12 sps:$4 sm:$0xff]  }
  0x9f   : > { %359 = vrot.lane.b32.xlu1 %v351_v37, %s997_s6  ;;  %365 = vrot.lane.b32.xlu0 %v354_v38, %s997_s6 }
  0xa3   : > { %361 = vrot.lane.b32.xlu0 %v352_v42, %s997_s6  ;;  %449 = vrot.lane.b32.xlu1 %v439_v43, %s998_s7 }
  0xa7   : > { %451 = vrot.lane.b32.xlu0 %v440_v46, %s998_s7  ;;  %331 = vrot.lane.b32.xlu1 %v321_v47, %s999_s8 }
  0xab   : > { %333 = vrot.lane.b32.xlu0 %v322_v50, %s999_s8  ;;  %445 = vrot.lane.b32.xlu1 %v437_v51, %s998_s7 }
  0xaf   : > { %447 = vrot.lane.b32.xlu0 %v438_v55, %s998_s7  ;;  %327 = vrot.lane.b32.xlu1 %v319_v56, %s999_s8 }
  0xb3   : > { %329 = vrot.lane.b32.xlu0 %v320_v59, %s999_s8  ;;  %418 = vrot.lane.b32.xlu1 %v408_v60, %s1000_s9 }
  0xb7   : > { %420 = vrot.lane.b32.xlu0 %v409_v63, %s1000_s9  ;;  %414 = vrot.lane.b32.xlu1 %v406_v0, %s1000_s9  ;;  %v971_v0 = vld [vmem:[#allocation3 + $0x8] sm:$0xff]  }
  0xbb   : > { %416 = vrot.lane.b32.xlu0 %v407_v2, %s1000_s9  ;;  %387 = vrot.lane.b32.xlu1 %v377_v3, %s1001_s10  ;;  %v973_v3 = vld [vmem:[#allocation3] sm:$0xff]  }
  0xbf   : > { %389 = vrot.lane.b32.xlu0 %v378_v5, %s1001_s10  ;;  %383 = vrot.lane.b32.xlu1 %v375_v6, %s1001_s10 }
  0xc3   : > { %385 = vrot.lane.b32.xlu0 %v376_v10, %s1001_s10  ;;  %504 = vrot.lane.b32.xlu1 %v494_v11, %s1003_s13 }
  0xc7   : > { %506 = vrot.lane.b32.xlu0 %v495_v14, %s1003_s13  ;;  %500 = vrot.lane.b32.xlu1 %v492_v15, %s1003_s13 }
  0xcb   : > { %502 = vrot.lane.b32.xlu0 %v493_v17, %s1003_s13  ;;  %560 = vperm.xlu1 %956, %v556_v18  }
  0xcf   : > { %565 = vperm.xlu0 %957, %v557_v19  }
  0xfd   : > { %v474_v20 = vpop.permute.xlu1 %473 }
  0xfe   : > { %483 = vst.msk [vmem:[#allocation3 + $0x78] sm:$0xf] %vm281_vm7, %v474_v20 }
 0x101   : > { %v476_v21 = vpop.permute.xlu0 %475  ;;  %v470_v22 = vpop.permute.xlu1 %469 }
 0x102   : > { %484 = vst.msk [vmem:[#allocation3 + $0x7c] sm:$0xf] %vm281_vm7, %v476_v21  ;;  %481 = vst.msk [vmem:[#allocation3 + $0x70] sm:$0xf] %vm281_vm7, %v470_v22 }
 0x105   : > { %v472_v23 = vpop.permute.xlu0 %471  ;;  %v299_v24 = vpop.permute.xlu1 %298 }
 0x106   : > { %482 = vst.msk [vmem:[#allocation3 + $0x74] sm:$0xf] %vm281_vm7, %v472_v23  ;;  %308 = vst.msk [vmem:[#allocation3 + $0x18] sm:$0xf] %vm281_vm7, %v299_v24 }
 0x109   : > { %v301_v25 = vpop.permute.xlu0 %300  ;;  %v295_v26 = vpop.permute.xlu1 %294  ;;  %v958_v27 = vld [vmem:[#allocation3 + $0x78] sm:$0xff]  }
 0x10a   : > { %309 = vst.msk [vmem:[#allocation3 + $0x1c] sm:$0xf] %vm281_vm7, %v301_v25  ;;  %306 = vst.msk [vmem:[#allocation3 + $0x10] sm:$0xf] %vm281_vm7, %v295_v26  ;;  %898 = vmatprep.subr.bf16.mxu0 %v958_v27 }
 0x10d   : > { %v297_v28 = vpop.permute.xlu0 %296  ;;  %v364_v29 = vpop.permute.xlu1 %363  ;;  %v960_v37 = vld [vmem:[#allocation3 + $0x70] sm:$0xff]  }
 0x10e   : > { %307 = vst.msk [vmem:[#allocation3 + $0x14] sm:$0xf] %vm281_vm7, %v297_v28  ;;  %373 = vst.msk [vmem:[#allocation3 + $0x38] sm:$0xf] %vm281_vm7, %v364_v29 }
 0x111   : > { %v366_v30 = vpop.permute.xlu0 %365  ;;  %v360_v31 = vpop.permute.xlu1 %359  ;;  %v967_v56 = vld [vmem:[#allocation3 + $0x18] sm:$0xff]  }
 0x112   : > { %374 = vst.msk [vmem:[#allocation3 + $0x3c] sm:$0xf] %vm281_vm7, %v366_v30  ;;  %371 = vst.msk [vmem:[#allocation3 + $0x30] sm:$0xf] %vm281_vm7, %v360_v31 }
 0x115   : > { %v362_v32 = vpop.permute.xlu0 %361  ;;  %v450_v33 = vpop.permute.xlu1 %449  ;;  %v969_v60 = vld [vmem:[#allocation3 + $0x10] sm:$0xff]  }
 0x116   : > { %372 = vst.msk [vmem:[#allocation3 + $0x34] sm:$0xf] %vm281_vm7, %v362_v32  ;;  %459 = vst.msk [vmem:[#allocation3 + $0x68] sm:$0xf] %vm281_vm7, %v450_v33 }
 0x119   : > { %v452_v34 = vpop.permute.xlu0 %451  ;;  %v332_v35 = vpop.permute.xlu1 %331  ;;  %v959_v36 = vld [vmem:[#allocation3 + $0x38] sm:$0xff]  }
 0x11a   : > { %460 = vst.msk [vmem:[#allocation3 + $0x6c] sm:$0xf] %vm281_vm7, %v452_v34  ;;  %341 = vst.msk [vmem:[#allocation3 + $0x28] sm:$0xf] %vm281_vm7, %v332_v35  ;;  %899 = vmatpush3.bf16.msra.mxu0 %v959_v36 }
 0x11b   : > { %900 = vmatprep.subr.bf16.mxu0 %v960_v37 }
 0x11d   : > { %v334_v38 = vpop.permute.xlu0 %333  ;;  %v446_v39 = vpop.permute.xlu1 %445  ;;  %v961_v40 = vld [vmem:[#allocation3 + $0x30] sm:$0xff]  }
 0x11e   : > { %342 = vst.msk [vmem:[#allocation3 + $0x2c] sm:$0xf] %vm281_vm7, %v334_v38  ;;  %457 = vst.msk [vmem:[#allocation3 + $0x60] sm:$0xf] %vm281_vm7, %v446_v39  ;;  %901 = vmatpush3.bf16.msra.mxu0 %v961_v40 }
 0x121   : > { %v448_v41 = vpop.permute.xlu0 %447  ;;  %v328_v42 = vpop.permute.xlu1 %327  ;;  %v962_v43 = vld [vmem:[#allocation3 + $0x68] sm:$0xff]  }
 0x122   : > { %458 = vst.msk [vmem:[#allocation3 + $0x64] sm:$0xf] %vm281_vm7, %v448_v41  ;;  %339 = vst.msk [vmem:[#allocation3 + $0x20] sm:$0xf] %vm281_vm7, %v328_v42  ;;  %902 = vmatprep.subr.bf16.mxu0 %v962_v43 }
 0x125   : > { %v330_v44 = vpop.permute.xlu0 %329  ;;  %v419_v45 = vpop.permute.xlu1 %418  ;;  %v963_v46 = vld [vmem:[#allocation3 + $0x28] sm:$0xff]  }
 0x126   : > { %340 = vst.msk [vmem:[#allocation3 + $0x24] sm:$0xf] %vm281_vm7, %v330_v44  ;;  %428 = vst.msk [vmem:[#allocation3 + $0x58] sm:$0xf] %vm281_vm7, %v419_v45  ;;  %903 = vmatpush3.bf16.msra.mxu0 %v963_v46 }
 0x129   : > { %v421_v47 = vpop.permute.xlu0 %420  ;;  %v415_v48 = vpop.permute.xlu1 %414  ;;  %v964_v49 = vld [vmem:[#allocation3 + $0x60] sm:$0xff]  }
 0x12a   : > { %429 = vst.msk [vmem:[#allocation3 + $0x5c] sm:$0xf] %vm281_vm7, %v421_v47  ;;  %426 = vst.msk [vmem:[#allocation3 + $0x50] sm:$0xf] %vm281_vm7, %v415_v48  ;;  %904 = vmatprep.subr.bf16.mxu0 %v964_v49 }
 0x12d   : > { %v417_v50 = vpop.permute.xlu0 %416  ;;  %v388_v51 = vpop.permute.xlu1 %387  ;;  %v965_v52 = vld [vmem:[#allocation3 + $0x20] sm:$0xff]  }
 0x12e   : > { %427 = vst.msk [vmem:[#allocation3 + $0x54] sm:$0xf] %vm281_vm7, %v417_v50  ;;  %397 = vst.msk [vmem:[#allocation3 + $0x48] sm:$0xf] %vm281_vm7, %v388_v51  ;;  %905 = vmatpush3.bf16.msra.mxu0 %v965_v52 }
 0x131   : > { %v390_v53 = vpop.permute.xlu0 %389  ;;  %v384_v54 = vpop.permute.xlu1 %383  ;;  %v966_v55 = vld [vmem:[#allocation3 + $0x58] sm:$0xff]  }
 0x132   : > { %398 = vst.msk [vmem:[#allocation3 + $0x4c] sm:$0xf] %vm281_vm7, %v390_v53  ;;  %395 = vst.msk [vmem:[#allocation3 + $0x40] sm:$0xf] %vm281_vm7, %v384_v54  ;;  %906 = vmatprep.subr.bf16.mxu0 %v966_v55 }
 0x133   : > { %907 = vmatpush3.bf16.msra.mxu0 %v967_v56 }
 0x135   : > { %v386_v57 = vpop.permute.xlu0 %385  ;;  %v505_v58 = vpop.permute.xlu1 %504  ;;  %v968_v59 = vld [vmem:[#allocation3 + $0x50] sm:$0xff]  }
 0x136   : > { %396 = vst.msk [vmem:[#allocation3 + $0x44] sm:$0xf] %vm281_vm7, %v386_v57  ;;  %514 = vst.msk [vmem:[#allocation3 + $0x88] sm:$0xf] %vm281_vm7, %v505_v58  ;;  %908 = vmatprep.subr.bf16.mxu0 %v968_v59 }
 0x137   : > { %909 = vmatpush3.bf16.msra.mxu0 %v969_v60 }
 0x139   : > { %v507_v61 = vpop.permute.xlu0 %506  ;;  %v501_v62 = vpop.permute.xlu1 %500  ;;  %v970_v63 = vld [vmem:[#allocation3 + $0x48] sm:$0xff]  }
 0x13a   : > { %515 = vst.msk [vmem:[#allocation3 + $0x8c] sm:$0xf] %vm281_vm7, %v507_v61  ;;  %512 = vst.msk [vmem:[#allocation3 + $0x80] sm:$0xf] %vm281_vm7, %v501_v62  ;;  %910 = vmatprep.subr.bf16.mxu0 %v970_v63 }
 0x13b   : > { %911 = vmatpush3.bf16.msra.mxu0 %v971_v0 }
 0x13d   : > { %v503_v1 = vpop.permute.xlu0 %502  ;;  %v972_v2 = vld [vmem:[#allocation3 + $0x40] sm:$0xff]  }
 0x13e   : > { %513 = vst.msk [vmem:[#allocation3 + $0x84] sm:$0xf] %vm281_vm7, %v503_v1  ;;  %912 = vmatprep.subr.bf16.mxu0 %v972_v2 }
 0x13f   : > { %913 = vmatpush3.bf16.msra.mxu0 %v973_v3 }
 0x141   : > { %v977_v5 = vld [vmem:[#allocation3 + $0x88] sm:$0xff]  }
 0x142   : > { %728 = vmatmul.mubr.bf16.vlgmr.msra.gmra.mxu0 %v974_v4  ;;  %924 = vmatpush3.bf16.msra.mxu1 %v977_v5 }
 0x143   : > { %925 = vmatprep.subr.bf16.mxu1 %v1002_v9 }
 0x145   : > { %v978_v6 = vld [vmem:[#allocation3 + $0x80] sm:$0xff]  }
 0x146   : > { %926 = vmatpush3.bf16.msra.mxu1 %v978_v6  ;;  %v561_v11 = vpop.permute.xlu1 %560 }
 0x149   : > { %928 = vmatmul.mubr.msk.bf16.vlgmr.msra.gmra.mxu1 %vm691_vm14, %v979_v7 }
 0x14a   : > { %v566_v16 = vpop.permute.xlu0 %565 }
 0x202   : > { %v914_v8 = vpop.f32.mrf.mxu0 }
 0x204   : > { %v915_v10 = vpop.f32.mrf.mxu0 }
 0x205   : > { %v916_v12 = vadd.f32 %v915_v10, %v914_v8 }
 0x206   : > { %v917_v13 = vpop.f32.mrf.mxu0 }
 0x207   : > { %v730_v14 = vadd.f32 %v916_v12, %v561_v11 }
 0x208   : > { %v918_v15 = vpop.f32.mrf.mxu0 }
 0x209   : > { %v919_v17 = vadd.f32 %v918_v15, %v917_v13  ;;  %v770_v18 = vpop.f32.mrf.mxu1 }
 0x20a   : > { %v771_v9 = vadd.f32 %v770_v18, %v730_v14 }
 0x20b   : > { %v733_v19 = vadd.f32 %v919_v17, %v566_v16  ;;  %v929_v20 = vpop.f32.mrf.mxu1 }
 0x20c   : > { %v777_v21 = vmax.f32 %v771_v9, 0.0 }
 0x20d   : > { %v773_v22 = vpop.f32.mrf.mxu1 }
 0x20e   : > { %v896_v23 = vpack.c.bf16 %v777_v21, %v777_v21  ;;  %v774_v24 = vadd.f32 %v773_v22, %v733_v19 }
 0x20f   : > { %v930_v25 = vpop.f32.mrf.mxu1 }
 0x210   : > { %787 = vst.msk [vmem:[%s217_s26] sm:$0xf] %vm281_vm7, %v896_v23  ;;  %v778_v26 = vmax.f32 %v774_v24, 0.0 }
 0x212   : > { %v897_v27 = vpack.c.bf16 %v778_v26, %v778_v26 }
 0x214   : > { %788 = vst.msk [vmem:[%s217_s26 + $0x4] sm:$0xf] %vm281_vm7, %v897_v27 }
 0x215 PF: > { %s14_s15 = sadd.s32 1, %s986_s15  }
 0x216   : > { %p11_p4 = scmp.ge.s32.totalorder %s14_s15, 4  }
 0x218   :  { %13 = sbr.rel (!%p11_p4) target bundleno = 1 (0x1), region = 69 }

// kernel: rsu_forward.14
= control target key start
LH: loop header
LB: loop body
LE: loop exit
PB: predicated region body
PF: predicated region fallthrough
CT: control target
= control target key end

     0   :  { %s1030_s15 = smov 0   ;;  %s1145_s0 = inlined_call_operand.vmem [shape: bf16[2,16,64], index: 0, kind: input, shape index: {}]   ;;  %s1146_s1 = inlined_call_operand.vmem [shape: bf16[2,16,64], index: 1, kind: input, shape index: {}]   ;;  %s1147_s2 = inlined_call_operand.vmem [shape: bf16[16,288], index: 2, kind: input, shape index: {}]   ;;  %s1148_s3 = inlined_call_operand.vmem [shape: f32[16,1], index: 3, kind: input, shape index: {}]   ;;  %s1149_s4 = inlined_call_operand.vmem [shape: bf16[2,16,64], index: 4, kind: output, shape index: {}]  }
   0x1 LB: > { %s856_s16 = sadd.s32 4294967295, %s986_s15   ;;  %p860_p0 = scmp.ge.s32.totalorder %s986_s15, 1  ;;  %s986_s15 = sphi %s1030_s15, %s14_s15  }
   0x2   : > { %p172_p1 = scmp.lt.s32.totalorder %s986_s15, 3 }
   0x4   : > { %p173_p2 = pnand %p860_p0, %p172_p1 }
   0x5   : > { %p203_p3 = scmp.lt.s32.totalorder (!%p173_p2), %s856_s16, 1  ;;  %s989_s24 = smov (!%p173_p2), 9  }
   0x6   : > { %176 = sbr.rel (%p173_p2) target bundleno = 533 (0x215), region = 36  ;;  %s990_s25 = smov (!%p173_p2), 8  }
   0x7   : > { %s991_s26 = smov (!%p173_p2), 16   ;;  %s992_s27 = smov (!%p173_p2), 2  }
   0x8   : > { %s993_s28 = smov (!%p173_p2), 10   ;;  %s994_s29 = smov (!%p173_p2), 18  }
   0x9   : > { %s995_s30 = smov (!%p173_p2), 111   ;;  %s996_s5 = smov (!%p173_p2), 127  }
   0xa   : > { %s997_s6 = smov (!%p173_p2), 120   ;;  %s998_s7 = smov (!%p173_p2), 112  }
   0xb   : > { %v256_v0 = vlaneseq  ;;  %vm221_vm0 = vcmask 68608   ;;  %vm226_vm1 = vcmask 667208   ;;  %v988_v1 = vmov 0   ;;  %s1153_s16 = smov (!%p203_p3, %s856_s16), 1  ;;  %s999_s8 = smov 126  }
   0xc   : > { %224 = vst.msk [vmem:[#allocation2 + $0x8] sm:$0xf] %vm221_vm0, %v988_v1  ;;  %222 = vst.msk [vmem:[#allocation2] sm:$0xf] %vm221_vm0, %v988_v1  ;;  %956 = vset.pattern.permute.xlu1 %v988_v1  ;;  %957 = vset.pattern.permute.xlu0 %v988_v1  ;;  %s1038_s17 = sshll.u32 %s1153_s16, 3  ;;  %vm241_vm6 = vcmask 592968  }
   0xd   : > { %223 = vst.msk [vmem:[#allocation2 + $0x4] sm:$0xf] %vm221_vm0, %v988_v1  ;;  %225 = vst.msk [vmem:[#allocation2 + $0xc] sm:$0xf] %vm221_vm0, %v988_v1  ;;  %v257_v2 = vand.u32 127, %v256_v0  ;;  %s212_s20 = scalar_lea.vmem %s1146_s1, %s1038_s17  ;;  %s207_s23 = scalar_lea.vmem %s1145_s0, %s1038_s17  ;;  %vm281_vm7 = vcmask 519168  }
   0xe   : > { %229 = vst.msk [vmem:[#allocation2 + $0x8] sm:$0xf] %vm226_vm1, %v988_v1  ;;  %227 = vst.msk [vmem:[#allocation2] sm:$0xf] %vm226_vm1, %v988_v1  ;;  %v244_v4 = vld [vmem:[%s212_s20] sm:$0xf] }
   0xf   : > { %228 = vst.msk [vmem:[#allocation2 + $0x4] sm:$0xf] %vm226_vm1, %v988_v1  ;;  %230 = vst.msk [vmem:[#allocation2 + $0xc] sm:$0xf] %vm226_vm1, %v988_v1  ;;  %v262_v3 = vand.u32 7, %v257_v2  ;;  %248 = vrot.lane.b32.xlu0 %v244_v4, %s989_s24  ;;  %s1000_s9 = smov 118  }
  0x10   : > { %v231_v5 = vld [vmem:[%s207_s23] sm:$0xf]  ;;  %v245_v6 = vld [vmem:[%s212_s20 + $0x4] sm:$0xf]  ;;  %s1001_s10 = smov 119   ;;  %s1003_s13 = smov 110  }
  0x11   : > { %vm270_vm2 = vcmp.ge.s32.totalorder %v262_v3, 1  ;;  %235 = vrot.lane.b32.xlu1 %v231_v5, %s989_s24  ;;  %v232_v7 = vld [vmem:[%s207_s23 + $0x4] sm:$0xf]  ;;  %vm271_vm4 = vcmp.lt.s32.totalorder %v262_v3, 7  ;;  %vm1004_vm13 = vmmov 0   ;;  %vm691_vm14 = vcmask 261120  }
  0x12   : > { %vm1048_vm3 = vmpackc.low %vm270_vm2, %vm270_vm2 }
  0x13   : > { %250 = vrot.lane.b32.xlu0 %v245_v6, %s989_s24  ;;  %v347_v9 = vsel %vm1048_vm3, 65537, %v988_v1  ;;  %vm314_vm5 = vmpackc.low %vm271_vm4, %vm271_vm4 }
  0x14   : > { %v315_v10 = vsel %vm314_vm5, 65537, %v988_v1 }
  0x15   : > { %237 = vrot.lane.b32.xlu1 %v232_v7, %s989_s24  ;;  %v976_v7 = vld [vmem:[%s1147_s2 + $0x4] ss:$12 sps:$4 sm:$0xff]  }
  0x16   : > { %727 = vmatprep.mubr.bf16.mxu0 %v976_v7  ;;  %v979_v7 = vld [vmem:[%s1147_s2 + $0x8] ss:$12 sps:$4 sm:$0xff]  }
  0x17   : > { %348 = vrot.lane.b32.xlu0 %v347_v9, %s990_s25 }
  0x19   : > { %434 = vrot.lane.b32.xlu1 %v347_v9, %s991_s26  ;;  %v1002_v9 = vmov 0.0   ;;  %s217_s26 = scalar_lea.vmem %s1149_s4, %s1038_s17 }
  0x1a   : > { %923 = vmatprep.subr.bf16.mxu1 %v1002_v9  ;;  %927 = vmatprep.mubr.msk.bf16.mxu1 %vm1004_vm13, %v1002_v9 }
  0x1b   : > { %316 = vrot.lane.b32.xlu0 %v315_v10, %s992_s27 }
  0x1d   : > { %403 = vrot.lane.b32.xlu1 %v315_v10, %s993_s28 }
  0x1f   : > { %489 = vrot.lane.b32.xlu0 %v315_v10, %s994_s29 }
  0x81   : > { %v249_v11 = vpop.permute.xlu0 %248 }
  0x82   : > { %254 = vst.msk [vmem:[#allocation2 + $0x8] sm:$0xf] %vm241_vm6, %v249_v11 }
  0x83   : > { %v236_v12 = vpop.permute.xlu1 %235 }
  0x84   : > { %242 = vst.msk [vmem:[#allocation2] sm:$0xf] %vm241_vm6, %v236_v12 }
  0x85   : > { %v251_v13 = vpop.permute.xlu0 %250 }
  0x86   : > { %255 = vst.msk [vmem:[#allocation2 + $0xc] sm:$0xf] %vm241_vm6, %v251_v13 }
  0x87   : > { %v238_v14 = vpop.permute.xlu1 %237 }
  0x88   : > { %243 = vst.msk [vmem:[#allocation2 + $0x4] sm:$0xf] %vm241_vm6, %v238_v14 }
  0x89   : > { %v274_v15 = vld [vmem:[#allocation2 + $0x8] sm:$0xf]  ;;  %v349_v28 = vpop.permute.xlu0 %348 }
  0x8a   : > { %v463_v16 = vld [vmem:[#allocation2 + $0x8] sm:$0xf]  ;;  %v279_v17 = vsel %vm1048_vm3, %v274_v15, 0  ;;  %vm350_vm8 = vcmp.ne.s16.totalorder %v349_v28, 0 }
  0x8b   : > { %v272_v18 = vld [vmem:[#allocation2] sm:$0xf]  ;;  %473 = vrot.lane.b32.xlu1 %v463_v16, %s995_s30  ;;  %284 = vst.msk [vmem:[#allocation3 + $0x8] sm:$0xf] %vm281_vm7, %v279_v17  ;;  %v288_v27 = vld [vmem:[#allocation2 + $0x8] sm:$0xf]  ;;  %v435_v36 = vpop.permute.xlu1 %434 }
  0x8c   : > { %v277_v19 = vsel %vm1048_vm3, %v272_v18, 0  ;;  %v461_v20 = vld [vmem:[#allocation2] sm:$0xf]  ;;  %v345_v31 = vld [vmem:[#allocation2 + $0x8] sm:$0xf]  ;;  %vm436_vm9 = vcmp.ne.s16.totalorder %v435_v36, 0 }
  0x8d   : > { %282 = vst.msk [vmem:[#allocation3] sm:$0xf] %vm281_vm7, %v277_v19  ;;  %v275_v21 = vld [vmem:[#allocation2 + $0xc] sm:$0xf]  ;;  %v286_v29 = vld [vmem:[#allocation2] sm:$0xf]  ;;  %v317_v41 = vpop.permute.xlu0 %316 }
  0x8e   : > { %v464_v22 = vld [vmem:[#allocation2 + $0xc] sm:$0xf]  ;;  %v280_v23 = vsel %vm1048_vm3, %v275_v21, 0  ;;  %v353_v32 = vsel %vm350_vm8, %v345_v31, 0  ;;  %v343_v34 = vld [vmem:[#allocation2] sm:$0xf] }
  0x8f   : > { %v273_v24 = vld [vmem:[#allocation2 + $0x4] sm:$0xf]  ;;  %475 = vrot.lane.b32.xlu0 %v464_v22, %s995_s30  ;;  %469 = vrot.lane.b32.xlu1 %v461_v20, %s995_s30  ;;  %285 = vst.msk [vmem:[#allocation3 + $0xc] sm:$0xf] %vm281_vm7, %v280_v23  ;;  %v289_v30 = vld [vmem:[#allocation2 + $0xc] sm:$0xf]  ;;  %v404_v54 = vpop.permute.xlu1 %403 }
  0x90   : > { %v278_v25 = vsel %vm1048_vm3, %v273_v24, 0  ;;  %v462_v26 = vld [vmem:[#allocation2 + $0x4] sm:$0xf]  ;;  %v346_v35 = vld [vmem:[#allocation2 + $0xc] sm:$0xf]  ;;  %v351_v37 = vsel %vm350_vm8, %v343_v34, 0 }
  0x91   : > { %283 = vst.msk [vmem:[#allocation3 + $0x4] sm:$0xf] %vm281_vm7, %v278_v25  ;;  %v287_v33 = vld [vmem:[#allocation2 + $0x4] sm:$0xf]  ;;  %v354_v38 = vsel %vm350_vm8, %v346_v35, 0  ;;  %vm318_vm10 = vcmp.ne.s16.totalorder %v317_v41, 0  ;;  %v490_v4 = vpop.permute.xlu0 %489 }
  0x92   : > { %v344_v39 = vld [vmem:[#allocation2 + $0x4] sm:$0xf]  ;;  %v432_v40 = vld [vmem:[#allocation2 + $0x8] sm:$0xf]  ;;  %v433_v44 = vld [vmem:[#allocation2 + $0xc] sm:$0xf] }
  0x93   : > { %298 = vrot.lane.b32.xlu1 %v288_v27, %s996_s5  ;;  %471 = vrot.lane.b32.xlu0 %v462_v26, %s995_s30  ;;  %v352_v42 = vsel %vm350_vm8, %v344_v39, 0  ;;  %v439_v43 = vsel %vm436_vm9, %v432_v40, 0  ;;  %v312_v45 = vld [vmem:[#allocation2 + $0x8] sm:$0xf]  ;;  %v440_v46 = vsel %vm436_vm9, %v433_v44, 0  ;;  %vm405_vm11 = vcmp.ne.s16.totalorder %v404_v54, 0 }
  0x94   : > { %v321_v47 = vsel %vm318_vm10, %v312_v45, 0  ;;  %v313_v48 = vld [vmem:[#allocation2 + $0xc] sm:$0xf]  ;;  %v430_v49 = vld [vmem:[#allocation2] sm:$0xf]  ;;  %vm491_vm12 = vcmp.ne.s16.totalorder %v490_v4, 0 }
  0x95   : > { %v322_v50 = vsel %vm318_vm10, %v313_v48, 0  ;;  %v437_v51 = vsel %vm436_vm9, %v430_v49, 0  ;;  %v431_v52 = vld [vmem:[#allocation2 + $0x4] sm:$0xf]  ;;  %v310_v53 = vld [vmem:[#allocation2] sm:$0xf] }
  0x96   : > { %v438_v55 = vsel %vm436_vm9, %v431_v52, 0  ;;  %v319_v56 = vsel %vm318_vm10, %v310_v53, 0  ;;  %v311_v57 = vld [vmem:[#allocation2 + $0x4] sm:$0xf]  ;;  %v401_v58 = vld [vmem:[#allocation2 + $0x8] sm:$0xf] }
  0x97   : > { %294 = vrot.lane.b32.xlu1 %v286_v29, %s996_s5  ;;  %300 = vrot.lane.b32.xlu0 %v289_v30, %s996_s5  ;;  %v320_v59 = vsel %vm318_vm10, %v311_v57, 0  ;;  %v408_v60 = vsel %vm405_vm11, %v401_v58, 0  ;;  %v402_v61 = vld [vmem:[#allocation2 + $0xc] sm:$0xf]  ;;  %v399_v62 = vld [vmem:[#allocation2] sm:$0xf] }
  0x98   : > { %v409_v63 = vsel %vm405_vm11, %v402_v61, 0  ;;  %v406_v0 = vsel %vm405_vm11, %v399_v62, 0  ;;  %v400_v1 = vld [vmem:[#allocation2 + $0x4] sm:$0xf]  ;;  %v377_v3 = vld [vmem:[#allocation2 + $0x8] sm:$0xf] }
  0x99   : > { %v407_v2 = vsel %vm405_vm11, %v400_v1, 0  ;;  %v378_v5 = vld [vmem:[#allocation2 + $0xc] sm:$0xf]  ;;  %v375_v6 = vld [vmem:[#allocation2] sm:$0xf] }
  0x9a   : > { %v487_v8 = vld [vmem:[#allocation2 + $0x8] sm:$0xf]  ;;  %v376_v10 = vld [vmem:[#allocation2 + $0x4] sm:$0xf]  ;;  %v488_v12 = vld [vmem:[#allocation2 + $0xc] sm:$0xf] }
  0x9b   : > { %363 = vrot.lane.b32.xlu1 %v353_v32, %s997_s6  ;;  %296 = vrot.lane.b32.xlu0 %v287_v33, %s996_s5  ;;  %v494_v11 = vsel %vm491_vm12, %v487_v8, 0  ;;  %v485_v13 = vld [vmem:[#allocation2] sm:$0xf]  ;;  %v495_v14 = vsel %vm491_vm12, %v488_v12, 0  ;;  %v486_v16 = vld [vmem:[#allocation2 + $0x4] sm:$0xf] }
  0x9c   : > { %v492_v15 = vsel %vm491_vm12, %v485_v13, 0  ;;  %v493_v17 = vsel %vm491_vm12, %v486_v16, 0  ;;  %v556_v18 = vld [vmem:[%s1148_s3] sm:$0xff]  ;;  %v557_v19 = vld [vmem:[%s1148_s3 + $0x8] sm:$0xff] }
  0x9d   : > { %v974_v4 = vld [vmem:[%s1147_s2] ss:$12 sps:$4 sm:$0xff]  }
  0x9f   : > { %359 = vrot.lane.b32.xlu1 %v351_v37, %s997_s6  ;;  %365 = vrot.lane.b32.xlu0 %v354_v38, %s997_s6 }
  0xa3   : > { %361 = vrot.lane.b32.xlu0 %v352_v42, %s997_s6  ;;  %449 = vrot.lane.b32.xlu1 %v439_v43, %s998_s7 }
  0xa7   : > { %451 = vrot.lane.b32.xlu0 %v440_v46, %s998_s7  ;;  %331 = vrot.lane.b32.xlu1 %v321_v47, %s999_s8 }
  0xab   : > { %333 = vrot.lane.b32.xlu0 %v322_v50, %s999_s8  ;;  %445 = vrot.lane.b32.xlu1 %v437_v51, %s998_s7 }
  0xaf   : > { %447 = vrot.lane.b32.xlu0 %v438_v55, %s998_s7  ;;  %327 = vrot.lane.b32.xlu1 %v319_v56, %s999_s8 }
  0xb3   : > { %329 = vrot.lane.b32.xlu0 %v320_v59, %s999_s8  ;;  %418 = vrot.lane.b32.xlu1 %v408_v60, %s1000_s9 }
  0xb7   : > { %420 = vrot.lane.b32.xlu0 %v409_v63, %s1000_s9  ;;  %414 = vrot.lane.b32.xlu1 %v406_v0, %s1000_s9  ;;  %v971_v0 = vld [vmem:[#allocation3 + $0x8] sm:$0xff]  }
  0xbb   : > { %416 = vrot.lane.b32.xlu0 %v407_v2, %s1000_s9  ;;  %387 = vrot.lane.b32.xlu1 %v377_v3, %s1001_s10  ;;  %v973_v3 = vld [vmem:[#allocation3] sm:$0xff]  }
  0xbf   : > { %389 = vrot.lane.b32.xlu0 %v378_v5, %s1001_s10  ;;  %383 = vrot.lane.b32.xlu1 %v375_v6, %s1001_s10 }
  0xc3   : > { %385 = vrot.lane.b32.xlu0 %v376_v10, %s1001_s10  ;;  %504 = vrot.lane.b32.xlu1 %v494_v11, %s1003_s13 }
  0xc7   : > { %506 = vrot.lane.b32.xlu0 %v495_v14, %s1003_s13  ;;  %500 = vrot.lane.b32.xlu1 %v492_v15, %s1003_s13 }
  0xcb   : > { %502 = vrot.lane.b32.xlu0 %v493_v17, %s1003_s13  ;;  %560 = vperm.xlu1 %956, %v556_v18  }
  0xcf   : > { %565 = vperm.xlu0 %957, %v557_v19  }
  0xfd   : > { %v474_v20 = vpop.permute.xlu1 %473 }
  0xfe   : > { %483 = vst.msk [vmem:[#allocation3 + $0x78] sm:$0xf] %vm281_vm7, %v474_v20 }
 0x101   : > { %v476_v21 = vpop.permute.xlu0 %475  ;;  %v470_v22 = vpop.permute.xlu1 %469 }
 0x102   : > { %484 = vst.msk [vmem:[#allocation3 + $0x7c] sm:$0xf] %vm281_vm7, %v476_v21  ;;  %481 = vst.msk [vmem:[#allocation3 + $0x70] sm:$0xf] %vm281_vm7, %v470_v22 }
 0x105   : > { %v472_v23 = vpop.permute.xlu0 %471  ;;  %v299_v24 = vpop.permute.xlu1 %298 }
 0x106   : > { %482 = vst.msk [vmem:[#allocation3 + $0x74] sm:$0xf] %vm281_vm7, %v472_v23  ;;  %308 = vst.msk [vmem:[#allocation3 + $0x18] sm:$0xf] %vm281_vm7, %v299_v24 }
 0x109   : > { %v301_v25 = vpop.permute.xlu0 %300  ;;  %v295_v26 = vpop.permute.xlu1 %294  ;;  %v958_v27 = vld [vmem:[#allocation3 + $0x78] sm:$0xff]  }
 0x10a   : > { %309 = vst.msk [vmem:[#allocation3 + $0x1c] sm:$0xf] %vm281_vm7, %v301_v25  ;;  %306 = vst.msk [vmem:[#allocation3 + $0x10] sm:$0xf] %vm281_vm7, %v295_v26  ;;  %898 = vmatprep.subr.bf16.mxu0 %v958_v27 }
 0x10d   : > { %v297_v28 = vpop.permute.xlu0 %296  ;;  %v364_v29 = vpop.permute.xlu1 %363  ;;  %v960_v37 = vld [vmem:[#allocation3 + $0x70] sm:$0xff]  }
 0x10e   : > { %307 = vst.msk [vmem:[#allocation3 + $0x14] sm:$0xf] %vm281_vm7, %v297_v28  ;;  %373 = vst.msk [vmem:[#allocation3 + $0x38] sm:$0xf] %vm281_vm7, %v364_v29 }
 0x111   : > { %v366_v30 = vpop.permute.xlu0 %365  ;;  %v360_v31 = vpop.permute.xlu1 %359  ;;  %v967_v56 = vld [vmem:[#allocation3 + $0x18] sm:$0xff]  }
 0x112   : > { %374 = vst.msk [vmem:[#allocation3 + $0x3c] sm:$0xf] %vm281_vm7, %v366_v30  ;;  %371 = vst.msk [vmem:[#allocation3 + $0x30] sm:$0xf] %vm281_vm7, %v360_v31 }
 0x115   : > { %v362_v32 = vpop.permute.xlu0 %361  ;;  %v450_v33 = vpop.permute.xlu1 %449  ;;  %v969_v60 = vld [vmem:[#allocation3 + $0x10] sm:$0xff]  }
 0x116   : > { %372 = vst.msk [vmem:[#allocation3 + $0x34] sm:$0xf] %vm281_vm7, %v362_v32  ;;  %459 = vst.msk [vmem:[#allocation3 + $0x68] sm:$0xf] %vm281_vm7, %v450_v33 }
 0x119   : > { %v452_v34 = vpop.permute.xlu0 %451  ;;  %v332_v35 = vpop.permute.xlu1 %331  ;;  %v959_v36 = vld [vmem:[#allocation3 + $0x38] sm:$0xff]  }
 0x11a   : > { %460 = vst.msk [vmem:[#allocation3 + $0x6c] sm:$0xf] %vm281_vm7, %v452_v34  ;;  %341 = vst.msk [vmem:[#allocation3 + $0x28] sm:$0xf] %vm281_vm7, %v332_v35  ;;  %899 = vmatpush3.bf16.msra.mxu0 %v959_v36 }
 0x11b   : > { %900 = vmatprep.subr.bf16.mxu0 %v960_v37 }
 0x11d   : > { %v334_v38 = vpop.permute.xlu0 %333  ;;  %v446_v39 = vpop.permute.xlu1 %445  ;;  %v961_v40 = vld [vmem:[#allocation3 + $0x30] sm:$0xff]  }
 0x11e   : > { %342 = vst.msk [vmem:[#allocation3 + $0x2c] sm:$0xf] %vm281_vm7, %v334_v38  ;;  %457 = vst.msk [vmem:[#allocation3 + $0x60] sm:$0xf] %vm281_vm7, %v446_v39  ;;  %901 = vmatpush3.bf16.msra.mxu0 %v961_v40 }
 0x121   : > { %v448_v41 = vpop.permute.xlu0 %447  ;;  %v328_v42 = vpop.permute.xlu1 %327  ;;  %v962_v43 = vld [vmem:[#allocation3 + $0x68] sm:$0xff]  }
 0x122   : > { %458 = vst.msk [vmem:[#allocation3 + $0x64] sm:$0xf] %vm281_vm7, %v448_v41  ;;  %339 = vst.msk [vmem:[#allocation3 + $0x20] sm:$0xf] %vm281_vm7, %v328_v42  ;;  %902 = vmatprep.subr.bf16.mxu0 %v962_v43 }
 0x125   : > { %v330_v44 = vpop.permute.xlu0 %329  ;;  %v419_v45 = vpop.permute.xlu1 %418  ;;  %v963_v46 = vld [vmem:[#allocation3 + $0x28] sm:$0xff]  }
 0x126   : > { %340 = vst.msk [vmem:[#allocation3 + $0x24] sm:$0xf] %vm281_vm7, %v330_v44  ;;  %428 = vst.msk [vmem:[#allocation3 + $0x58] sm:$0xf] %vm281_vm7, %v419_v45  ;;  %903 = vmatpush3.bf16.msra.mxu0 %v963_v46 }
 0x129   : > { %v421_v47 = vpop.permute.xlu0 %420  ;;  %v415_v48 = vpop.permute.xlu1 %414  ;;  %v964_v49 = vld [vmem:[#allocation3 + $0x60] sm:$0xff]  }
 0x12a   : > { %429 = vst.msk [vmem:[#allocation3 + $0x5c] sm:$0xf] %vm281_vm7, %v421_v47  ;;  %426 = vst.msk [vmem:[#allocation3 + $0x50] sm:$0xf] %vm281_vm7, %v415_v48  ;;  %904 = vmatprep.subr.bf16.mxu0 %v964_v49 }
 0x12d   : > { %v417_v50 = vpop.permute.xlu0 %416  ;;  %v388_v51 = vpop.permute.xlu1 %387  ;;  %v965_v52 = vld [vmem:[#allocation3 + $0x20] sm:$0xff]  }
 0x12e   : > { %427 = vst.msk [vmem:[#allocation3 + $0x54] sm:$0xf] %vm281_vm7, %v417_v50  ;;  %397 = vst.msk [vmem:[#allocation3 + $0x48] sm:$0xf] %vm281_vm7, %v388_v51  ;;  %905 = vmatpush3.bf16.msra.mxu0 %v965_v52 }
 0x131   : > { %v390_v53 = vpop.permute.xlu0 %389  ;;  %v384_v54 = vpop.permute.xlu1 %383  ;;  %v966_v55 = vld [vmem:[#allocation3 + $0x58] sm:$0xff]  }
 0x132   : > { %398 = vst.msk [vmem:[#allocation3 + $0x4c] sm:$0xf] %vm281_vm7, %v390_v53  ;;  %395 = vst.msk [vmem:[#allocation3 + $0x40] sm:$0xf] %vm281_vm7, %v384_v54  ;;  %906 = vmatprep.subr.bf16.mxu0 %v966_v55 }
 0x133   : > { %907 = vmatpush3.bf16.msra.mxu0 %v967_v56 }
 0x135   : > { %v386_v57 = vpop.permute.xlu0 %385  ;;  %v505_v58 = vpop.permute.xlu1 %504  ;;  %v968_v59 = vld [vmem:[#allocation3 + $0x50] sm:$0xff]  }
 0x136   : > { %396 = vst.msk [vmem:[#allocation3 + $0x44] sm:$0xf] %vm281_vm7, %v386_v57  ;;  %514 = vst.msk [vmem:[#allocation3 + $0x88] sm:$0xf] %vm281_vm7, %v505_v58  ;;  %908 = vmatprep.subr.bf16.mxu0 %v968_v59 }
 0x137   : > { %909 = vmatpush3.bf16.msra.mxu0 %v969_v60 }
 0x139   : > { %v507_v61 = vpop.permute.xlu0 %506  ;;  %v501_v62 = vpop.permute.xlu1 %500  ;;  %v970_v63 = vld [vmem:[#allocation3 + $0x48] sm:$0xff]  }
 0x13a   : > { %515 = vst.msk [vmem:[#allocation3 + $0x8c] sm:$0xf] %vm281_vm7, %v507_v61  ;;  %512 = vst.msk [vmem:[#allocation3 + $0x80] sm:$0xf] %vm281_vm7, %v501_v62  ;;  %910 = vmatprep.subr.bf16.mxu0 %v970_v63 }
 0x13b   : > { %911 = vmatpush3.bf16.msra.mxu0 %v971_v0 }
 0x13d   : > { %v503_v1 = vpop.permute.xlu0 %502  ;;  %v972_v2 = vld [vmem:[#allocation3 + $0x40] sm:$0xff]  }
 0x13e   : > { %513 = vst.msk [vmem:[#allocation3 + $0x84] sm:$0xf] %vm281_vm7, %v503_v1  ;;  %912 = vmatprep.subr.bf16.mxu0 %v972_v2 }
 0x13f   : > { %913 = vmatpush3.bf16.msra.mxu0 %v973_v3 }
 0x141   : > { %v977_v5 = vld [vmem:[#allocation3 + $0x88] sm:$0xff]  }
 0x142   : > { %728 = vmatmul.mubr.bf16.vlgmr.msra.gmra.mxu0 %v974_v4  ;;  %924 = vmatpush3.bf16.msra.mxu1 %v977_v5 }
 0x143   : > { %925 = vmatprep.subr.bf16.mxu1 %v1002_v9 }
 0x145   : > { %v978_v6 = vld [vmem:[#allocation3 + $0x80] sm:$0xff]  }
 0x146   : > { %926 = vmatpush3.bf16.msra.mxu1 %v978_v6  ;;  %v561_v11 = vpop.permute.xlu1 %560 }
 0x149   : > { %928 = vmatmul.mubr.msk.bf16.vlgmr.msra.gmra.mxu1 %vm691_vm14, %v979_v7 }
 0x14a   : > { %v566_v16 = vpop.permute.xlu0 %565 }
 0x202   : > { %v914_v8 = vpop.f32.mrf.mxu0 }
 0x204   : > { %v915_v10 = vpop.f32.mrf.mxu0 }
 0x205   : > { %v916_v12 = vadd.f32 %v915_v10, %v914_v8 }
 0x206   : > { %v917_v13 = vpop.f32.mrf.mxu0 }
 0x207   : > { %v730_v14 = vadd.f32 %v916_v12, %v561_v11 }
 0x208   : > { %v918_v15 = vpop.f32.mrf.mxu0 }
 0x209   : > { %v919_v17 = vadd.f32 %v918_v15, %v917_v13  ;;  %v770_v18 = vpop.f32.mrf.mxu1 }
 0x20a   : > { %v771_v9 = vadd.f32 %v770_v18, %v730_v14 }
 0x20b   : > { %v733_v19 = vadd.f32 %v919_v17, %v566_v16  ;;  %v929_v20 = vpop.f32.mrf.mxu1 }
 0x20c   : > { %v777_v21 = vmax.f32 %v771_v9, 0.0 }
 0x20d   : > { %v773_v22 = vpop.f32.mrf.mxu1 }
 0x20e   : > { %v896_v23 = vpack.c.bf16 %v777_v21, %v777_v21  ;;  %v774_v24 = vadd.f32 %v773_v22, %v733_v19 }
 0x20f   : > { %v930_v25 = vpop.f32.mrf.mxu1 }
 0x210   : > { %787 = vst.msk [vmem:[%s217_s26] sm:$0xf] %vm281_vm7, %v896_v23  ;;  %v778_v26 = vmax.f32 %v774_v24, 0.0 }
 0x212   : > { %v897_v27 = vpack.c.bf16 %v778_v26, %v778_v26 }
 0x214   : > { %788 = vst.msk [vmem:[%s217_s26 + $0x4] sm:$0xf] %vm281_vm7, %v897_v27 }
 0x215 PF: > { %s14_s15 = sadd.s32 1, %s986_s15  }
 0x216   : > { %p11_p4 = scmp.ge.s32.totalorder %s14_s15, 4  }
 0x218   :  { %13 = sbr.rel (!%p11_p4) target bundleno = 1 (0x1), region = 69 }

// kernel: rsu_forward.15
= control target key start
LH: loop header
LB: loop body
LE: loop exit
PB: predicated region body
PF: predicated region fallthrough
CT: control target
= control target key end

     0   :  { %s1413_s15 = smov 0   ;;  %s1811_s0 = inlined_call_operand.vmem [shape: bf16[2,16,256], index: 0, kind: input, shape index: {}]   ;;  %s1812_s1 = inlined_call_operand.vmem [shape: bf16[2,16,256], index: 1, kind: input, shape index: {}]   ;;  %s1813_s2 = inlined_call_operand.vmem [shape: bf16[16,288], index: 2, kind: input, shape index: {}]   ;;  %s1814_s3 = inlined_call_operand.vmem [shape: f32[16,1], index: 3, kind: input, shape index: {}]   ;;  %s1815_s4 = inlined_call_operand.vmem [shape: bf16[2,16,256], index: 4, kind: output, shape index: {}]  }
   0x1 LB: > { %s1276_s16 = sadd.s32 4294967295, %s1371_s15   ;;  %p1280_p0 = scmp.ge.s32.totalorder %s1371_s15, 1  ;;  %s1371_s15 = sphi %s1413_s15, %s14_s15  }
   0x2   : > { %p172_p1 = scmp.lt.s32.totalorder %s1371_s15, 3 }
   0x4   : > { %p173_p2 = pnand %p1280_p0, %p172_p1 }
   0x5   : > { %p1421_p3 = scmp.lt.s32.totalorder (!%p173_p2), %s1276_s16, 1  ;;  %s1374_s25 = smov (!%p173_p2), 17  }
   0x6   : > { %176 = sbr.rel (%p173_p2) target bundleno = 596 (0x254), region = 36  ;;  %s1375_s26 = smov (!%p173_p2), 16  }
   0x7   : > { %s1376_s27 = smov (!%p173_p2), 2   ;;  %s1377_s28 = smov (!%p173_p2), 32  }
   0x8   : > { %s1378_s29 = smov (!%p173_p2), 18   ;;  %s1379_s30 = smov (!%p173_p2), 34  }
   0x9   : > { %s1380_s5 = smov (!%p173_p2), 127   ;;  %s1381_s6 = smov (!%p173_p2), 95  }
   0xa   : > { %s1382_s7 = smov (!%p173_p2), 111   ;;  %s1383_s8 = smov (!%p173_p2), 112  }
   0xb   : > { %v275_v0 = vlaneseq  ;;  %vm221_vm0 = vcmask 134144   ;;  %vm226_vm1 = vcmask 273544   ;;  %v1373_v1 = vmov 0   ;;  %s1832_s16 = smov (!%p1421_p3, %s1276_s16), 1  ;;  %s1384_s9 = smov 126  }
   0xc   : > { %224 = vst.msk [vmem:[#allocation2 + $0x18] sm:$0xf] %vm221_vm0, %v1373_v1  ;;  %222 = vst.msk [vmem:[#allocation2] sm:$0xf] %vm221_vm0, %v1373_v1  ;;  %1180 = vmatprep.mubr.bf16.mxu1 %v1373_v1  ;;  %1359 = vset.pattern.permute.xlu1 %v1373_v1  ;;  %s1431_s18 = sshll.u32 %s1832_s16, 4  ;;  %vm248_vm8 = vcmask 1043592  }
   0xd   : > { %229 = vst.msk [vmem:[#allocation2 + $0x20] sm:$0xf] %vm226_vm1, %v1373_v1  ;;  %227 = vst.msk [vmem:[#allocation2 + $0x8] sm:$0xf] %vm226_vm1, %v1373_v1  ;;  %v276_v2 = vand.u32 127, %v275_v0  ;;  %1360 = vset.pattern.permute.xlu0 %v1373_v1  ;;  %s212_s21 = scalar_lea.vmem %s1812_s1, %s1431_s18  ;;  %s207_s24 = scalar_lea.vmem %s1811_s0, %s1431_s18  ;;  %vm249_vm9 = vcmask 1047556  }
   0xe   : > { %223 = vst.msk [vmem:[#allocation2 + $0xc] sm:$0xf] %vm221_vm0, %v1373_v1  ;;  %225 = vst.msk [vmem:[#allocation2 + $0x24] sm:$0xf] %vm221_vm0, %v1373_v1  ;;  %v255_v5 = vld [vmem:[%s212_s21] sm:$0xff]  ;;  %v256_v8 = vld [vmem:[%s212_s21 + $0x8] sm:$0xff] }
   0xf   : > { %228 = vst.msk [vmem:[#allocation2 + $0x14] sm:$0xf] %vm226_vm1, %v1373_v1  ;;  %230 = vst.msk [vmem:[#allocation2 + $0x2c] sm:$0xf] %vm226_vm1, %v1373_v1  ;;  %v277_v3 = vadd.s32 128, %v276_v2  ;;  %v282_v4 = vand.u32 15, %v276_v2  ;;  %259 = vrot.lane.b32.xlu0 %v255_v5, %s1374_s25 }
  0x10   : > { %v231_v6 = vld [vmem:[%s207_s24] sm:$0xff]  ;;  %v232_v9 = vld [vmem:[%s207_s24 + $0x8] sm:$0xff]  ;;  %vm241_vm10 = vcmask 138240   ;;  %vm1447_vm11 = vmor %vm249_vm9, %vm248_vm8  ;;  %vm463_vm12 = vcmask 130048   ;;  %vm390_vm15 = vcmask 15360   ;;  %s1385_s10 = smov 96  }
  0x11   : > { %v289_v7 = vand.u32 15, %v277_v3  ;;  %vm302_vm2 = vcmp.ge.s32.totalorder %v282_v4, 1  ;;  %235 = vrot.lane.b32.xlu1 %v231_v6, %s1374_s25  ;;  %vm304_vm3 = vcmp.lt.s32.totalorder %v282_v4, 15  ;;  %s1386_s11 = smov 110   ;;  %vm793_vm9 = vcmask 277504   ;;  %s1387_s12 = smov 94  }
  0x13   : > { %vm303_vm4 = vcmp.ge.s32.totalorder %v289_v7, 1  ;;  %vm305_vm5 = vcmp.lt.s32.totalorder %v289_v7, 15  ;;  %261 = vrot.lane.b32.xlu0 %v256_v8, %s1374_s25 }
  0x14   : > { %vm1441_vm6 = vmpackc.low %vm303_vm4, %vm302_vm2  ;;  %vm664_vm2 = vcmask 261120  }
  0x15   : > { %vm385_vm7 = vmpackc.low %vm305_vm5, %vm304_vm3  ;;  %237 = vrot.lane.b32.xlu1 %v232_v9, %s1374_s25  ;;  %v459_v11 = vsel %vm1441_vm6, 65537, %v1373_v1  ;;  %vm592_vm5 = vcmask 146432  }
  0x16   : > { %v386_v12 = vsel %vm385_vm7, 65537, %v1373_v1 }
  0x17   : > { %460 = vrot.lane.b32.xlu0 %v459_v11, %s1375_s26 }
  0x19   : > { %387 = vrot.lane.b32.xlu1 %v386_v12, %s1376_s27  ;;  %s217_s27 = scalar_lea.vmem %s1815_s4, %s1431_s18 }
  0x1b   : > { %661 = vrot.lane.b32.xlu0 %v459_v11, %s1377_s28 }
  0x1d   : > { %589 = vrot.lane.b32.xlu1 %v386_v12, %s1378_s29 }
  0x1f   : > { %790 = vrot.lane.b32.xlu0 %v386_v12, %s1379_s30 }
  0x81   : > { %v260_v13 = vpop.permute.xlu0 %259 }
  0x82   : > { %v263_v16 = vrot.slane %v260_v13, 4 }
  0x83   : > { %v236_v14 = vpop.permute.xlu1 %235 }
  0x84   : > { %v239_v17 = vrot.slane %v236_v14, 4  ;;  %v265_v18 = vsel %vm241_vm10, %v263_v16, %v260_v13  ;;  %272 = vst.msk [vmem:[#allocation2 + $0x20] sm:$0xf] %vm221_vm0, %v263_v16 }
  0x85   : > { %271 = vst.msk [vmem:[#allocation2 + $0x18] sm:$0xff] %vm1447_vm11, %v265_v18  ;;  %v262_v20 = vpop.permute.xlu0 %261 }
  0x86   : > { %v242_v19 = vsel %vm241_vm10, %v239_v17, %v236_v14  ;;  %252 = vst.msk [vmem:[#allocation2 + $0x8] sm:$0xf] %vm221_vm0, %v239_v17  ;;  %v264_v22 = vrot.slane %v262_v20, 4 }
  0x87   : > { %251 = vst.msk [vmem:[#allocation2] sm:$0xff] %vm1447_vm11, %v242_v19  ;;  %v238_v21 = vpop.permute.xlu1 %237 }
  0x88   : > { %v240_v23 = vrot.slane %v238_v21, 4  ;;  %v266_v24 = vsel %vm241_vm10, %v264_v22, %v262_v20  ;;  %274 = vst.msk [vmem:[#allocation2 + $0x2c] sm:$0xf] %vm221_vm0, %v264_v22 }
  0x89   : > { %273 = vst.msk [vmem:[#allocation2 + $0x24] sm:$0xff] %vm1447_vm11, %v266_v24  ;;  %v461_v42 = vpop.permute.xlu0 %460 }
  0x8a   : > { %v243_v25 = vsel %vm241_vm10, %v240_v23, %v238_v21  ;;  %254 = vst.msk [vmem:[#allocation2 + $0x14] sm:$0xf] %vm221_vm0, %v240_v23  ;;  %v462_v44 = vrot.slane %v461_v42, 4 }
  0x8b   : > { %253 = vst.msk [vmem:[#allocation2 + $0xc] sm:$0xff] %vm1447_vm11, %v243_v25  ;;  %v324_v26 = vld [vmem:[#allocation2 + $0x20] sm:$0xf]  ;;  %v388_v53 = vpop.permute.xlu1 %387 }
  0x8c   : > { %345 = vrot.lane.b32.xlu0 %v324_v26, %s1380_s5  ;;  %v1467_v27 = vld [vmem:[#allocation2 + $0x18] sm:$0xff]  ;;  %v730_v34 = vld [vmem:[#allocation2 + $0x20] sm:$0xf]  ;;  %v464_v46 = vsel %vm463_vm12, %v462_v44, %v461_v42  ;;  %vm1503_vm13 = vcmp.ne.s16.totalorder %v462_v44, 0  ;;  %v389_v57 = vrot.slane %v388_v53, 4  ;;  %vm359_vm12 = vcmask 1043456  }
  0x8d   : > { %343 = vrot.lane.b32.xlu1 %v1467_v27, %s1380_s5  ;;  %v320_v30 = vld [vmem:[#allocation2 + $0x8] sm:$0xf]  ;;  %v1483_v36 = vsel %vm1441_vm6, %v1467_v27, 0  ;;  %v529_v43 = vld [vmem:[#allocation2 + $0x20] sm:$0xf]  ;;  %vm465_vm14 = vcmp.ne.s16.totalorder %v464_v46, 0  ;;  %v662_v8 = vpop.permute.xlu0 %661 }
  0x8e   : > { %v1473_v31 = vld [vmem:[#allocation2] sm:$0xff]  ;;  %v726_v40 = vld [vmem:[#allocation2 + $0x8] sm:$0xf]  ;;  %v471_v51 = vsel %vm465_vm14, %v1467_v27, 0  ;;  %v391_v61 = vsel %vm390_vm15, %v389_v57, %v388_v53  ;;  %vm1524_vm0 = vcmp.ne.s16.totalorder %v389_v57, 0  ;;  %v663_v11 = vrot.slane %v662_v8, 4 }
  0x8f   : > { %v326_v28 = vld [vmem:[#allocation2 + $0x2c] sm:$0xf]  ;;  %v525_v47 = vld [vmem:[#allocation2 + $0x8] sm:$0xf]  ;;  %v456_v49 = vld [vmem:[#allocation2 + $0x20] sm:$0xf]  ;;  %v590_v24 = vpop.permute.xlu1 %589 }
  0x90   : > { %349 = vrot.lane.b32.xlu0 %v326_v28, %s1380_s5  ;;  %v1470_v29 = vld [vmem:[#allocation2 + $0x24] sm:$0xff]  ;;  %v732_v35 = vld [vmem:[#allocation2 + $0x2c] sm:$0xf]  ;;  %v472_v50 = vsel %vm1503_vm13, %v456_v49, 0  ;;  %v467_v59 = vsel %vm465_vm14, %v1473_v31, 0  ;;  %vm392_vm1 = vcmp.ne.s16.totalorder %v391_v61, 0  ;;  %v665_v17 = vsel %vm664_vm2, %v663_v11, %v662_v8 }
  0x91   : > { %347 = vrot.lane.b32.xlu1 %v1470_v29, %s1380_s5  ;;  %v322_v32 = vld [vmem:[#allocation2 + $0x14] sm:$0xf]  ;;  %v1488_v37 = vsel %vm1441_vm6, %v1470_v29, 0  ;;  %v531_v45 = vld [vmem:[#allocation2 + $0x2c] sm:$0xf]  ;;  %v473_v55 = vsel %vm465_vm14, %v1470_v29, 0  ;;  %v791_v48 = vpop.permute.xlu0 %790 }
  0x92   : > { %v1476_v33 = vld [vmem:[#allocation2 + $0xc] sm:$0xff]  ;;  %v1293_v38 = vcombine.high %v1483_v36, %v1488_v37  ;;  %v1292_v39 = vcombine.low %v1483_v36, %v1488_v37  ;;  %v728_v41 = vld [vmem:[#allocation2 + $0x14] sm:$0xf]  ;;  %v452_v56 = vld [vmem:[#allocation2 + $0x8] sm:$0xf]  ;;  %v398_v3 = vsel %vm392_vm1, %v1467_v27, 0 }
  0x93   : > { %v458_v52 = vld [vmem:[#allocation2 + $0x2c] sm:$0xf]  ;;  %v468_v58 = vsel %vm1503_vm13, %v452_v56, 0  ;;  %v454_v60 = vld [vmem:[#allocation2 + $0x14] sm:$0xf]  ;;  %v469_v0 = vsel %vm465_vm14, %v1476_v33, 0 }
  0x94   : > { %337 = vrot.lane.b32.xlu0 %v320_v30, %s1380_s5  ;;  %v474_v54 = vsel %vm1503_vm13, %v458_v52, 0  ;;  %v470_v62 = vsel %vm1503_vm13, %v454_v60, 0  ;;  %v382_v1 = vld [vmem:[#allocation2 + $0x20] sm:$0xf]  ;;  %v384_v4 = vld [vmem:[#allocation2 + $0x2c] sm:$0xf] }
  0x95   : > { %335 = vrot.lane.b32.xlu1 %v1473_v31, %s1380_s5  ;;  %v399_v2 = vsel %vm1524_vm0, %v382_v1, 0  ;;  %v401_v5 = vsel %vm1524_vm0, %v384_v4, 0  ;;  %v400_v6 = vsel %vm392_vm1, %v1470_v29, 0  ;;  %v378_v7 = vld [vmem:[#allocation2 + $0x8] sm:$0xf]  ;;  %v394_v12 = vsel %vm392_vm1, %v1473_v31, 0 }
  0x96   : > { %v395_v9 = vsel %vm1524_vm0, %v378_v7, 0  ;;  %v380_v13 = vld [vmem:[#allocation2 + $0x14] sm:$0xf]  ;;  %vm1544_vm3 = vcmp.ne.s16.totalorder %v663_v11, 0  ;;  %v396_v16 = vsel %vm392_vm1, %v1476_v33, 0  ;;  %vm666_vm4 = vcmp.ne.s16.totalorder %v665_v17, 0 }
  0x97   : > { %v397_v14 = vsel %vm1524_vm0, %v380_v13, 0  ;;  %v658_v18 = vld [vmem:[#allocation2 + $0x20] sm:$0xf]  ;;  %v660_v20 = vld [vmem:[#allocation2 + $0x2c] sm:$0xf]  ;;  %v672_v22 = vsel %vm666_vm4, %v1467_v27, 0 }
  0x98   : > { %341 = vrot.lane.b32.xlu0 %v322_v32, %s1380_s5  ;;  %v673_v19 = vsel %vm1544_vm3, %v658_v18, 0  ;;  %v675_v21 = vsel %vm1544_vm3, %v660_v20, 0  ;;  %v654_v23 = vld [vmem:[#allocation2 + $0x8] sm:$0xf]  ;;  %v591_v26 = vrot.slane %v590_v24, 4  ;;  %v674_v28 = vsel %vm666_vm4, %v1470_v29, 0 }
  0x99   : > { %339 = vrot.lane.b32.xlu1 %v1476_v33, %s1380_s5  ;;  %v669_v25 = vsel %vm1544_vm3, %v654_v23, 0  ;;  %v656_v30 = vld [vmem:[#allocation2 + $0x14] sm:$0xf]  ;;  %v588_v44 = vld [vmem:[#allocation2 + $0x2c] sm:$0xf]  ;;  %vm361_vm13 = vcmask 1039360  }
  0x9a   : > { %v671_v32 = vsel %vm1544_vm3, %v656_v30, 0  ;;  %vm1570_vm7 = vcmp.ne.s16.totalorder %v591_v26, 0  ;;  %v584_v52 = vld [vmem:[#allocation2 + $0x14] sm:$0xf]  ;;  %v787_v57 = vld [vmem:[#allocation2 + $0x20] sm:$0xf] }
  0x9b   : > { %v599_v53 = vsel %vm1570_vm7, %v584_v52, 0  ;;  %v789_v60 = vld [vmem:[#allocation2 + $0x2c] sm:$0xf]  ;;  %v894_v30 = vld [vmem:[%s1814_s3] sm:$0xff]  ;;  %vm766_vm14 = vcmask 777216   ;;  %vm565_vm15 = vcmask 908288  }
  0x9c   : > { %751 = vrot.lane.b32.xlu0 %v730_v34, %s1381_s6  ;;  %vm508_vm0 = vcmask 916480   ;;  %vm435_vm1 = vcmask 1031168   ;;  %vm637_vm3 = vcmask 900096  }
  0x9d   : > { %749 = vrot.lane.b32.xlu1 %v1467_v27, %s1381_s6 }
  0xa0   : > { %755 = vrot.lane.b32.xlu0 %v732_v35, %s1381_s6  ;;  %v668_v35 = vsel %vm666_vm4, %v1473_v31, 0 }
  0xa1   : > { %753 = vrot.lane.b32.xlu1 %v1470_v29, %s1381_s6 }
  0xa4   : > { %743 = vrot.lane.b32.xlu0 %v726_v40, %s1381_s6  ;;  %v593_v40 = vsel %vm592_vm5, %v591_v26, %v590_v24 }
  0xa5   : > { %741 = vrot.lane.b32.xlu1 %v1473_v31, %s1381_s6  ;;  %vm594_vm8 = vcmp.ne.s16.totalorder %v593_v40, 0 }
  0xa6   : > { %v600_v46 = vsel %vm594_vm8, %v1467_v27, 0 }
  0xa8   : > { %747 = vrot.lane.b32.xlu0 %v728_v41, %s1381_s6  ;;  %v586_v41 = vld [vmem:[#allocation2 + $0x20] sm:$0xf] }
  0xa9   : > { %745 = vrot.lane.b32.xlu1 %v1476_v33, %s1381_s6  ;;  %v601_v42 = vsel %vm1570_vm7, %v586_v41, 0 }
  0xac   : > { %550 = vrot.lane.b32.xlu0 %v529_v43, %s1382_s7  ;;  %v670_v43 = vsel %vm666_vm4, %v1476_v33, 0  ;;  %vm838_vm4 = vcmask 769024  }
  0xad   : > { %548 = vrot.lane.b32.xlu1 %v1467_v27, %s1382_s7 }
  0xb0   : > { %554 = vrot.lane.b32.xlu0 %v531_v45, %s1382_s7  ;;  %v603_v45 = vsel %vm1570_vm7, %v588_v44, 0 }
  0xb1   : > { %552 = vrot.lane.b32.xlu1 %v1470_v29, %s1382_s7 }
  0xb4   : > { %542 = vrot.lane.b32.xlu0 %v525_v47, %s1382_s7  ;;  %v582_v47 = vld [vmem:[#allocation2 + $0x8] sm:$0xf] }
  0xb5   : > { %540 = vrot.lane.b32.xlu1 %v1473_v31, %s1382_s7  ;;  %v597_v49 = vsel %vm1570_vm7, %v582_v47, 0 }
  0xb8   : > { %493 = vrot.lane.b32.xlu0 %v472_v50, %s1383_s8  ;;  %v792_v50 = vrot.slane %v791_v48, 4 }
  0xb9   : > { %491 = vrot.lane.b32.xlu1 %v471_v51, %s1383_s8  ;;  %v602_v51 = vsel %vm594_vm8, %v1470_v29, 0 }
  0xba   : > { %vm1598_vm10 = vcmp.ne.s16.totalorder %v792_v50, 0  ;;  %v794_v56 = vsel %vm793_vm9, %v792_v50, %v791_v48 }
  0xbb   : > { %vm795_vm11 = vcmp.ne.s16.totalorder %v794_v56, 0  ;;  %v804_v61 = vsel %vm1598_vm10, %v789_v60, 0 }
  0xbc   : > { %497 = vrot.lane.b32.xlu0 %v474_v54, %s1383_s8  ;;  %v803_v4 = vsel %vm795_vm11, %v1470_v29, 0  ;;  %v797_v13 = vsel %vm795_vm11, %v1473_v31, 0  ;;  %v799_v24 = vsel %vm795_vm11, %v1476_v33, 0 }
  0xbd   : > { %495 = vrot.lane.b32.xlu1 %v473_v55, %s1383_s8  ;;  %v596_v55 = vsel %vm594_vm8, %v1473_v31, 0 }
  0xc0   : > { %485 = vrot.lane.b32.xlu0 %v468_v58, %s1383_s8  ;;  %v802_v58 = vsel %vm1598_vm10, %v787_v57, 0 }
  0xc1   : > { %483 = vrot.lane.b32.xlu1 %v467_v59, %s1383_s8  ;;  %v598_v59 = vsel %vm594_vm8, %v1476_v33, 0 }
  0xc4   : > { %489 = vrot.lane.b32.xlu0 %v470_v62, %s1383_s8  ;;  %v801_v62 = vsel %vm795_vm11, %v1467_v27, 0 }
  0xc5   : > { %487 = vrot.lane.b32.xlu1 %v469_v0, %s1383_s8 }
  0xc8   : > { %420 = vrot.lane.b32.xlu0 %v399_v2, %s1384_s9  ;;  %v527_v2 = vld [vmem:[#allocation2 + $0x14] sm:$0xf] }
  0xc9   : > { %418 = vrot.lane.b32.xlu1 %v398_v3, %s1384_s9 }
  0xcc   : > { %424 = vrot.lane.b32.xlu0 %v401_v5, %s1384_s9  ;;  %v783_v5 = vld [vmem:[#allocation2 + $0x8] sm:$0xf] }
  0xcd   : > { %422 = vrot.lane.b32.xlu1 %v400_v6, %s1384_s9  ;;  %v1363_v6 = vld [vmem:[%s1813_s2 + $0x4] ss:$12 sps:$4 sm:$0xff]  }
  0xce   : > { %1137 = vmatprep.mubr.bf16.mxu0 %v1363_v6 }
  0xd0   : > { %412 = vrot.lane.b32.xlu0 %v395_v9, %s1384_s9 }
  0xd1   : > { %410 = vrot.lane.b32.xlu1 %v394_v12, %s1384_s9  ;;  %v798_v12 = vsel %vm1598_vm10, %v783_v5, 0 }
  0xd4   : > { %416 = vrot.lane.b32.xlu0 %v397_v14, %s1384_s9  ;;  %v785_v14 = vld [vmem:[#allocation2 + $0x14] sm:$0xf] }
  0xd5   : > { %414 = vrot.lane.b32.xlu1 %v396_v16, %s1384_s9  ;;  %v800_v20 = vsel %vm1598_vm10, %v785_v14, 0 }
  0xd8   : > { %694 = vrot.lane.b32.xlu0 %v673_v19, %s1385_s10 }
  0xd9   : > { %544 = vrot.lane.b32.xlu1 %v1476_v33, %s1382_s7 }
  0xdc   : > { %698 = vrot.lane.b32.xlu0 %v675_v21, %s1385_s10 }
  0xdd   : > { %692 = vrot.lane.b32.xlu1 %v672_v22, %s1385_s10 }
  0xe0   : > { %686 = vrot.lane.b32.xlu0 %v669_v25, %s1385_s10  ;;  %v895_v25 = vld [vmem:[%s1814_s3 + $0x8] sm:$0xff] }
  0xe1   : > { %696 = vrot.lane.b32.xlu1 %v674_v28, %s1385_s10 }
  0xe4   : > { %690 = vrot.lane.b32.xlu0 %v671_v32, %s1385_s10 }
  0xe5   : > { %684 = vrot.lane.b32.xlu1 %v668_v35, %s1385_s10 }
  0xe8   : > { %622 = vrot.lane.b32.xlu0 %v601_v42, %s1386_s11 }
  0xe9   : > { %688 = vrot.lane.b32.xlu1 %v670_v43, %s1385_s10 }
  0xec   : > { %626 = vrot.lane.b32.xlu0 %v603_v45, %s1386_s11 }
  0xed   : > { %620 = vrot.lane.b32.xlu1 %v600_v46, %s1386_s11 }
  0xf0   : > { %614 = vrot.lane.b32.xlu0 %v597_v49, %s1386_s11 }
  0xf1   : > { %624 = vrot.lane.b32.xlu1 %v602_v51, %s1386_s11 }
  0xf4   : > { %618 = vrot.lane.b32.xlu0 %v599_v53, %s1386_s11 }
  0xf5   : > { %612 = vrot.lane.b32.xlu1 %v596_v55, %s1386_s11 }
  0xf8   : > { %823 = vrot.lane.b32.xlu0 %v802_v58, %s1387_s12 }
  0xf9   : > { %616 = vrot.lane.b32.xlu1 %v598_v59, %s1386_s11 }
  0xfc   : > { %827 = vrot.lane.b32.xlu0 %v804_v61, %s1387_s12 }
  0xfd   : > { %821 = vrot.lane.b32.xlu1 %v801_v62, %s1387_s12 }
  0xfe   : > { %v346_v63 = vpop.permute.xlu0 %345 }
  0xff   : > { %v356_v0 = vrot.slane %v346_v63, 4  ;;  %v344_v1 = vpop.permute.xlu1 %343 }
 0x100   : > { %v355_v3 = vrot.slane %v344_v1, 4  ;;  %546 = vrot.lane.b32.xlu0 %v527_v2, %s1382_s7 }
 0x101   : > { %825 = vrot.lane.b32.xlu1 %v803_v4, %s1387_s12 }
 0x102   : > { %v365_v27 = vsel %vm359_vm12, %v355_v3, %v356_v0  ;;  %v350_v7 = vpop.permute.xlu0 %349 }
 0x103   : > { %v1627_v8 = vsel %vm361_vm13, %v344_v1, %v365_v27  ;;  %v358_v9 = vrot.slane %v350_v7, 4  ;;  %v348_v11 = vpop.permute.xlu1 %347 }
 0x104   : > { %v357_v29 = vrot.slane %v348_v11, 4  ;;  %815 = vrot.lane.b32.xlu0 %v798_v12, %s1387_s12 }
 0x105   : > { %813 = vrot.lane.b32.xlu1 %v797_v13, %s1387_s12 }
 0x106   : > { %v367_v15 = vsel %vm359_vm12, %v357_v29, %v358_v9  ;;  %v338_v16 = vpop.permute.xlu0 %337 }
 0x107   : > { %v1637_v17 = vsel %vm361_vm13, %v348_v11, %v367_v15  ;;  %v352_v18 = vrot.slane %v338_v16, 4  ;;  %v336_v19 = vpop.permute.xlu1 %335 }
 0x108   : > { %v1296_v21 = vcombine.low %v1627_v8, %v1637_v17  ;;  %v1297_v22 = vcombine.high %v1627_v8, %v1637_v17  ;;  %v351_v23 = vrot.slane %v336_v19, 4  ;;  %819 = vrot.lane.b32.xlu0 %v800_v20, %s1387_s12  ;;  %v312_v8 = vsel %vm1441_vm6, %v1476_v33, 0 }
 0x109   : > { %817 = vrot.lane.b32.xlu1 %v799_v24, %s1387_s12 }
 0x10a   : > { %v360_v26 = vsel %vm359_vm12, %v351_v23, %v352_v18  ;;  %v342_v28 = vpop.permute.xlu0 %341 }
 0x10b   : > { %v1657_v32 = vsel %vm361_vm13, %v336_v19, %v360_v26  ;;  %v354_v34 = vrot.slane %v342_v28, 4  ;;  %v340_v35 = vpop.permute.xlu1 %339 }
 0x10c   : > { %v353_v40 = vrot.slane %v340_v35, 4  ;;  %903 = vperm.xlu0 %1360, %v895_v25  }
 0x10d   : > { %898 = vperm.xlu1 %1359, %v894_v30  }
 0x10e   : > { %v363_v41 = vsel %vm359_vm12, %v353_v40, %v354_v34  ;;  %v752_v42 = vpop.permute.xlu0 %751 }
 0x10f   : > { %v1661_v43 = vsel %vm361_vm13, %v340_v35, %v363_v41  ;;  %v762_v44 = vrot.slane %v752_v42, 4  ;;  %v750_v45 = vpop.permute.xlu1 %749 }
 0x110   : > { %v1294_v46 = vcombine.low %v1657_v32, %v1661_v43  ;;  %v1295_v47 = vcombine.high %v1657_v32, %v1661_v43  ;;  %v761_v48 = vrot.slane %v750_v45, 4 }
 0x112   : > { %v770_v49 = vsel %vm359_vm12, %v761_v48, %v762_v44  ;;  %v756_v50 = vpop.permute.xlu0 %755 }
 0x113   : > { %v1669_v51 = vsel %vm766_vm14, %v750_v45, %v770_v49  ;;  %v764_v52 = vrot.slane %v756_v50, 4  ;;  %v754_v53 = vpop.permute.xlu1 %753 }
 0x114   : > { %v763_v54 = vrot.slane %v754_v53, 4 }
 0x116   : > { %v772_v55 = vsel %vm359_vm12, %v763_v54, %v764_v52  ;;  %v744_v56 = vpop.permute.xlu0 %743 }
 0x117   : > { %v1673_v57 = vsel %vm766_vm14, %v754_v53, %v772_v55  ;;  %v758_v58 = vrot.slane %v744_v56, 4  ;;  %v742_v59 = vpop.permute.xlu1 %741 }
 0x118   : > { %v1320_v60 = vcombine.low %v1669_v51, %v1673_v57  ;;  %v1321_v61 = vcombine.high %v1669_v51, %v1673_v57  ;;  %v757_v62 = vrot.slane %v742_v59, 4 }
 0x11a   : > { %v765_v63 = vsel %vm359_vm12, %v757_v62, %v758_v58  ;;  %v748_v0 = vpop.permute.xlu0 %747 }
 0x11b   : > { %v1681_v1 = vsel %vm766_vm14, %v742_v59, %v765_v63  ;;  %v760_v2 = vrot.slane %v748_v0, 4  ;;  %v746_v3 = vpop.permute.xlu1 %745 }
 0x11c   : > { %v759_v4 = vrot.slane %v746_v3, 4 }
 0x11e   : > { %v768_v5 = vsel %vm359_vm12, %v759_v4, %v760_v2  ;;  %v551_v6 = vpop.permute.xlu0 %550 }
 0x11f   : > { %v1685_v27 = vsel %vm766_vm14, %v746_v3, %v768_v5  ;;  %v561_v7 = vrot.slane %v551_v6, 4  ;;  %v549_v9 = vpop.permute.xlu1 %548 }
 0x120   : > { %v1318_v11 = vcombine.low %v1681_v1, %v1685_v27  ;;  %v1319_v12 = vcombine.high %v1681_v1, %v1685_v27  ;;  %v560_v29 = vrot.slane %v549_v9, 4 }
 0x122   : > { %v569_v13 = vsel %vm359_vm12, %v560_v29, %v561_v7  ;;  %v555_v14 = vpop.permute.xlu0 %554 }
 0x123   : > { %v1693_v15 = vsel %vm565_vm15, %v549_v9, %v569_v13  ;;  %v563_v16 = vrot.slane %v555_v14, 4  ;;  %v553_v18 = vpop.permute.xlu1 %552 }
 0x124   : > { %v562_v19 = vrot.slane %v553_v18, 4 }
 0x126   : > { %v571_v20 = vsel %vm359_vm12, %v562_v19, %v563_v16  ;;  %v543_v23 = vpop.permute.xlu0 %542 }
 0x127   : > { %v1697_v24 = vsel %vm565_vm15, %v553_v18, %v571_v20  ;;  %v557_v25 = vrot.slane %v543_v23, 4  ;;  %v541_v26 = vpop.permute.xlu1 %540 }
 0x128   : > { %v1308_v28 = vcombine.low %v1693_v15, %v1697_v24  ;;  %v1309_v30 = vcombine.high %v1693_v15, %v1697_v24  ;;  %v556_v34 = vrot.slane %v541_v26, 4 }
 0x12a   : > { %v564_v35 = vsel %vm359_vm12, %v556_v34, %v557_v25  ;;  %v494_v40 = vpop.permute.xlu0 %493 }
 0x12b   : > { %v1705_v41 = vsel %vm565_vm15, %v541_v26, %v564_v35  ;;  %v492_v42 = vpop.permute.xlu1 %491  ;;  %v504_v44 = vrot.slane %v494_v40, 4 }
 0x12c   : > { %v503_v45 = vrot.slane %v492_v42, 4 }
 0x12e   : > { %v498_v48 = vpop.permute.xlu0 %497  ;;  %v512_v53 = vsel %vm359_vm12, %v503_v45, %v504_v44 }
 0x12f   : > { %v506_v49 = vrot.slane %v498_v48, 4  ;;  %v496_v50 = vpop.permute.xlu1 %495  ;;  %v513_v58 = vsel %vm508_vm0, %v492_v42, %v512_v53 }
 0x130   : > { %v505_v52 = vrot.slane %v496_v50, 4 }
 0x132   : > { %v486_v54 = vpop.permute.xlu0 %485  ;;  %v514_v55 = vsel %vm359_vm12, %v505_v52, %v506_v49 }
 0x133   : > { %v484_v56 = vpop.permute.xlu1 %483  ;;  %v515_v59 = vsel %vm508_vm0, %v496_v50, %v514_v55  ;;  %v500_v62 = vrot.slane %v486_v54, 4 }
 0x134   : > { %v499_v63 = vrot.slane %v484_v56, 4  ;;  %v1305_v0 = vcombine.high %v513_v58, %v515_v59  ;;  %v1304_v2 = vcombine.low %v513_v58, %v515_v59 }
 0x136   : > { %v490_v3 = vpop.permute.xlu0 %489  ;;  %1105 = vmatprep.subr.bf16.mxu0 %v1305_v0  ;;  %v507_v6 = vsel %vm359_vm12, %v499_v63, %v500_v62 }
 0x137   : > { %v502_v4 = vrot.slane %v490_v3, 4  ;;  %1106 = vmatpush1.bf16.msra.mxu0 %v1304_v2  ;;  %v488_v5 = vpop.permute.xlu1 %487  ;;  %v509_v13 = vsel %vm508_vm0, %v484_v56, %v507_v6 }
 0x138   : > { %v501_v7 = vrot.slane %v488_v5, 4 }
 0x13a   : > { %v510_v9 = vsel %vm359_vm12, %v501_v7, %v502_v4  ;;  %v421_v29 = vpop.permute.xlu0 %420 }
 0x13b   : > { %v511_v14 = vsel %vm508_vm0, %v488_v5, %v510_v9  ;;  %v419_v16 = vpop.permute.xlu1 %418  ;;  %v431_v20 = vrot.slane %v421_v29, 4 }
 0x13c   : > { %v1302_v18 = vcombine.low %v509_v13, %v511_v14  ;;  %v1303_v19 = vcombine.high %v509_v13, %v511_v14  ;;  %v430_v23 = vrot.slane %v419_v16, 4 }
 0x13e   : > { %v425_v25 = vpop.permute.xlu0 %424  ;;  %1107 = vmatprep.subr.bf16.mxu0 %v1303_v19  ;;  %v439_v35 = vsel %vm359_vm12, %v430_v23, %v431_v20 }
 0x13f   : > { %v433_v26 = vrot.slane %v425_v25, 4  ;;  %1108 = vmatpush1.bf16.msra.mxu0 %v1302_v18  ;;  %v423_v34 = vpop.permute.xlu1 %422  ;;  %v440_v45 = vsel %vm435_vm1, %v419_v16, %v439_v35 }
 0x140   : > { %v432_v40 = vrot.slane %v423_v34, 4 }
 0x142   : > { %v441_v42 = vsel %vm359_vm12, %v432_v40, %v433_v26  ;;  %v413_v44 = vpop.permute.xlu0 %412 }
 0x143   : > { %v442_v48 = vsel %vm435_vm1, %v423_v34, %v441_v42  ;;  %v411_v49 = vpop.permute.xlu1 %410  ;;  %v427_v53 = vrot.slane %v413_v44, 4 }
 0x144   : > { %v1300_v50 = vcombine.low %v440_v45, %v442_v48  ;;  %v1301_v52 = vcombine.high %v440_v45, %v442_v48  ;;  %v426_v54 = vrot.slane %v411_v49, 4 }
 0x146   : > { %v417_v55 = vpop.permute.xlu0 %416  ;;  %1109 = vmatprep.subr.bf16.mxu0 %v1301_v52  ;;  %v434_v59 = vsel %vm359_vm12, %v426_v54, %v427_v53 }
 0x147   : > { %v429_v56 = vrot.slane %v417_v55, 4  ;;  %1110 = vmatpush1.bf16.msra.mxu0 %v1300_v50  ;;  %v415_v58 = vpop.permute.xlu1 %414  ;;  %v436_v2 = vsel %vm435_vm1, %v411_v49, %v434_v59 }
 0x148   : > { %v428_v62 = vrot.slane %v415_v58, 4 }
 0x14a   : > { %v437_v63 = vsel %vm359_vm12, %v428_v62, %v429_v56  ;;  %v695_v0 = vpop.permute.xlu0 %694 }
 0x14b   : > { %v438_v3 = vsel %vm435_vm1, %v415_v58, %v437_v63  ;;  %v1723_v4 = vpop.permute.xlu1 %544  ;;  %v705_v33 = vrot.slane %v695_v0, 4 }
 0x14c   : > { %v1298_v5 = vcombine.low %v436_v2, %v438_v3  ;;  %v1299_v6 = vcombine.high %v436_v2, %v438_v3 }
 0x14e   : > { %v699_v7 = vpop.permute.xlu0 %698  ;;  %1111 = vmatprep.subr.bf16.mxu0 %v1299_v6 }
 0x14f   : > { %1112 = vmatpush1.bf16.msra.mxu0 %v1298_v5  ;;  %v693_v9 = vpop.permute.xlu1 %692 }
 0x150   : > { %1113 = vmatprep.subr.bf16.mxu0 %v1297_v22  ;;  %v311_v22 = vsel %vm1441_vm6, %v1473_v31, 0  ;;  %v704_v31 = vrot.slane %v693_v9, 4  ;;  %vm709_vm6 = vcmask 785408  }
 0x152   : > { %v687_v29 = vpop.permute.xlu0 %686  ;;  %v713_v36 = vsel %vm359_vm12, %v704_v31, %v705_v33 }
 0x153   : > { %1114 = vmatpush1.bf16.msra.mxu0 %v1296_v21  ;;  %v697_v13 = vpop.permute.xlu1 %696  ;;  %v1291_v21 = vcombine.high %v311_v22, %v312_v8  ;;  %v701_v26 = vrot.slane %v687_v29, 4 }
 0x154   : > { %1115 = vmatprep.subr.bf16.mxu0 %v1295_v47  ;;  %v706_v43 = vrot.slane %v697_v13, 4  ;;  %v707_v47 = vrot.slane %v699_v7, 4 }
 0x156   : > { %v691_v14 = vpop.permute.xlu0 %690  ;;  %v715_v19 = vsel %vm359_vm12, %v706_v43, %v707_v47 }
 0x157   : > { %1116 = vmatpush1.bf16.msra.mxu0 %v1294_v46  ;;  %v685_v16 = vpop.permute.xlu1 %684  ;;  %v1290_v46 = vcombine.low %v311_v22, %v312_v8  ;;  %v703_v37 = vrot.slane %v691_v14, 4  ;;  %v716_v23 = vsel %vm709_vm6, %v697_v13, %v715_v19  ;;  %v558_v22 = vrot.slane %v1723_v4, 4 }
 0x158   : > { %1117 = vmatprep.subr.bf16.mxu0 %v1293_v38  ;;  %v700_v38 = vrot.slane %v685_v16, 4 }
 0x15a   : > { %v623_v17 = vpop.permute.xlu0 %622  ;;  %v708_v42 = vsel %vm359_vm12, %v700_v38, %v701_v26 }
 0x15b   : > { %1118 = vmatpush1.bf16.msra.mxu0 %v1292_v39  ;;  %v689_v32 = vpop.permute.xlu1 %688  ;;  %v710_v50 = vsel %vm709_vm6, %v685_v16, %v708_v42 }
 0x15c   : > { %1119 = vmatprep.subr.bf16.mxu0 %v1291_v21  ;;  %v702_v20 = vrot.slane %v689_v32, 4 }
 0x15e   : > { %v627_v18 = vpop.permute.xlu0 %626  ;;  %v711_v34 = vsel %vm359_vm12, %v702_v20, %v703_v37 }
 0x15f   : > { %1120 = vmatpush1.bf16.msra.mxu0 %v1290_v46  ;;  %v621_v10 = vpop.permute.xlu1 %620  ;;  %v635_v44 = vrot.slane %v627_v18, 4  ;;  %v712_v51 = vsel %vm709_vm6, %v689_v32, %v711_v34 }
 0x160   : > { %1121 = vmatprep.subr.bf16.mxu0 %v1321_v61  ;;  %v714_v61 = vsel %vm709_vm6, %v693_v9, %v713_v36  ;;  %v632_v45 = vrot.slane %v621_v10, 4  ;;  %v1315_v52 = vcombine.high %v710_v50, %v712_v51  ;;  %v1314_v59 = vcombine.low %v710_v50, %v712_v51 }
 0x161   : > { %v1317_v40 = vcombine.high %v714_v61, %v716_v23 }
 0x162   : > { %v615_v39 = vpop.permute.xlu0 %614 }
 0x163   : > { %1122 = vmatpush2.bf16.msra.mxu0 %v1320_v60  ;;  %v625_v25 = vpop.permute.xlu1 %624  ;;  %v633_v60 = vrot.slane %v623_v17, 4  ;;  %v629_v1 = vrot.slane %v615_v39, 4 }
 0x164   : > { %v634_v35 = vrot.slane %v625_v25, 4  ;;  %1123 = vmatprep.subr.bf16.mxu0 %v1319_v12  ;;  %v1316_v12 = vcombine.low %v714_v61, %v716_v23 }
 0x165   : > { %v641_v53 = vsel %vm359_vm12, %v632_v45, %v633_v60 }
 0x166   : > { %v619_v48 = vpop.permute.xlu0 %618  ;;  %v643_v49 = vsel %vm359_vm12, %v634_v35, %v635_v44  ;;  %v642_v62 = vsel %vm637_vm3, %v621_v10, %v641_v53 }
 0x167   : > { %1124 = vmatpush2.bf16.msra.mxu0 %v1318_v11  ;;  %v613_v57 = vpop.permute.xlu1 %612  ;;  %v644_v56 = vsel %vm637_vm3, %v625_v25, %v643_v49  ;;  %v631_v27 = vrot.slane %v619_v48, 4 }
 0x168   : > { %1125 = vmatprep.subr.bf16.mxu0 %v1317_v40  ;;  %v628_v54 = vrot.slane %v613_v57, 4  ;;  %v1313_v63 = vcombine.high %v642_v62, %v644_v56  ;;  %v1312_v9 = vcombine.low %v642_v62, %v644_v56  ;;  %v1361_v40 = vld [vmem:[%s1813_s2] ss:$12 sps:$4 sm:$0xff]  }
 0x16a   : > { %v824_v55 = vpop.permute.xlu0 %823  ;;  %v636_v0 = vsel %vm359_vm12, %v628_v54, %v629_v1 }
 0x16b   : > { %1126 = vmatpush2.bf16.msra.mxu0 %v1316_v12  ;;  %v617_v58 = vpop.permute.xlu1 %616  ;;  %v638_v29 = vsel %vm637_vm3, %v613_v57, %v636_v0  ;;  %v834_v13 = vrot.slane %v824_v55, 4 }
 0x16c   : > { %v630_v11 = vrot.slane %v617_v58, 4  ;;  %1127 = vmatprep.subr.bf16.mxu0 %v1315_v52 }
 0x16e   : > { %v639_v2 = vsel %vm359_vm12, %v630_v11, %v631_v27  ;;  %v828_v3 = vpop.permute.xlu0 %827 }
 0x16f   : > { %v640_v5 = vsel %vm637_vm3, %v617_v58, %v639_v2  ;;  %1128 = vmatpush2.bf16.msra.mxu0 %v1314_v59  ;;  %v822_v6 = vpop.permute.xlu1 %821  ;;  %v836_v21 = vrot.slane %v828_v3, 4 }
 0x170   : > { %v833_v7 = vrot.slane %v822_v6, 4  ;;  %1129 = vmatprep.subr.bf16.mxu0 %v1313_v63  ;;  %v1311_v14 = vcombine.high %v638_v29, %v640_v5  ;;  %v1310_v46 = vcombine.low %v638_v29, %v640_v5 }
 0x172   : > { %v547_v16 = vpop.permute.xlu0 %546  ;;  %v842_v43 = vsel %vm359_vm12, %v833_v7, %v834_v13 }
 0x173   : > { %v559_v8 = vrot.slane %v547_v16, 4  ;;  %1130 = vmatpush2.bf16.msra.mxu0 %v1312_v9  ;;  %v826_v17 = vpop.permute.xlu1 %825  ;;  %v843_v33 = vsel %vm838_vm4, %v822_v6, %v842_v43 }
 0x174   : > { %v835_v32 = vrot.slane %v826_v17, 4  ;;  %1131 = vmatprep.subr.bf16.mxu0 %v1311_v14 }
 0x175   : > { %v567_v47 = vsel %vm359_vm12, %v558_v22, %v559_v8 }
 0x176   : > { %v816_v31 = vpop.permute.xlu0 %815  ;;  %v844_v18 = vsel %vm359_vm12, %v835_v32, %v836_v21  ;;  %v568_v20 = vsel %vm565_vm15, %v1723_v4, %v567_v47 }
 0x177   : > { %1132 = vmatpush2.bf16.msra.mxu0 %v1310_v46  ;;  %v814_v10 = vpop.permute.xlu1 %813  ;;  %v845_v19 = vsel %vm838_vm4, %v826_v17, %v844_v18  ;;  %v830_v36 = vrot.slane %v816_v31, 4  ;;  %v1307_v25 = vcombine.high %v1705_v41, %v568_v20  ;;  %v1306_v61 = vcombine.low %v1705_v41, %v568_v20 }
 0x178   : > { %v829_v37 = vrot.slane %v814_v10, 4  ;;  %1133 = vmatprep.subr.bf16.mxu0 %v1309_v30  ;;  %v1325_v38 = vcombine.high %v843_v33, %v845_v19  ;;  %v1324_v39 = vcombine.low %v843_v33, %v845_v19 }
 0x17a   : > { %v820_v23 = vpop.permute.xlu0 %819  ;;  %1160 = vmatprep.subr.bf16.mxu1 %v1325_v38  ;;  %v837_v4 = vsel %vm359_vm12, %v829_v37, %v830_v36 }
 0x17b   : > { %v832_v26 = vrot.slane %v820_v23, 4  ;;  %1134 = vmatpush2.bf16.msra.mxu0 %v1308_v28  ;;  %1161 = vmatpush1.bf16.msra.mxu1 %v1324_v39  ;;  %v818_v34 = vpop.permute.xlu1 %817  ;;  %v839_v42 = vsel %vm838_vm4, %v814_v10, %v837_v4  ;;  %v1364_v28 = vld [vmem:[%s1813_s2 + $0x8] ss:$12 sps:$4 sm:$0xff]  }
 0x17c   : > { %v831_v35 = vrot.slane %v818_v34, 4  ;;  %1135 = vmatprep.subr.bf16.mxu0 %v1307_v25 }
 0x17e   : > { %v840_v30 = vsel %vm359_vm12, %v831_v35, %v832_v26 }
 0x17f   : > { %v841_v44 = vsel %vm838_vm4, %v818_v34, %v840_v30  ;;  %1136 = vmatpush2.bf16.msra.mxu0 %v1306_v61 }
 0x180   : > { %v1322_v15 = vcombine.low %v839_v42, %v841_v44  ;;  %v1323_v24 = vcombine.high %v839_v42, %v841_v44 }
 0x182   : > { %1138 = vmatmul.mubr.bf16.vlgmr.msra.gmra.mxu0 %v1361_v40  ;;  %1162 = vmatprep.subr.bf16.mxu1 %v1323_v24 }
 0x183   : > { %1163 = vmatpush1.bf16.msra.mxu1 %v1322_v15 }
 0x186   : > { %1326 = vmatmul.mubr.msk.bf16.vlgmr.msra.gmra.mxu1 %vm664_vm2, %v1364_v28 }
 0x187   : > { %v904_v57 = vpop.permute.xlu0 %903 }
 0x188   : > { %v899_v41 = vpop.permute.xlu1 %898 }
 0x242   : > { %v1139_v45 = vpop.f32.mrf.mxu0 }
 0x243   : > { %v1140_v48 = vadd.f32 %v1139_v45, %v899_v41 }
 0x244   : > { %v1141_v51 = vpop.f32.mrf.mxu0 }
 0x245   : > { %v1142_v12 = vadd.f32 %v1141_v51, %v899_v41 }
 0x246   : > { %v1143_v60 = vpop.f32.mrf.mxu0  ;;  %v1182_v49 = vpop.f32.mrf.mxu1 }
 0x247   : > { %v1183_v50 = vadd.f32 %v1182_v49, %v1140_v48  ;;  %v1144_v54 = vadd.f32 %v1143_v60, %v904_v57 }
 0x248   : > { %v1145_v52 = vpop.f32.mrf.mxu0  ;;  %v1184_v53 = vpop.f32.mrf.mxu1 }
 0x249   : > { %v1185_v55 = vadd.f32 %v1184_v53, %v1142_v12  ;;  %v1191_v58 = vmax.f32 %v1183_v50, 0.0  ;;  %v1146_v1 = vadd.f32 %v1145_v52, %v904_v57 }
 0x24a   : > { %v1186_v56 = vpop.f32.mrf.mxu1 }
 0x24b   : > { %v1192_v27 = vmax.f32 %v1185_v55, 0.0  ;;  %v1187_v11 = vadd.f32 %v1186_v56, %v1144_v54 }
 0x24c   : > { %v1188_v59 = vpop.f32.mrf.mxu1 }
 0x24d   : > { %v1334_v62 = vpack.c.bf16 %v1192_v27, %v1191_v58  ;;  %v1189_v63 = vadd.f32 %v1188_v59, %v1146_v1  ;;  %v1193_v0 = vmax.f32 %v1187_v11, 0.0 }
 0x24f   : > { %1207 = vst [vmem:[%s217_s27] sm:$0xff] %v1334_v62  ;;  %v1194_v2 = vmax.f32 %v1189_v63, 0.0 }
 0x251   : > { %v1335_v3 = vpack.c.bf16 %v1194_v2, %v1193_v0 }
 0x253   : > { %1208 = vst [vmem:[%s217_s27 + $0x8] sm:$0xff] %v1335_v3 }
 0x254 PF: > { %s14_s15 = sadd.s32 1, %s1371_s15  }
 0x255   : > { %p11_p4 = scmp.ge.s32.totalorder %s14_s15, 4  }
 0x257   :  { %13 = sbr.rel (!%p11_p4) target bundleno = 1 (0x1), region = 69 }

</bundles_post_ra>
